<compile_context>
chip_gen: v7x
topology: tpu7x:2x2x1
jax: 0.10.0
libtpu: 0.0.40
codegen_flags: <defaults>
</compile_context>

<pallas_src>
import functools

import jax
import jax.numpy as jnp
from jax.experimental import pallas as pl
from jax.experimental.pallas import tpu as pltpu

LANE = 128


def _round_up(x, m):
    return ((x + m - 1) // m) * m


def _vmem_limit(est_bytes):
    """Raise the scoped-VMEM limit above the default only when the working set
    needs it; clamp below v7x's 64 MiB physical VMEM."""
    if est_bytes <= 24 * 1024 * 1024:
        return None
    return int(min(est_bytes, 56 * 1024 * 1024))


def _pad_gate_cols(w, h, hp):
    """(..., 4*h) -> (..., 4*hp): zero-pad each of the 4 fused gate blocks so
    the per-gate slices inside the kernel land on 128-lane boundaries."""
    if hp == h:
        return w
    w4 = w.reshape(w.shape[:-1] + (4, h))
    w4 = jnp.pad(w4, [(0, 0)] * (w4.ndim - 1) + [(0, hp - h)])
    return w4.reshape(w.shape[:-1] + (4 * hp,))


# ----------------------------------------------------------------------------
# Fused, time-chunked bidirectional LSTM recurrence.
# The input projection (x @ W_ih + b_ih + b_hh) is hoisted outside; per step
# only h_prev @ W_hh (one fused (B,Hp)@(Hp,4Hp) matmul) + elementwise remain.
# Each grid step processes TT forward steps and TT backward steps (reversed).
# ----------------------------------------------------------------------------
def _bilstm_kernel(gxf_ref, gxb_ref, whhf_ref, whhb_ref, outf_ref, outb_ref,
                   hf_sc, cf_sc, hb_sc, cb_sc):
    @pl.when(pl.program_id(0) == 0)
    def _():
        hf_sc[...] = jnp.zeros_like(hf_sc)
        cf_sc[...] = jnp.zeros_like(cf_sc)
        hb_sc[...] = jnp.zeros_like(hb_sc)
        cb_sc[...] = jnp.zeros_like(cb_sc)

    whh_f = whhf_ref[...]
    whh_b = whhb_ref[...]
    Hp = whh_f.shape[0]
    TT = gxf_ref.shape[0]

    def cell(gx, h, c, whh):
        gates = gx + jnp.dot(h, whh, preferred_element_type=jnp.float32)
        i_g = jax.nn.sigmoid(gates[:, 0 * Hp:1 * Hp])
        f_g = jax.nn.sigmoid(gates[:, 1 * Hp:2 * Hp])
        g_g = jnp.tanh(gates[:, 2 * Hp:3 * Hp])
        o_g = jax.nn.sigmoid(gates[:, 3 * Hp:4 * Hp])
        c_new = f_g * c + i_g * g_g
        h_new = o_g * jnp.tanh(c_new)
        return h_new, c_new

    hf, cf = hf_sc[...], cf_sc[...]
    hb, cb = hb_sc[...], cb_sc[...]
    # Fully-unrolled time chunk: amortizes per-grid-step overhead and lets the
    # scheduler interleave the two independent recurrence chains.
    for i in range(TT):
        hf, cf = cell(gxf_ref[i], hf, cf, whh_f)
        outf_ref[i] = hf
        j = TT - 1 - i
        hb, cb = cell(gxb_ref[j], hb, cb, whh_b)
        outb_ref[j] = hb
    hf_sc[...], cf_sc[...] = hf, cf
    hb_sc[...], cb_sc[...] = hb, cb


def bilstm_layer(x_parts, layer, *, time_chunk=16):
    """One bidirectional LSTM layer.

    x_parts: list of (x, true_width) with x (T, B, W_k) float32; the layer's
    input features are the concatenation of x[..., :true_width] over the parts
    (columns beyond true_width are exactly zero).  Returns (out_f, out_b, H)
    where out_* is (T, B, Hp) with only the first H lanes meaningful (rest 0).
    """
    T, B, _ = x_parts[0][0].shape
    H = layer["w_hh_f"].shape[0]
    Hp = _round_up(H, LANE)
    G = 4 * Hp

    # Fused, lane-padded parameters (constant-folded under jit).
    w_ih = jnp.concatenate([_pad_gate_cols(layer["w_ih_f"], H, Hp),
                            _pad_gate_cols(layer["w_ih_b"], H, Hp)], axis=-1)
    bias = jnp.concatenate([_pad_gate_cols(layer["b_f"], H, Hp),
                            _pad_gate_cols(layer["b_b"], H, Hp)], axis=-1)
    whh_f = jnp.pad(_pad_gate_cols(layer["w_hh_f"], H, Hp), ((0, Hp - H), (0, 0)))
    whh_b = jnp.pad(_pad_gate_cols(layer["w_hh_b"], H, Hp), ((0, Hp - H), (0, 0)))

    # Hoisted input projection: one wide GEMM per input part (both directions
    # at once), summed -- consuming the previous layer's out_f / out_b as
    # separate parts means their concatenation is never materialized in HBM.
    gx = None
    row = 0
    for x, tw in x_parts:
        w_rows = w_ih[row:row + tw]
        if x.shape[-1] != tw:                       # part is stored lane-padded
            w_rows = jnp.pad(w_rows, ((0, x.shape[-1] - tw), (0, 0)))
        part = jnp.einsum("tbd,dg->tbg", x, w_rows,
                          preferred_element_type=jnp.float32)
        gx = part if gx is None else gx + part
        row += tw
    gx = gx + bias                                   # (T, B, 8Hp)

    # Time chunk: largest divisor of T not exceeding `time_chunk` (no time
    # padding -- it would perturb the backward direction's state).
    tt = min(time_chunk, T)
    while T % tt:
        tt -= 1
    n_chunks = T // tt

    est = (2 * 2 * tt * B * (G + Hp) * 4     # gate/output blocks, double buffered
           + 2 * 2 * Hp * G * 4              # W_hh fwd/bwd, double buffered
           + 4 * B * Hp * 4)                 # h/c scratch

    out_f, out_b = pl.pallas_call(
        _bilstm_kernel,
        out_shape=(jax.ShapeDtypeStruct((T, B, Hp), jnp.float32),
                   jax.ShapeDtypeStruct((T, B, Hp), jnp.float32)),
        grid_spec=pltpu.PrefetchScalarGridSpec(
            num_scalar_prefetch=0,
            grid=(n_chunks,),
            in_specs=[
                # The same (T, B, 8Hp) gate slab is passed twice; the two specs
                # select the fwd / bwd halves via the last-dim block index, so
                # no XLA slice copies are materialized.
                pl.BlockSpec((tt, B, G), lambda t: (t, 0, 0)),
                pl.BlockSpec((tt, B, G), lambda t: (n_chunks - 1 - t, 0, 1)),
                pl.BlockSpec((Hp, G), lambda t: (0, 0)),
                pl.BlockSpec((Hp, G), lambda t: (0, 0)),
            ],
            out_specs=[
                pl.BlockSpec((tt, B, Hp), lambda t: (t, 0, 0)),
                pl.BlockSpec((tt, B, Hp), lambda t: (n_chunks - 1 - t, 0, 0)),
            ],
            scratch_shapes=[
                pltpu.VMEM((B, Hp), jnp.float32),   # h fwd
                pltpu.VMEM((B, Hp), jnp.float32),   # c fwd
                pltpu.VMEM((B, Hp), jnp.float32),   # h bwd
                pltpu.VMEM((B, Hp), jnp.float32),   # c bwd
            ],
        ),
        compiler_params=pltpu.CompilerParams(
            dimension_semantics=("arbitrary",),
            vmem_limit_bytes=_vmem_limit(est)),
    )(gx, gx, whh_f, whh_b)

    return out_f, out_b, H


# ----------------------------------------------------------------------------
# SyntacticGCN (last layer) + tagger, fused.
# Per batch element (grid axis 0, parallel) and label chunk (axis 1, arbitrary):
#   agg = graph_chunk (Lc*N, N) @ [nodes | 1] (N, D+1)       bf16 MXU, f32 acc
#   h   = sum_l agg[l] @ [[W_l, 0], [b_l, 1]] (D+1, H+1)     f32 MXU
# so acc[:, :H] accumulates (h + bias) and acc[:, H] accumulates the degree
# normaliser.  Epilogue on the last chunk:
#   hidden = relu(acc[:, :H] / (acc[:, H] + 1e-10));  out = hidden @ Wtag + btag
# ----------------------------------------------------------------------------
def _gcn_tagger_kernel(graph_ref, nodes_ref, w_ref, wtag_ref, btag_ref,
                       out_ref, acc_ref):
    lc = pl.program_id(1)

    @pl.when(lc == 0)
    def _():
        acc_ref[...] = jnp.zeros_like(acc_ref)

    nodes = nodes_ref[...]                                   # (N, D+1) bf16
    N, Daug = nodes.shape
    Lc = w_ref.shape[0]

    # (1) Aggregation over neighbours for all labels of the chunk: one wide
    #     bf16 matmul.  The ones column of `nodes` makes the last output column
    #     the per-(label, node) degree (f32-accumulated, hence exact).
    agg = jnp.dot(graph_ref[...], nodes,
                  preferred_element_type=jnp.float32)        # (Lc*N, D+1)
    agg = agg.reshape(Lc, N, Daug)

    # (2) Label-batched weight matmul with the bias row / norm column folded
    #     into w_ref; the sum over labels is a cheap VPU reduction over Lc.
    h = jnp.einsum("lnd,ldh->lnh", agg, w_ref[...],
                   preferred_element_type=jnp.float32)       # (Lc, N, H+1)
    acc_ref[...] += jnp.sum(h, axis=0)

    # (3) Epilogue on the last chunk: ReLU(h / norm) -> tagger linear
    #     (lane-padded output -> unmasked stores).
    @pl.when(lc == pl.num_programs(1) - 1)
    def _():
        Hh = acc_ref.shape[-1] - 1
        acc = acc_ref[...]
        hidden = jnp.maximum(acc[:, :Hh] / (acc[:, Hh:] + 1e-10), 0.0)  # (N, H)
        out_ref[...] = (jnp.dot(hidden, wtag_ref[...],
                                preferred_element_type=jnp.float32)
                        + btag_ref[...])


def gcn_tagger(graph_g, nodes_aug, w_aug, w_tag_p, b_tag_p, *, label_chunks=1):
    """graph_g: (B, L*N, N) bf16 (label-major row blocks); nodes_aug: (B, N, D+1)
    bf16 with a trailing ones column; w_aug: (L, D+1, H+1) f32 with the bias row
    and norm column folded in; w_tag_p/b_tag_p: lane-padded tagger parameters.
    Returns (B, N, Cp) f32."""
    B, LN, N = graph_g.shape
    L = w_aug.shape[0]
    assert LN == L * N and L % label_chunks == 0
    Lc = L // label_chunks
    Daug = nodes_aug.shape[-1]
    Haug = w_aug.shape[-1]
    Hh, Cp = w_tag_p.shape

    est = (2 * Lc * N * N * 2              # graph blocks (bf16), double buffered
           + 2 * N * Daug * 2              # nodes
           + 2 * Lc * Daug * Haug * 4      # augmented GCN weights
           + 2 * (Hh * Cp + Cp) * 4        # tagger weights
           + 2 * N * Cp * 4                # output block
           + N * Haug * 4                  # accumulator scratch
           + Lc * N * (Daug + Haug) * 4)   # agg / h intermediates

    return pl.pallas_call(
        _gcn_tagger_kernel,
        out_shape=jax.ShapeDtypeStruct((B, N, Cp), jnp.float32),
        grid_spec=pltpu.PrefetchScalarGridSpec(
            num_scalar_prefetch=0,
            grid=(B, label_chunks),
            in_specs=[
                pl.BlockSpec((None, Lc * N, N), lambda bi, lc: (bi, lc, 0)),
                pl.BlockSpec((None, N, Daug), lambda bi, lc: (bi, 0, 0)),
                pl.BlockSpec((Lc, Daug, Haug), lambda bi, lc: (lc, 0, 0)),
                pl.BlockSpec((Hh, Cp), lambda bi, lc: (0, 0)),
                pl.BlockSpec((1, Cp), lambda bi, lc: (0, 0)),
            ],
            out_specs=pl.BlockSpec((None, N, Cp), lambda bi, lc: (bi, 0, 0)),
            scratch_shapes=[pltpu.VMEM((N, Haug), jnp.float32)],
        ),
        compiler_params=pltpu.CompilerParams(
            dimension_semantics=("parallel", "arbitrary"),
            vmem_limit_bytes=_vmem_limit(est)),
    )(graph_g, nodes_aug, w_aug, w_tag_p, b_tag_p)


def _build_w_aug(W, b):
    """Fold the GCN bias and the degree normaliser into the weight matmul:
        W_aug[l] = [[ W[l] , 0 ],
                    [ b[l] , 1 ]]          ((D+1, H+1) per label)
    so that (agg | degree) @ W_aug = (h + bias | norm)."""
    L, D, H = W.shape
    top = jnp.concatenate([W, jnp.zeros((L, D, 1), W.dtype)], axis=-1)
    bot = jnp.concatenate([b[:, None, :], jnp.ones((L, 1, 1), W.dtype)], axis=-1)
    return jnp.concatenate([top, bot], axis=1)


# ----------------------------------------------------------------------------
# Full model: embeddings (glue) -> fused biLSTM -> GCN + tagger (fused).
# ----------------------------------------------------------------------------
def gcn_segmenter_forward(params, word_ids, pos_ids, graph, masks=None,
                          *, time_chunk=16, label_chunks=1):
    # TODO(synk): masks / pack_padded_sequence length handling not implemented;
    # this reproduces the masks=None branch of the PyTorch forward.
    del masks

    word_e = jnp.take(params["word_emb"], word_ids, axis=0)      # (B, T, w2v)
    pos_e = jnp.take(params["pos_emb"], pos_ids, axis=0)         # (B, T, pos)
    rnn_in = jnp.concatenate([word_e, pos_e], axis=-1)           # (B, T, D_in)
    x_tm = jnp.transpose(rnn_in, (1, 0, 2)).astype(jnp.float32)  # (T, B, D_in)

    parts = [(x_tm, x_tm.shape[-1])]
    for layer in params["lstm"]:
        out_f, out_b, H = bilstm_layer(parts, layer, time_chunk=time_chunk)
        parts = [(out_f, H), (out_b, H)]

    # GCN nodes: concat(fwd, bwd, ones-column), batch-major, bf16 -- a single
    # fused XLA transpose/concat/cast (the batch-major re-layout is needed
    # anyway).  The ones column turns the per-(label, node) degree into an
    # extra MXU output column inside the kernel.
    (out_f, H), (out_b, _) = parts
    ones = jnp.ones(out_f.shape[:2] + (1,), jnp.float32)
    nodes_aug = jnp.concatenate([out_f[..., :H], out_b[..., :H], ones], axis=-1)
    nodes_aug = jnp.transpose(nodes_aug, (1, 0, 2)).astype(jnp.bfloat16)

    # Graph: {0,1} adjacency -> bf16 (exact), label-major / neighbour-minor so
    # the kernel aggregation is one plain 2-D MXU matmul per chunk.
    # TODO(synk): emit the graph in this layout upstream to remove this HBM
    # round trip of the model's largest tensor.
    B, N, _, L = graph.shape
    graph_g = jnp.transpose(graph.astype(jnp.bfloat16),
                            (0, 3, 1, 2)).reshape(B, L * N, N)

    # The reference loops over every GCN layer but overwrites gcn_outputs each
    # iteration, so only the last layer reaches the tagger -> run only it.
    g = params["gcns"][-1]
    w_aug = _build_w_aug(g["W"], g["b"])                         # (L, D+1, H+1)

    C = params["tag_W"].shape[-1]
    Cp = _round_up(C, LANE)
    w_tag_p = jnp.pad(params["tag_W"], ((0, 0), (0, Cp - C)))
    b_tag_p = jnp.pad(params["tag_b"], ((0, 0), (0, Cp - C)))

    out_p = gcn_tagger(graph_g, nodes_aug, w_aug, w_tag_p, b_tag_p,
                       label_chunks=label_chunks)                # (B, N, Cp)
    return out_p[..., :C]


# ----------------------------------------------------------------------------
# Deterministic parameter init (shapes follow the PyTorch module __init__,
# with LSTM gate matrices stored pre-fused as (D,4H)/(H,4H)/(1,4H)).
# ----------------------------------------------------------------------------
def init_params(key, *, word_vocab_size, w2v_size, pos_vocab_size, pos_size,
                hidden_size, rnn_layers, gcn_layers, num_labels, num_tags):
    H_dir = hidden_size // 2
    keys = iter(jax.random.split(key, 128))

    def uniform(shape, scale):
        return jax.random.uniform(next(keys), shape, jnp.float32, -scale, scale)

    params = {
        "word_emb": jax.random.normal(next(keys), (word_vocab_size, w2v_size),
                                      jnp.float32) * 0.1,
        "pos_emb": jax.random.normal(next(keys), (pos_vocab_size, pos_size),
                                     jnp.float32) * 0.1,
    }

    k_lstm = 1.0 / float(H_dir) ** 0.5
    lstm_layers = []
    d_in = w2v_size + pos_size
    for _ in range(rnn_layers):
        lstm_layers.append({
            # fused gate order (i|f|g|o); b = b_ih + b_hh combined.
            "w_ih_f": uniform((d_in, 4 * H_dir), k_lstm),
            "w_hh_f": uniform((H_dir, 4 * H_dir), k_lstm),
            "b_f": uniform((1, 4 * H_dir), k_lstm),
            "w_ih_b": uniform((d_in, 4 * H_dir), k_lstm),
            "w_hh_b": uniform((H_dir, 4 * H_dir), k_lstm),
            "b_b": uniform((1, 4 * H_dir), k_lstm),
        })
        d_in = hidden_size
    params["lstm"] = lstm_layers

    gcn_std = (2.0 / (hidden_size + hidden_size)) ** 0.5   # ~xavier_normal
    params["gcns"] = [{
        "W": jax.random.normal(next(keys),
                               (num_labels, hidden_size, hidden_size),
                               jnp.float32) * gcn_std,
        "b": jax.random.normal(next(keys), (num_labels, hidden_size),
                               jnp.float32) * gcn_std,
    } for _ in range(gcn_layers)]

    k_tag = 1.0 / float(hidden_size) ** 0.5
    params["tag_W"] = uniform((hidden_size, num_tags), k_tag)
    params["tag_b"] = uniform((1, num_tags), k_tag)
    return params


if __name__ == "__main__":
    # Small, module-consistent shapes.
    B, T = 2, 8                 # batch, sequence length (== n graph nodes)
    WORD_VOCAB, W2V_SIZE = 50, 34
    POS_VOCAB, POS_SIZE = 20, 30
    HIDDEN = 32
    RNN_LAYERS = 1
    GCN_LAYERS = 2
    NUM_LABELS = 3              # len(gcn_vocab)
    NUM_TAGS = 2                # len(tag_label)

    key = jax.random.PRNGKey(0)
    k_par, k_w, k_p, k_g = jax.random.split(key, 4)

    params = init_params(
        k_par,
        word_vocab_size=WORD_VOCAB, w2v_size=W2V_SIZE,
        pos_vocab_size=POS_VOCAB, pos_size=POS_SIZE,
        hidden_size=HIDDEN, rnn_layers=RNN_LAYERS, gcn_layers=GCN_LAYERS,
        num_labels=NUM_LABELS, num_tags=NUM_TAGS,
    )

    word_ids = jax.random.randint(k_w, (B, T), 0, WORD_VOCAB, jnp.int32)
    pos_ids = jax.random.randint(k_p, (B, T), 0, POS_VOCAB, jnp.int32)
    # Sparse labeled adjacency graph (B, N, N, L) of {0, 1}.
    graph = jax.random.bernoulli(k_g, 0.2, (B, T, T, NUM_LABELS)).astype(jnp.int32)

    fwd = jax.jit(functools.partial(gcn_segmenter_forward, params))
    tag_score = fwd(word_ids, pos_ids, graph)
    jax.block_until_ready(tag_score)

    assert tag_score.shape == (B, T, NUM_TAGS)
    assert tag_score.dtype == jnp.float32
    print("KERNEL_OK")
</pallas_src>

<mosaic_0001>
module attributes {stable_mosaic.version = 11 : i64} {
  func.func @_gcn_tagger_kernel(%arg0: i32, %arg1: i32, %arg2: memref<1x24x8xbf16, #tpu.memory_space<vmem>>, %arg3: memref<1x8x33xbf16, #tpu.memory_space<vmem>>, %arg4: memref<3x33x33xf32, #tpu.memory_space<vmem>>, %arg5: memref<32x128xf32, #tpu.memory_space<vmem>>, %arg6: memref<1x128xf32, #tpu.memory_space<vmem>>, %arg7: memref<1x8x128xf32, #tpu.memory_space<vmem>>, %arg8: memref<8x33xf32, #tpu.memory_space<vmem>>) attributes {dimension_semantics = [#tpu.dimension_semantics<parallel>, #tpu.dimension_semantics<arbitrary>], iteration_bounds = array<i64: 2, 1>, scalar_prefetch = 0 : i64, scratch_operands = 1 : i64, tpu.core_type = #tpu.core_type<tc>, window_params = [{transform_indices = @transform_0, window_bounds = array<i64: 1, 24, 8>}, {transform_indices = @transform_1, window_bounds = array<i64: 1, 8, 33>}, {transform_indices = @transform_2, window_bounds = array<i64: 3, 33, 33>}, {pipeline_mode = #tpu.pipeline_mode<synchronous>, transform_indices = @transform_3, window_bounds = array<i64: 32, 128>}, {pipeline_mode = #tpu.pipeline_mode<synchronous>, transform_indices = @transform_4, window_bounds = array<i64: 1, 128>}, {transform_indices = @transform_5, window_bounds = array<i64: 1, 8, 128>}]} {
    %c0_i32 = arith.constant 0 : i32
    %0 = arith.cmpi eq, %arg1, %c0_i32 : i32
    %1 = arith.extui %0 : i1 to i32
    %c0_i32_0 = arith.constant 0 : i32
    %2 = arith.cmpi ne, %1, %c0_i32_0 : i32
    scf.if %2 {
      %cst_17 = arith.constant 0.000000e+00 : f32
      %18 = vector.broadcast %cst_17 : f32 to vector<8x33xf32>
      %c0_18 = arith.constant 0 : index
      %c0_19 = arith.constant 0 : index
      %19 = vector.load %arg8[%c0_18, %c0_19] : memref<8x33xf32, #tpu.memory_space<vmem>>, vector<8x33xf32>
      tpu.vector_store %arg8[%c0_18, %c0_19], %18 {strides = array<i32>} : memref<8x33xf32, #tpu.memory_space<vmem>>, vector<8x33xf32>,
    } else {
    }
    %c0 = arith.constant 0 : index
    %c0_1 = arith.constant 0 : index
    %c0_2 = arith.constant 0 : index
    %3 = vector.load %arg3[%c0, %c0_1, %c0_2] : memref<1x8x33xbf16, #tpu.memory_space<vmem>>, vector<1x8x33xbf16>
    %4 = vector.shape_cast %3 : vector<1x8x33xbf16> to vector<8x33xbf16>
    %c0_3 = arith.constant 0 : index
    %c0_4 = arith.constant 0 : index
    %c0_5 = arith.constant 0 : index
    %5 = vector.load %arg2[%c0_3, %c0_4, %c0_5] : memref<1x24x8xbf16, #tpu.memory_space<vmem>>, vector<1x24x8xbf16>
    %6 = vector.shape_cast %5 : vector<1x24x8xbf16> to vector<24x8xbf16>
    %cst = arith.constant dense<0.000000e+00> : vector<24x33xf32>
    %7 = tpu.matmul %6, %4, %cst {dimension_numbers = #tpu.dot_dimension_numbers<[1], [0], [0], [1], [0, 0, 1, 1], [], []>} : vector<24x8xbf16>, vector<8x33xbf16>, vector<24x33xf32> -> vector<24x33xf32>
    %8 = vector.shape_cast %7 : vector<24x33xf32> to vector<3x8x33xf32>
    %c0_6 = arith.constant 0 : index
    %c0_7 = arith.constant 0 : index
    %c0_8 = arith.constant 0 : index
    %9 = vector.load %arg4[%c0_6, %c0_7, %c0_8] : memref<3x33x33xf32, #tpu.memory_space<vmem>>, vector<3x33x33xf32>
    "tpu.trace_start"() <{level = 10 : i32, message = "lnd,ldh->lnh"}> : () -> ()
    %cst_9 = arith.constant dense<0.000000e+00> : vector<3x8x33xf32>
    %10 = tpu.matmul %8, %9, %cst_9 {dimension_numbers = #tpu.dot_dimension_numbers<[2], [1], [1], [2], [0, 0, 0, 1, 1, 2], [0], [0]>} : vector<3x8x33xf32>, vector<3x33x33xf32>, vector<3x8x33xf32> -> vector<3x8x33xf32>
    "tpu.trace_stop"() : () -> ()
    %c0_10 = arith.constant 0 : index
    %c0_11 = arith.constant 0 : index
    %11 = vector.load %arg8[%c0_10, %c0_11] : memref<8x33xf32, #tpu.memory_space<vmem>>, vector<8x33xf32>
    %cst_12 = arith.constant dense<0.000000e+00> : vector<8x33xf32>
    %12 = vector.multi_reduction <add>, %10, %cst_12 [0] : vector<3x8x33xf32> to vector<8x33xf32>
    %13 = arith.addf %11, %12 : vector<8x33xf32>
    %c0_13 = arith.constant 0 : index
    %c0_14 = arith.constant 0 : index
    %14 = vector.load %arg8[%c0_13, %c0_14] : memref<8x33xf32, #tpu.memory_space<vmem>>, vector<8x33xf32>
    tpu.vector_store %arg8[%c0_13, %c0_14], %13 {strides = array<i32>} : memref<8x33xf32, #tpu.memory_space<vmem>>, vector<8x33xf32>,
    %c0_i32_15 = arith.constant 0 : i32
    %15 = arith.cmpi eq, %arg1, %c0_i32_15 : i32
    %16 = arith.extui %15 : i1 to i32
    %c0_i32_16 = arith.constant 0 : i32
    %17 = arith.cmpi ne, %16, %c0_i32_16 : i32
    scf.if %17 {
      %c0_17 = arith.constant 0 : index
      %c0_18 = arith.constant 0 : index
      %18 = vector.load %arg8[%c0_17, %c0_18] : memref<8x33xf32, #tpu.memory_space<vmem>>, vector<8x33xf32>
      %19 = vector.extract_strided_slice %18 {offsets = [0, 0], sizes = [8, 32], strides = [1, 1]} : vector<8x33xf32> to vector<8x32xf32>
      %20 = vector.extract_strided_slice %18 {offsets = [0, 32], sizes = [8, 1], strides = [1, 1]} : vector<8x33xf32> to vector<8x1xf32>
      %cst_19 = arith.constant 1.000000e-10 : f32
      %21 = vector.broadcast %cst_19 : f32 to vector<8x1xf32>
      %22 = arith.addf %20, %21 : vector<8x1xf32>
      %23 = vector.broadcast %22 : vector<8x1xf32> to vector<8x32xf32>
      %24 = arith.divf %19, %23 : vector<8x32xf32>
      %cst_20 = arith.constant 0.000000e+00 : f32
      %25 = vector.broadcast %cst_20 : f32 to vector<8x32xf32>
      %26 = arith.maximumf %24, %25 : vector<8x32xf32>
      %c0_21 = arith.constant 0 : index
      %c0_22 = arith.constant 0 : index
      %27 = vector.load %arg5[%c0_21, %c0_22] : memref<32x128xf32, #tpu.memory_space<vmem>>, vector<32x128xf32>
      %cst_23 = arith.constant dense<0.000000e+00> : vector<8x128xf32>
      %28 = tpu.matmul %26, %27, %cst_23 {dimension_numbers = #tpu.dot_dimension_numbers<[1], [0], [0], [1], [0, 0, 1, 1], [], []>} : vector<8x32xf32>, vector<32x128xf32>, vector<8x128xf32> -> vector<8x128xf32>
      %c0_24 = arith.constant 0 : index
      %c0_25 = arith.constant 0 : index
      %29 = vector.load %arg6[%c0_24, %c0_25] : memref<1x128xf32, #tpu.memory_space<vmem>>, vector<1x128xf32>
      %30 = vector.broadcast %29 : vector<1x128xf32> to vector<8x128xf32>
      %31 = arith.addf %28, %30 : vector<8x128xf32>
      %c0_26 = arith.constant 0 : index
      %c0_27 = arith.constant 0 : index
      %c0_28 = arith.constant 0 : index
      %32 = vector.load %arg7[%c0_26, %c0_27, %c0_28] : memref<1x8x128xf32, #tpu.memory_space<vmem>>, vector<1x8x128xf32>
      %33 = vector.shape_cast %32 : vector<1x8x128xf32> to vector<8x128xf32>
      %34 = vector.shape_cast %31 : vector<8x128xf32> to vector<1x8x128xf32>
      tpu.vector_store %arg7[%c0_26, %c0_27, %c0_28], %34 {strides = array<i32>} : memref<1x8x128xf32, #tpu.memory_space<vmem>>, vector<1x8x128xf32>,
    } else {
    }
    return
  }
  func.func @transform_0(%arg0: i32, %arg1: i32) -> (i32, i32, i32) {
    %c0_i32 = arith.constant 0 : i32
    %c0_i32_0 = arith.constant 0 : i32
    return %arg0, %arg1, %c0_i32 : i32, i32, i32
  }
  func.func @transform_1(%arg0: i32, %arg1: i32) -> (i32, i32, i32) {
    %c0_i32 = arith.constant 0 : i32
    %c0_i32_0 = arith.constant 0 : i32
    %c0_i32_1 = arith.constant 0 : i32
    return %arg0, %c0_i32, %c0_i32_0 : i32, i32, i32
  }
  func.func @transform_2(%arg0: i32, %arg1: i32) -> (i32, i32, i32) {
    %c0_i32 = arith.constant 0 : i32
    %c0_i32_0 = arith.constant 0 : i32
    %c0_i32_1 = arith.constant 0 : i32
    return %arg1, %c0_i32, %c0_i32_0 : i32, i32, i32
  }
  func.func @transform_3(%arg0: i32, %arg1: i32) -> (i32, i32) {
    %c0_i32 = arith.constant 0 : i32
    %c0_i32_0 = arith.constant 0 : i32
    %c0_i32_1 = arith.constant 0 : i32
    return %c0_i32, %c0_i32_0 : i32, i32
  }
  func.func @transform_4(%arg0: i32, %arg1: i32) -> (i32, i32) {
    %c0_i32 = arith.constant 0 : i32
    %c0_i32_0 = arith.constant 0 : i32
    %c0_i32_1 = arith.constant 0 : i32
    return %c0_i32, %c0_i32_0 : i32, i32
  }
  func.func @transform_5(%arg0: i32, %arg1: i32) -> (i32, i32, i32) {
    %c0_i32 = arith.constant 0 : i32
    %c0_i32_0 = arith.constant 0 : i32
    %c0_i32_1 = arith.constant 0 : i32
    return %arg0, %c0_i32, %c0_i32_0 : i32, i32, i32
  }
}

module attributes {stable_mosaic.version = 11 : i64} {
  func.func @_bilstm_kernel(%arg0: i32, %arg1: memref<8x2x512xf32, #tpu.memory_space<vmem>>, %arg2: memref<8x2x512xf32, #tpu.memory_space<vmem>>, %arg3: memref<128x512xf32, #tpu.memory_space<vmem>>, %arg4: memref<128x512xf32, #tpu.memory_space<vmem>>, %arg5: memref<8x2x128xf32, #tpu.memory_space<vmem>>, %arg6: memref<8x2x128xf32, #tpu.memory_space<vmem>>, %arg7: memref<2x128xf32, #tpu.memory_space<vmem>>, %arg8: memref<2x128xf32, #tpu.memory_space<vmem>>, %arg9: memref<2x128xf32, #tpu.memory_space<vmem>>, %arg10: memref<2x128xf32, #tpu.memory_space<vmem>>) attributes {dimension_semantics = [#tpu.dimension_semantics<arbitrary>], iteration_bounds = array<i64: 1>, scalar_prefetch = 0 : i64, scratch_operands = 4 : i64, tpu.core_type = #tpu.core_type<tc>, window_params = [{transform_indices = @transform_0, window_bounds = array<i64: 8, 2, 512>}, {transform_indices = @transform_1, window_bounds = array<i64: 8, 2, 512>}, {pipeline_mode = #tpu.pipeline_mode<synchronous>, transform_indices = @transform_2, window_bounds = array<i64: 128, 512>}, {pipeline_mode = #tpu.pipeline_mode<synchronous>, transform_indices = @transform_3, window_bounds = array<i64: 128, 512>}, {transform_indices = @transform_4, window_bounds = array<i64: 8, 2, 128>}, {transform_indices = @transform_5, window_bounds = array<i64: 8, 2, 128>}]} {
    %c0_i32 = arith.constant 0 : i32
    %0 = arith.cmpi eq, %arg0, %c0_i32 : i32
    %1 = arith.extui %0 : i1 to i32
    %c0_i32_0 = arith.constant 0 : i32
    %2 = arith.cmpi ne, %1, %c0_i32_0 : i32
    scf.if %2 {
      %cst_172 = arith.constant 0.000000e+00 : f32
      %525 = vector.broadcast %cst_172 : f32 to vector<2x128xf32>
      %c0_173 = arith.constant 0 : index
      %c0_174 = arith.constant 0 : index
      %526 = vector.load %arg7[%c0_173, %c0_174] : memref<2x128xf32, #tpu.memory_space<vmem>>, vector<2x128xf32>
      tpu.vector_store %arg7[%c0_173, %c0_174], %525 {strides = array<i32>} : memref<2x128xf32, #tpu.memory_space<vmem>>, vector<2x128xf32>,
      %cst_175 = arith.constant 0.000000e+00 : f32
      %527 = vector.broadcast %cst_175 : f32 to vector<2x128xf32>
      %c0_176 = arith.constant 0 : index
      %c0_177 = arith.constant 0 : index
      %528 = vector.load %arg8[%c0_176, %c0_177] : memref<2x128xf32, #tpu.memory_space<vmem>>, vector<2x128xf32>
      tpu.vector_store %arg8[%c0_176, %c0_177], %527 {strides = array<i32>} : memref<2x128xf32, #tpu.memory_space<vmem>>, vector<2x128xf32>,
      %cst_178 = arith.constant 0.000000e+00 : f32
      %529 = vector.broadcast %cst_178 : f32 to vector<2x128xf32>
      %c0_179 = arith.constant 0 : index
      %c0_180 = arith.constant 0 : index
      %530 = vector.load %arg9[%c0_179, %c0_180] : memref<2x128xf32, #tpu.memory_space<vmem>>, vector<2x128xf32>
      tpu.vector_store %arg9[%c0_179, %c0_180], %529 {strides = array<i32>} : memref<2x128xf32, #tpu.memory_space<vmem>>, vector<2x128xf32>,
      %cst_181 = arith.constant 0.000000e+00 : f32
      %531 = vector.broadcast %cst_181 : f32 to vector<2x128xf32>
      %c0_182 = arith.constant 0 : index
      %c0_183 = arith.constant 0 : index
      %532 = vector.load %arg10[%c0_182, %c0_183] : memref<2x128xf32, #tpu.memory_space<vmem>>, vector<2x128xf32>
      tpu.vector_store %arg10[%c0_182, %c0_183], %531 {strides = array<i32>} : memref<2x128xf32, #tpu.memory_space<vmem>>, vector<2x128xf32>,
    } else {
    }
    %c0 = arith.constant 0 : index
    %c0_1 = arith.constant 0 : index
    %3 = vector.load %arg3[%c0, %c0_1] : memref<128x512xf32, #tpu.memory_space<vmem>>, vector<128x512xf32>
    %c0_2 = arith.constant 0 : index
    %c0_3 = arith.constant 0 : index
    %4 = vector.load %arg4[%c0_2, %c0_3] : memref<128x512xf32, #tpu.memory_space<vmem>>, vector<128x512xf32>
    %c0_4 = arith.constant 0 : index
    %c0_5 = arith.constant 0 : index
    %5 = vector.load %arg7[%c0_4, %c0_5] : memref<2x128xf32, #tpu.memory_space<vmem>>, vector<2x128xf32>
    %c0_6 = arith.constant 0 : index
    %c0_7 = arith.constant 0 : index
    %6 = vector.load %arg8[%c0_6, %c0_7] : memref<2x128xf32, #tpu.memory_space<vmem>>, vector<2x128xf32>
    %c0_8 = arith.constant 0 : index
    %c0_9 = arith.constant 0 : index
    %7 = vector.load %arg9[%c0_8, %c0_9] : memref<2x128xf32, #tpu.memory_space<vmem>>, vector<2x128xf32>
    %c0_10 = arith.constant 0 : index
    %c0_11 = arith.constant 0 : index
    %8 = vector.load %arg10[%c0_10, %c0_11] : memref<2x128xf32, #tpu.memory_space<vmem>>, vector<2x128xf32>
    %c0_12 = arith.constant 0 : index
    %c0_13 = arith.constant 0 : index
    %c0_14 = arith.constant 0 : index
    %9 = vector.load %arg1[%c0_12, %c0_13, %c0_14] : memref<8x2x512xf32, #tpu.memory_space<vmem>>, vector<1x2x512xf32>
    %10 = vector.shape_cast %9 : vector<1x2x512xf32> to vector<2x512xf32>
    %cst = arith.constant dense<0.000000e+00> : vector<2x512xf32>
    %11 = tpu.matmul %5, %3, %cst {dimension_numbers = #tpu.dot_dimension_numbers<[1], [0], [0], [1], [0, 0, 1, 1], [], []>} : vector<2x128xf32>, vector<128x512xf32>, vector<2x512xf32> -> vector<2x512xf32>
    %12 = arith.addf %10, %11 : vector<2x512xf32>
    %13 = vector.extract_strided_slice %12 {offsets = [0, 0], sizes = [2, 128], strides = [1, 1]} : vector<2x512xf32> to vector<2x128xf32>
    %14 = arith.negf %13 : vector<2x128xf32>
    %15 = math.exp %14 : vector<2x128xf32>
    %cst_15 = arith.constant 1.000000e+00 : f32
    %16 = vector.broadcast %cst_15 : f32 to vector<2x128xf32>
    %17 = arith.addf %16, %15 : vector<2x128xf32>
    %18 = arith.divf %16, %17 : vector<2x128xf32>
    %19 = vector.extract_strided_slice %12 {offsets = [0, 128], sizes = [2, 128], strides = [1, 1]} : vector<2x512xf32> to vector<2x128xf32>
    %20 = arith.negf %19 : vector<2x128xf32>
    %21 = math.exp %20 : vector<2x128xf32>
    %cst_16 = arith.constant 1.000000e+00 : f32
    %22 = vector.broadcast %cst_16 : f32 to vector<2x128xf32>
    %23 = arith.addf %22, %21 : vector<2x128xf32>
    %24 = arith.divf %22, %23 : vector<2x128xf32>
    %25 = vector.extract_strided_slice %12 {offsets = [0, 256], sizes = [2, 128], strides = [1, 1]} : vector<2x512xf32> to vector<2x128xf32>
    %26 = math.tanh %25 : vector<2x128xf32>
    %27 = vector.extract_strided_slice %12 {offsets = [0, 384], sizes = [2, 128], strides = [1, 1]} : vector<2x512xf32> to vector<2x128xf32>
    %28 = arith.negf %27 : vector<2x128xf32>
    %29 = math.exp %28 : vector<2x128xf32>
    %cst_17 = arith.constant 1.000000e+00 : f32
    %30 = vector.broadcast %cst_17 : f32 to vector<2x128xf32>
    %31 = arith.addf %30, %29 : vector<2x128xf32>
    %32 = arith.divf %30, %31 : vector<2x128xf32>
    %33 = arith.mulf %24, %6 : vector<2x128xf32>
    %34 = arith.mulf %18, %26 : vector<2x128xf32>
    %35 = arith.addf %33, %34 : vector<2x128xf32>
    %36 = math.tanh %35 : vector<2x128xf32>
    %37 = arith.mulf %32, %36 : vector<2x128xf32>
    %c0_18 = arith.constant 0 : index
    %c0_19 = arith.constant 0 : index
    %c0_20 = arith.constant 0 : index
    %38 = vector.load %arg5[%c0_18, %c0_19, %c0_20] : memref<8x2x128xf32, #tpu.memory_space<vmem>>, vector<1x2x128xf32>
    %39 = vector.shape_cast %38 : vector<1x2x128xf32> to vector<2x128xf32>
    %40 = vector.shape_cast %37 : vector<2x128xf32> to vector<1x2x128xf32>
    tpu.vector_store %arg5[%c0_18, %c0_19, %c0_20], %40 {strides = array<i32>} : memref<8x2x128xf32, #tpu.memory_space<vmem>>, vector<1x2x128xf32>,
    %c7 = arith.constant 7 : index
    %c0_21 = arith.constant 0 : index
    %c0_22 = arith.constant 0 : index
    %41 = vector.load %arg2[%c7, %c0_21, %c0_22] : memref<8x2x512xf32, #tpu.memory_space<vmem>>, vector<1x2x512xf32>
    %42 = vector.shape_cast %41 : vector<1x2x512xf32> to vector<2x512xf32>
    %cst_23 = arith.constant dense<0.000000e+00> : vector<2x512xf32>
    %43 = tpu.matmul %7, %4, %cst_23 {dimension_numbers = #tpu.dot_dimension_numbers<[1], [0], [0], [1], [0, 0, 1, 1], [], []>} : vector<2x128xf32>, vector<128x512xf32>, vector<2x512xf32> -> vector<2x512xf32>
    %44 = arith.addf %42, %43 : vector<2x512xf32>
    %45 = vector.extract_strided_slice %44 {offsets = [0, 0], sizes = [2, 128], strides = [1, 1]} : vector<2x512xf32> to vector<2x128xf32>
    %46 = arith.negf %45 : vector<2x128xf32>
    %47 = math.exp %46 : vector<2x128xf32>
    %cst_24 = arith.constant 1.000000e+00 : f32
    %48 = vector.broadcast %cst_24 : f32 to vector<2x128xf32>
    %49 = arith.addf %48, %47 : vector<2x128xf32>
    %50 = arith.divf %48, %49 : vector<2x128xf32>
    %51 = vector.extract_strided_slice %44 {offsets = [0, 128], sizes = [2, 128], strides = [1, 1]} : vector<2x512xf32> to vector<2x128xf32>
    %52 = arith.negf %51 : vector<2x128xf32>
    %53 = math.exp %52 : vector<2x128xf32>
    %cst_25 = arith.constant 1.000000e+00 : f32
    %54 = vector.broadcast %cst_25 : f32 to vector<2x128xf32>
    %55 = arith.addf %54, %53 : vector<2x128xf32>
    %56 = arith.divf %54, %55 : vector<2x128xf32>
    %57 = vector.extract_strided_slice %44 {offsets = [0, 256], sizes = [2, 128], strides = [1, 1]} : vector<2x512xf32> to vector<2x128xf32>
    %58 = math.tanh %57 : vector<2x128xf32>
    %59 = vector.extract_strided_slice %44 {offsets = [0, 384], sizes = [2, 128], strides = [1, 1]} : vector<2x512xf32> to vector<2x128xf32>
    %60 = arith.negf %59 : vector<2x128xf32>
    %61 = math.exp %60 : vector<2x128xf32>
    %cst_26 = arith.constant 1.000000e+00 : f32
    %62 = vector.broadcast %cst_26 : f32 to vector<2x128xf32>
    %63 = arith.addf %62, %61 : vector<2x128xf32>
    %64 = arith.divf %62, %63 : vector<2x128xf32>
    %65 = arith.mulf %56, %8 : vector<2x128xf32>
    %66 = arith.mulf %50, %58 : vector<2x128xf32>
    %67 = arith.addf %65, %66 : vector<2x128xf32>
    %68 = math.tanh %67 : vector<2x128xf32>
    %69 = arith.mulf %64, %68 : vector<2x128xf32>
    %c7_27 = arith.constant 7 : index
    %c0_28 = arith.constant 0 : index
    %c0_29 = arith.constant 0 : index
    %70 = vector.load %arg6[%c7_27, %c0_28, %c0_29] : memref<8x2x128xf32, #tpu.memory_space<vmem>>, vector<1x2x128xf32>
    %71 = vector.shape_cast %70 : vector<1x2x128xf32> to vector<2x128xf32>
    %72 = vector.shape_cast %69 : vector<2x128xf32> to vector<1x2x128xf32>
    tpu.vector_store %arg6[%c7_27, %c0_28, %c0_29], %72 {strides = array<i32>} : memref<8x2x128xf32, #tpu.memory_space<vmem>>, vector<1x2x128xf32>,
    %c1 = arith.constant 1 : index
    %c0_30 = arith.constant 0 : index
    %c0_31 = arith.constant 0 : index
    %73 = vector.load %arg1[%c1, %c0_30, %c0_31] : memref<8x2x512xf32, #tpu.memory_space<vmem>>, vector<1x2x512xf32>
    %74 = vector.shape_cast %73 : vector<1x2x512xf32> to vector<2x512xf32>
    %cst_32 = arith.constant dense<0.000000e+00> : vector<2x512xf32>
    %75 = tpu.matmul %37, %3, %cst_32 {dimension_numbers = #tpu.dot_dimension_numbers<[1], [0], [0], [1], [0, 0, 1, 1], [], []>} : vector<2x128xf32>, vector<128x512xf32>, vector<2x512xf32> -> vector<2x512xf32>
    %76 = arith.addf %74, %75 : vector<2x512xf32>
    %77 = vector.extract_strided_slice %76 {offsets = [0, 0], sizes = [2, 128], strides = [1, 1]} : vector<2x512xf32> to vector<2x128xf32>
    %78 = arith.negf %77 : vector<2x128xf32>
    %79 = math.exp %78 : vector<2x128xf32>
    %cst_33 = arith.constant 1.000000e+00 : f32
    %80 = vector.broadcast %cst_33 : f32 to vector<2x128xf32>
    %81 = arith.addf %80, %79 : vector<2x128xf32>
    %82 = arith.divf %80, %81 : vector<2x128xf32>
    %83 = vector.extract_strided_slice %76 {offsets = [0, 128], sizes = [2, 128], strides = [1, 1]} : vector<2x512xf32> to vector<2x128xf32>
    %84 = arith.negf %83 : vector<2x128xf32>
    %85 = math.exp %84 : vector<2x128xf32>
    %cst_34 = arith.constant 1.000000e+00 : f32
    %86 = vector.broadcast %cst_34 : f32 to vector<2x128xf32>
    %87 = arith.addf %86, %85 : vector<2x128xf32>
    %88 = arith.divf %86, %87 : vector<2x128xf32>
    %89 = vector.extract_strided_slice %76 {offsets = [0, 256], sizes = [2, 128], strides = [1, 1]} : vector<2x512xf32> to vector<2x128xf32>
    %90 = math.tanh %89 : vector<2x128xf32>
    %91 = vector.extract_strided_slice %76 {offsets = [0, 384], sizes = [2, 128], strides = [1, 1]} : vector<2x512xf32> to vector<2x128xf32>
    %92 = arith.negf %91 : vector<2x128xf32>
    %93 = math.exp %92 : vector<2x128xf32>
    %cst_35 = arith.constant 1.000000e+00 : f32
    %94 = vector.broadcast %cst_35 : f32 to vector<2x128xf32>
    %95 = arith.addf %94, %93 : vector<2x128xf32>
    %96 = arith.divf %94, %95 : vector<2x128xf32>
    %97 = arith.mulf %88, %35 : vector<2x128xf32>
    %98 = arith.mulf %82, %90 : vector<2x128xf32>
    %99 = arith.addf %97, %98 : vector<2x128xf32>
    %100 = math.tanh %99 : vector<2x128xf32>
    %101 = arith.mulf %96, %100 : vector<2x128xf32>
    %c1_36 = arith.constant 1 : index
    %c0_37 = arith.constant 0 : index
    %c0_38 = arith.constant 0 : index
    %102 = vector.load %arg5[%c1_36, %c0_37, %c0_38] : memref<8x2x128xf32, #tpu.memory_space<vmem>>, vector<1x2x128xf32>
    %103 = vector.shape_cast %102 : vector<1x2x128xf32> to vector<2x128xf32>
    %104 = vector.shape_cast %101 : vector<2x128xf32> to vector<1x2x128xf32>
    tpu.vector_store %arg5[%c1_36, %c0_37, %c0_38], %104 {strides = array<i32>} : memref<8x2x128xf32, #tpu.memory_space<vmem>>, vector<1x2x128xf32>,
    %c6 = arith.constant 6 : index
    %c0_39 = arith.constant 0 : index
    %c0_40 = arith.constant 0 : index
    %105 = vector.load %arg2[%c6, %c0_39, %c0_40] : memref<8x2x512xf32, #tpu.memory_space<vmem>>, vector<1x2x512xf32>
    %106 = vector.shape_cast %105 : vector<1x2x512xf32> to vector<2x512xf32>
    %cst_41 = arith.constant dense<0.000000e+00> : vector<2x512xf32>
    %107 = tpu.matmul %69, %4, %cst_41 {dimension_numbers = #tpu.dot_dimension_numbers<[1], [0], [0], [1], [0, 0, 1, 1], [], []>} : vector<2x128xf32>, vector<128x512xf32>, vector<2x512xf32> -> vector<2x512xf32>
    %108 = arith.addf %106, %107 : vector<2x512xf32>
    %109 = vector.extract_strided_slice %108 {offsets = [0, 0], sizes = [2, 128], strides = [1, 1]} : vector<2x512xf32> to vector<2x128xf32>
    %110 = arith.negf %109 : vector<2x128xf32>
    %111 = math.exp %110 : vector<2x128xf32>
    %cst_42 = arith.constant 1.000000e+00 : f32
    %112 = vector.broadcast %cst_42 : f32 to vector<2x128xf32>
    %113 = arith.addf %112, %111 : vector<2x128xf32>
    %114 = arith.divf %112, %113 : vector<2x128xf32>
    %115 = vector.extract_strided_slice %108 {offsets = [0, 128], sizes = [2, 128], strides = [1, 1]} : vector<2x512xf32> to vector<2x128xf32>
    %116 = arith.negf %115 : vector<2x128xf32>
    %117 = math.exp %116 : vector<2x128xf32>
    %cst_43 = arith.constant 1.000000e+00 : f32
    %118 = vector.broadcast %cst_43 : f32 to vector<2x128xf32>
    %119 = arith.addf %118, %117 : vector<2x128xf32>
    %120 = arith.divf %118, %119 : vector<2x128xf32>
    %121 = vector.extract_strided_slice %108 {offsets = [0, 256], sizes = [2, 128], strides = [1, 1]} : vector<2x512xf32> to vector<2x128xf32>
    %122 = math.tanh %121 : vector<2x128xf32>
    %123 = vector.extract_strided_slice %108 {offsets = [0, 384], sizes = [2, 128], strides = [1, 1]} : vector<2x512xf32> to vector<2x128xf32>
    %124 = arith.negf %123 : vector<2x128xf32>
    %125 = math.exp %124 : vector<2x128xf32>
    %cst_44 = arith.constant 1.000000e+00 : f32
    %126 = vector.broadcast %cst_44 : f32 to vector<2x128xf32>
    %127 = arith.addf %126, %125 : vector<2x128xf32>
    %128 = arith.divf %126, %127 : vector<2x128xf32>
    %129 = arith.mulf %120, %67 : vector<2x128xf32>
    %130 = arith.mulf %114, %122 : vector<2x128xf32>
    %131 = arith.addf %129, %130 : vector<2x128xf32>
    %132 = math.tanh %131 : vector<2x128xf32>
    %133 = arith.mulf %128, %132 : vector<2x128xf32>
    %c6_45 = arith.constant 6 : index
    %c0_46 = arith.constant 0 : index
    %c0_47 = arith.constant 0 : index
    %134 = vector.load %arg6[%c6_45, %c0_46, %c0_47] : memref<8x2x128xf32, #tpu.memory_space<vmem>>, vector<1x2x128xf32>
    %135 = vector.shape_cast %134 : vector<1x2x128xf32> to vector<2x128xf32>
    %136 = vector.shape_cast %133 : vector<2x128xf32> to vector<1x2x128xf32>
    tpu.vector_store %arg6[%c6_45, %c0_46, %c0_47], %136 {strides = array<i32>} : memref<8x2x128xf32, #tpu.memory_space<vmem>>, vector<1x2x128xf32>,
    %c2 = arith.constant 2 : index
    %c0_48 = arith.constant 0 : index
    %c0_49 = arith.constant 0 : index
    %137 = vector.load %arg1[%c2, %c0_48, %c0_49] : memref<8x2x512xf32, #tpu.memory_space<vmem>>, vector<1x2x512xf32>
    %138 = vector.shape_cast %137 : vector<1x2x512xf32> to vector<2x512xf32>
    %cst_50 = arith.constant dense<0.000000e+00> : vector<2x512xf32>
    %139 = tpu.matmul %101, %3, %cst_50 {dimension_numbers = #tpu.dot_dimension_numbers<[1], [0], [0], [1], [0, 0, 1, 1], [], []>} : vector<2x128xf32>, vector<128x512xf32>, vector<2x512xf32> -> vector<2x512xf32>
    %140 = arith.addf %138, %139 : vector<2x512xf32>
    %141 = vector.extract_strided_slice %140 {offsets = [0, 0], sizes = [2, 128], strides = [1, 1]} : vector<2x512xf32> to vector<2x128xf32>
    %142 = arith.negf %141 : vector<2x128xf32>
    %143 = math.exp %142 : vector<2x128xf32>
    %cst_51 = arith.constant 1.000000e+00 : f32
    %144 = vector.broadcast %cst_51 : f32 to vector<2x128xf32>
    %145 = arith.addf %144, %143 : vector<2x128xf32>
    %146 = arith.divf %144, %145 : vector<2x128xf32>
    %147 = vector.extract_strided_slice %140 {offsets = [0, 128], sizes = [2, 128], strides = [1, 1]} : vector<2x512xf32> to vector<2x128xf32>
    %148 = arith.negf %147 : vector<2x128xf32>
    %149 = math.exp %148 : vector<2x128xf32>
    %cst_52 = arith.constant 1.000000e+00 : f32
    %150 = vector.broadcast %cst_52 : f32 to vector<2x128xf32>
    %151 = arith.addf %150, %149 : vector<2x128xf32>
    %152 = arith.divf %150, %151 : vector<2x128xf32>
    %153 = vector.extract_strided_slice %140 {offsets = [0, 256], sizes = [2, 128], strides = [1, 1]} : vector<2x512xf32> to vector<2x128xf32>
    %154 = math.tanh %153 : vector<2x128xf32>
    %155 = vector.extract_strided_slice %140 {offsets = [0, 384], sizes = [2, 128], strides = [1, 1]} : vector<2x512xf32> to vector<2x128xf32>
    %156 = arith.negf %155 : vector<2x128xf32>
    %157 = math.exp %156 : vector<2x128xf32>
    %cst_53 = arith.constant 1.000000e+00 : f32
    %158 = vector.broadcast %cst_53 : f32 to vector<2x128xf32>
    %159 = arith.addf %158, %157 : vector<2x128xf32>
    %160 = arith.divf %158, %159 : vector<2x128xf32>
    %161 = arith.mulf %152, %99 : vector<2x128xf32>
    %162 = arith.mulf %146, %154 : vector<2x128xf32>
    %163 = arith.addf %161, %162 : vector<2x128xf32>
    %164 = math.tanh %163 : vector<2x128xf32>
    %165 = arith.mulf %160, %164 : vector<2x128xf32>
    %c2_54 = arith.constant 2 : index
    %c0_55 = arith.constant 0 : index
    %c0_56 = arith.constant 0 : index
    %166 = vector.load %arg5[%c2_54, %c0_55, %c0_56] : memref<8x2x128xf32, #tpu.memory_space<vmem>>, vector<1x2x128xf32>
    %167 = vector.shape_cast %166 : vector<1x2x128xf32> to vector<2x128xf32>
    %168 = vector.shape_cast %165 : vector<2x128xf32> to vector<1x2x128xf32>
    tpu.vector_store %arg5[%c2_54, %c0_55, %c0_56], %168 {strides = array<i32>} : memref<8x2x128xf32, #tpu.memory_space<vmem>>, vector<1x2x128xf32>,
    %c5 = arith.constant 5 : index
    %c0_57 = arith.constant 0 : index
    %c0_58 = arith.constant 0 : index
    %169 = vector.load %arg2[%c5, %c0_57, %c0_58] : memref<8x2x512xf32, #tpu.memory_space<vmem>>, vector<1x2x512xf32>
    %170 = vector.shape_cast %169 : vector<1x2x512xf32> to vector<2x512xf32>
    %cst_59 = arith.constant dense<0.000000e+00> : vector<2x512xf32>
    %171 = tpu.matmul %133, %4, %cst_59 {dimension_numbers = #tpu.dot_dimension_numbers<[1], [0], [0], [1], [0, 0, 1, 1], [], []>} : vector<2x128xf32>, vector<128x512xf32>, vector<2x512xf32> -> vector<2x512xf32>
    %172 = arith.addf %170, %171 : vector<2x512xf32>
    %173 = vector.extract_strided_slice %172 {offsets = [0, 0], sizes = [2, 128], strides = [1, 1]} : vector<2x512xf32> to vector<2x128xf32>
    %174 = arith.negf %173 : vector<2x128xf32>
    %175 = math.exp %174 : vector<2x128xf32>
    %cst_60 = arith.constant 1.000000e+00 : f32
    %176 = vector.broadcast %cst_60 : f32 to vector<2x128xf32>
    %177 = arith.addf %176, %175 : vector<2x128xf32>
    %178 = arith.divf %176, %177 : vector<2x128xf32>
    %179 = vector.extract_strided_slice %172 {offsets = [0, 128], sizes = [2, 128], strides = [1, 1]} : vector<2x512xf32> to vector<2x128xf32>
    %180 = arith.negf %179 : vector<2x128xf32>
    %181 = math.exp %180 : vector<2x128xf32>
    %cst_61 = arith.constant 1.000000e+00 : f32
    %182 = vector.broadcast %cst_61 : f32 to vector<2x128xf32>
    %183 = arith.addf %182, %181 : vector<2x128xf32>
    %184 = arith.divf %182, %183 : vector<2x128xf32>
    %185 = vector.extract_strided_slice %172 {offsets = [0, 256], sizes = [2, 128], strides = [1, 1]} : vector<2x512xf32> to vector<2x128xf32>
    %186 = math.tanh %185 : vector<2x128xf32>
    %187 = vector.extract_strided_slice %172 {offsets = [0, 384], sizes = [2, 128], strides = [1, 1]} : vector<2x512xf32> to vector<2x128xf32>
    %188 = arith.negf %187 : vector<2x128xf32>
    %189 = math.exp %188 : vector<2x128xf32>
    %cst_62 = arith.constant 1.000000e+00 : f32
    %190 = vector.broadcast %cst_62 : f32 to vector<2x128xf32>
    %191 = arith.addf %190, %189 : vector<2x128xf32>
    %192 = arith.divf %190, %191 : vector<2x128xf32>
    %193 = arith.mulf %184, %131 : vector<2x128xf32>
    %194 = arith.mulf %178, %186 : vector<2x128xf32>
    %195 = arith.addf %193, %194 : vector<2x128xf32>
    %196 = math.tanh %195 : vector<2x128xf32>
    %197 = arith.mulf %192, %196 : vector<2x128xf32>
    %c5_63 = arith.constant 5 : index
    %c0_64 = arith.constant 0 : index
    %c0_65 = arith.constant 0 : index
    %198 = vector.load %arg6[%c5_63, %c0_64, %c0_65] : memref<8x2x128xf32, #tpu.memory_space<vmem>>, vector<1x2x128xf32>
    %199 = vector.shape_cast %198 : vector<1x2x128xf32> to vector<2x128xf32>
    %200 = vector.shape_cast %197 : vector<2x128xf32> to vector<1x2x128xf32>
    tpu.vector_store %arg6[%c5_63, %c0_64, %c0_65], %200 {strides = array<i32>} : memref<8x2x128xf32, #tpu.memory_space<vmem>>, vector<1x2x128xf32>,
    %c3 = arith.constant 3 : index
    %c0_66 = arith.constant 0 : index
    %c0_67 = arith.constant 0 : index
    %201 = vector.load %arg1[%c3, %c0_66, %c0_67] : memref<8x2x512xf32, #tpu.memory_space<vmem>>, vector<1x2x512xf32>
    %202 = vector.shape_cast %201 : vector<1x2x512xf32> to vector<2x512xf32>
    %cst_68 = arith.constant dense<0.000000e+00> : vector<2x512xf32>
    %203 = tpu.matmul %165, %3, %cst_68 {dimension_numbers = #tpu.dot_dimension_numbers<[1], [0], [0], [1], [0, 0, 1, 1], [], []>} : vector<2x128xf32>, vector<128x512xf32>, vector<2x512xf32> -> vector<2x512xf32>
    %204 = arith.addf %202, %203 : vector<2x512xf32>
    %205 = vector.extract_strided_slice %204 {offsets = [0, 0], sizes = [2, 128], strides = [1, 1]} : vector<2x512xf32> to vector<2x128xf32>
    %206 = arith.negf %205 : vector<2x128xf32>
    %207 = math.exp %206 : vector<2x128xf32>
    %cst_69 = arith.constant 1.000000e+00 : f32
    %208 = vector.broadcast %cst_69 : f32 to vector<2x128xf32>
    %209 = arith.addf %208, %207 : vector<2x128xf32>
    %210 = arith.divf %208, %209 : vector<2x128xf32>
    %211 = vector.extract_strided_slice %204 {offsets = [0, 128], sizes = [2, 128], strides = [1, 1]} : vector<2x512xf32> to vector<2x128xf32>
    %212 = arith.negf %211 : vector<2x128xf32>
    %213 = math.exp %212 : vector<2x128xf32>
    %cst_70 = arith.constant 1.000000e+00 : f32
    %214 = vector.broadcast %cst_70 : f32 to vector<2x128xf32>
    %215 = arith.addf %214, %213 : vector<2x128xf32>
    %216 = arith.divf %214, %215 : vector<2x128xf32>
    %217 = vector.extract_strided_slice %204 {offsets = [0, 256], sizes = [2, 128], strides = [1, 1]} : vector<2x512xf32> to vector<2x128xf32>
    %218 = math.tanh %217 : vector<2x128xf32>
    %219 = vector.extract_strided_slice %204 {offsets = [0, 384], sizes = [2, 128], strides = [1, 1]} : vector<2x512xf32> to vector<2x128xf32>
    %220 = arith.negf %219 : vector<2x128xf32>
    %221 = math.exp %220 : vector<2x128xf32>
    %cst_71 = arith.constant 1.000000e+00 : f32
    %222 = vector.broadcast %cst_71 : f32 to vector<2x128xf32>
    %223 = arith.addf %222, %221 : vector<2x128xf32>
    %224 = arith.divf %222, %223 : vector<2x128xf32>
    %225 = arith.mulf %216, %163 : vector<2x128xf32>
    %226 = arith.mulf %210, %218 : vector<2x128xf32>
    %227 = arith.addf %225, %226 : vector<2x128xf32>
    %228 = math.tanh %227 : vector<2x128xf32>
    %229 = arith.mulf %224, %228 : vector<2x128xf32>
    %c3_72 = arith.constant 3 : index
    %c0_73 = arith.constant 0 : index
    %c0_74 = arith.constant 0 : index
    %230 = vector.load %arg5[%c3_72, %c0_73, %c0_74] : memref<8x2x128xf32, #tpu.memory_space<vmem>>, vector<1x2x128xf32>
    %231 = vector.shape_cast %230 : vector<1x2x128xf32> to vector<2x128xf32>
    %232 = vector.shape_cast %229 : vector<2x128xf32> to vector<1x2x128xf32>
    tpu.vector_store %arg5[%c3_72, %c0_73, %c0_74], %232 {strides = array<i32>} : memref<8x2x128xf32, #tpu.memory_space<vmem>>, vector<1x2x128xf32>,
    %c4 = arith.constant 4 : index
    %c0_75 = arith.constant 0 : index
    %c0_76 = arith.constant 0 : index
    %233 = vector.load %arg2[%c4, %c0_75, %c0_76] : memref<8x2x512xf32, #tpu.memory_space<vmem>>, vector<1x2x512xf32>
    %234 = vector.shape_cast %233 : vector<1x2x512xf32> to vector<2x512xf32>
    %cst_77 = arith.constant dense<0.000000e+00> : vector<2x512xf32>
    %235 = tpu.matmul %197, %4, %cst_77 {dimension_numbers = #tpu.dot_dimension_numbers<[1], [0], [0], [1], [0, 0, 1, 1], [], []>} : vector<2x128xf32>, vector<128x512xf32>, vector<2x512xf32> -> vector<2x512xf32>
    %236 = arith.addf %234, %235 : vector<2x512xf32>
    %237 = vector.extract_strided_slice %236 {offsets = [0, 0], sizes = [2, 128], strides = [1, 1]} : vector<2x512xf32> to vector<2x128xf32>
    %238 = arith.negf %237 : vector<2x128xf32>
    %239 = math.exp %238 : vector<2x128xf32>
    %cst_78 = arith.constant 1.000000e+00 : f32
    %240 = vector.broadcast %cst_78 : f32 to vector<2x128xf32>
    %241 = arith.addf %240, %239 : vector<2x128xf32>
    %242 = arith.divf %240, %241 : vector<2x128xf32>
    %243 = vector.extract_strided_slice %236 {offsets = [0, 128], sizes = [2, 128], strides = [1, 1]} : vector<2x512xf32> to vector<2x128xf32>
    %244 = arith.negf %243 : vector<2x128xf32>
    %245 = math.exp %244 : vector<2x128xf32>
    %cst_79 = arith.constant 1.000000e+00 : f32
    %246 = vector.broadcast %cst_79 : f32 to vector<2x128xf32>
    %247 = arith.addf %246, %245 : vector<2x128xf32>
    %248 = arith.divf %246, %247 : vector<2x128xf32>
    %249 = vector.extract_strided_slice %236 {offsets = [0, 256], sizes = [2, 128], strides = [1, 1]} : vector<2x512xf32> to vector<2x128xf32>
    %250 = math.tanh %249 : vector<2x128xf32>
    %251 = vector.extract_strided_slice %236 {offsets = [0, 384], sizes = [2, 128], strides = [1, 1]} : vector<2x512xf32> to vector<2x128xf32>
    %252 = arith.negf %251 : vector<2x128xf32>
    %253 = math.exp %252 : vector<2x128xf32>
    %cst_80 = arith.constant 1.000000e+00 : f32
    %254 = vector.broadcast %cst_80 : f32 to vector<2x128xf32>
    %255 = arith.addf %254, %253 : vector<2x128xf32>
    %256 = arith.divf %254, %255 : vector<2x128xf32>
    %257 = arith.mulf %248, %195 : vector<2x128xf32>
    %258 = arith.mulf %242, %250 : vector<2x128xf32>
    %259 = arith.addf %257, %258 : vector<2x128xf32>
    %260 = math.tanh %259 : vector<2x128xf32>
    %261 = arith.mulf %256, %260 : vector<2x128xf32>
    %c4_81 = arith.constant 4 : index
    %c0_82 = arith.constant 0 : index
    %c0_83 = arith.constant 0 : index
    %262 = vector.load %arg6[%c4_81, %c0_82, %c0_83] : memref<8x2x128xf32, #tpu.memory_space<vmem>>, vector<1x2x128xf32>
    %263 = vector.shape_cast %262 : vector<1x2x128xf32> to vector<2x128xf32>
    %264 = vector.shape_cast %261 : vector<2x128xf32> to vector<1x2x128xf32>
    tpu.vector_store %arg6[%c4_81, %c0_82, %c0_83], %264 {strides = array<i32>} : memref<8x2x128xf32, #tpu.memory_space<vmem>>, vector<1x2x128xf32>,
    %c4_84 = arith.constant 4 : index
    %c0_85 = arith.constant 0 : index
    %c0_86 = arith.constant 0 : index
    %265 = vector.load %arg1[%c4_84, %c0_85, %c0_86] : memref<8x2x512xf32, #tpu.memory_space<vmem>>, vector<1x2x512xf32>
    %266 = vector.shape_cast %265 : vector<1x2x512xf32> to vector<2x512xf32>
    %cst_87 = arith.constant dense<0.000000e+00> : vector<2x512xf32>
    %267 = tpu.matmul %229, %3, %cst_87 {dimension_numbers = #tpu.dot_dimension_numbers<[1], [0], [0], [1], [0, 0, 1, 1], [], []>} : vector<2x128xf32>, vector<128x512xf32>, vector<2x512xf32> -> vector<2x512xf32>
    %268 = arith.addf %266, %267 : vector<2x512xf32>
    %269 = vector.extract_strided_slice %268 {offsets = [0, 0], sizes = [2, 128], strides = [1, 1]} : vector<2x512xf32> to vector<2x128xf32>
    %270 = arith.negf %269 : vector<2x128xf32>
    %271 = math.exp %270 : vector<2x128xf32>
    %cst_88 = arith.constant 1.000000e+00 : f32
    %272 = vector.broadcast %cst_88 : f32 to vector<2x128xf32>
    %273 = arith.addf %272, %271 : vector<2x128xf32>
    %274 = arith.divf %272, %273 : vector<2x128xf32>
    %275 = vector.extract_strided_slice %268 {offsets = [0, 128], sizes = [2, 128], strides = [1, 1]} : vector<2x512xf32> to vector<2x128xf32>
    %276 = arith.negf %275 : vector<2x128xf32>
    %277 = math.exp %276 : vector<2x128xf32>
    %cst_89 = arith.constant 1.000000e+00 : f32
    %278 = vector.broadcast %cst_89 : f32 to vector<2x128xf32>
    %279 = arith.addf %278, %277 : vector<2x128xf32>
    %280 = arith.divf %278, %279 : vector<2x128xf32>
    %281 = vector.extract_strided_slice %268 {offsets = [0, 256], sizes = [2, 128], strides = [1, 1]} : vector<2x512xf32> to vector<2x128xf32>
    %282 = math.tanh %281 : vector<2x128xf32>
    %283 = vector.extract_strided_slice %268 {offsets = [0, 384], sizes = [2, 128], strides = [1, 1]} : vector<2x512xf32> to vector<2x128xf32>
    %284 = arith.negf %283 : vector<2x128xf32>
    %285 = math.exp %284 : vector<2x128xf32>
    %cst_90 = arith.constant 1.000000e+00 : f32
    %286 = vector.broadcast %cst_90 : f32 to vector<2x128xf32>
    %287 = arith.addf %286, %285 : vector<2x128xf32>
    %288 = arith.divf %286, %287 : vector<2x128xf32>
    %289 = arith.mulf %280, %227 : vector<2x128xf32>
    %290 = arith.mulf %274, %282 : vector<2x128xf32>
    %291 = arith.addf %289, %290 : vector<2x128xf32>
    %292 = math.tanh %291 : vector<2x128xf32>
    %293 = arith.mulf %288, %292 : vector<2x128xf32>
    %c4_91 = arith.constant 4 : index
    %c0_92 = arith.constant 0 : index
    %c0_93 = arith.constant 0 : index
    %294 = vector.load %arg5[%c4_91, %c0_92, %c0_93] : memref<8x2x128xf32, #tpu.memory_space<vmem>>, vector<1x2x128xf32>
    %295 = vector.shape_cast %294 : vector<1x2x128xf32> to vector<2x128xf32>
    %296 = vector.shape_cast %293 : vector<2x128xf32> to vector<1x2x128xf32>
    tpu.vector_store %arg5[%c4_91, %c0_92, %c0_93], %296 {strides = array<i32>} : memref<8x2x128xf32, #tpu.memory_space<vmem>>, vector<1x2x128xf32>,
    %c3_94 = arith.constant 3 : index
    %c0_95 = arith.constant 0 : index
    %c0_96 = arith.constant 0 : index
    %297 = vector.load %arg2[%c3_94, %c0_95, %c0_96] : memref<8x2x512xf32, #tpu.memory_space<vmem>>, vector<1x2x512xf32>
    %298 = vector.shape_cast %297 : vector<1x2x512xf32> to vector<2x512xf32>
    %cst_97 = arith.constant dense<0.000000e+00> : vector<2x512xf32>
    %299 = tpu.matmul %261, %4, %cst_97 {dimension_numbers = #tpu.dot_dimension_numbers<[1], [0], [0], [1], [0, 0, 1, 1], [], []>} : vector<2x128xf32>, vector<128x512xf32>, vector<2x512xf32> -> vector<2x512xf32>
    %300 = arith.addf %298, %299 : vector<2x512xf32>
    %301 = vector.extract_strided_slice %300 {offsets = [0, 0], sizes = [2, 128], strides = [1, 1]} : vector<2x512xf32> to vector<2x128xf32>
    %302 = arith.negf %301 : vector<2x128xf32>
    %303 = math.exp %302 : vector<2x128xf32>
    %cst_98 = arith.constant 1.000000e+00 : f32
    %304 = vector.broadcast %cst_98 : f32 to vector<2x128xf32>
    %305 = arith.addf %304, %303 : vector<2x128xf32>
    %306 = arith.divf %304, %305 : vector<2x128xf32>
    %307 = vector.extract_strided_slice %300 {offsets = [0, 128], sizes = [2, 128], strides = [1, 1]} : vector<2x512xf32> to vector<2x128xf32>
    %308 = arith.negf %307 : vector<2x128xf32>
    %309 = math.exp %308 : vector<2x128xf32>
    %cst_99 = arith.constant 1.000000e+00 : f32
    %310 = vector.broadcast %cst_99 : f32 to vector<2x128xf32>
    %311 = arith.addf %310, %309 : vector<2x128xf32>
    %312 = arith.divf %310, %311 : vector<2x128xf32>
    %313 = vector.extract_strided_slice %300 {offsets = [0, 256], sizes = [2, 128], strides = [1, 1]} : vector<2x512xf32> to vector<2x128xf32>
    %314 = math.tanh %313 : vector<2x128xf32>
    %315 = vector.extract_strided_slice %300 {offsets = [0, 384], sizes = [2, 128], strides = [1, 1]} : vector<2x512xf32> to vector<2x128xf32>
    %316 = arith.negf %315 : vector<2x128xf32>
    %317 = math.exp %316 : vector<2x128xf32>
    %cst_100 = arith.constant 1.000000e+00 : f32
    %318 = vector.broadcast %cst_100 : f32 to vector<2x128xf32>
    %319 = arith.addf %318, %317 : vector<2x128xf32>
    %320 = arith.divf %318, %319 : vector<2x128xf32>
    %321 = arith.mulf %312, %259 : vector<2x128xf32>
    %322 = arith.mulf %306, %314 : vector<2x128xf32>
    %323 = arith.addf %321, %322 : vector<2x128xf32>
    %324 = math.tanh %323 : vector<2x128xf32>
    %325 = arith.mulf %320, %324 : vector<2x128xf32>
    %c3_101 = arith.constant 3 : index
    %c0_102 = arith.constant 0 : index
    %c0_103 = arith.constant 0 : index
    %326 = vector.load %arg6[%c3_101, %c0_102, %c0_103] : memref<8x2x128xf32, #tpu.memory_space<vmem>>, vector<1x2x128xf32>
    %327 = vector.shape_cast %326 : vector<1x2x128xf32> to vector<2x128xf32>
    %328 = vector.shape_cast %325 : vector<2x128xf32> to vector<1x2x128xf32>
    tpu.vector_store %arg6[%c3_101, %c0_102, %c0_103], %328 {strides = array<i32>} : memref<8x2x128xf32, #tpu.memory_space<vmem>>, vector<1x2x128xf32>,
    %c5_104 = arith.constant 5 : index
    %c0_105 = arith.constant 0 : index
    %c0_106 = arith.constant 0 : index
    %329 = vector.load %arg1[%c5_104, %c0_105, %c0_106] : memref<8x2x512xf32, #tpu.memory_space<vmem>>, vector<1x2x512xf32>
    %330 = vector.shape_cast %329 : vector<1x2x512xf32> to vector<2x512xf32>
    %cst_107 = arith.constant dense<0.000000e+00> : vector<2x512xf32>
    %331 = tpu.matmul %293, %3, %cst_107 {dimension_numbers = #tpu.dot_dimension_numbers<[1], [0], [0], [1], [0, 0, 1, 1], [], []>} : vector<2x128xf32>, vector<128x512xf32>, vector<2x512xf32> -> vector<2x512xf32>
    %332 = arith.addf %330, %331 : vector<2x512xf32>
    %333 = vector.extract_strided_slice %332 {offsets = [0, 0], sizes = [2, 128], strides = [1, 1]} : vector<2x512xf32> to vector<2x128xf32>
    %334 = arith.negf %333 : vector<2x128xf32>
    %335 = math.exp %334 : vector<2x128xf32>
    %cst_108 = arith.constant 1.000000e+00 : f32
    %336 = vector.broadcast %cst_108 : f32 to vector<2x128xf32>
    %337 = arith.addf %336, %335 : vector<2x128xf32>
    %338 = arith.divf %336, %337 : vector<2x128xf32>
    %339 = vector.extract_strided_slice %332 {offsets = [0, 128], sizes = [2, 128], strides = [1, 1]} : vector<2x512xf32> to vector<2x128xf32>
    %340 = arith.negf %339 : vector<2x128xf32>
    %341 = math.exp %340 : vector<2x128xf32>
    %cst_109 = arith.constant 1.000000e+00 : f32
    %342 = vector.broadcast %cst_109 : f32 to vector<2x128xf32>
    %343 = arith.addf %342, %341 : vector<2x128xf32>
    %344 = arith.divf %342, %343 : vector<2x128xf32>
    %345 = vector.extract_strided_slice %332 {offsets = [0, 256], sizes = [2, 128], strides = [1, 1]} : vector<2x512xf32> to vector<2x128xf32>
    %346 = math.tanh %345 : vector<2x128xf32>
    %347 = vector.extract_strided_slice %332 {offsets = [0, 384], sizes = [2, 128], strides = [1, 1]} : vector<2x512xf32> to vector<2x128xf32>
    %348 = arith.negf %347 : vector<2x128xf32>
    %349 = math.exp %348 : vector<2x128xf32>
    %cst_110 = arith.constant 1.000000e+00 : f32
    %350 = vector.broadcast %cst_110 : f32 to vector<2x128xf32>
    %351 = arith.addf %350, %349 : vector<2x128xf32>
    %352 = arith.divf %350, %351 : vector<2x128xf32>
    %353 = arith.mulf %344, %291 : vector<2x128xf32>
    %354 = arith.mulf %338, %346 : vector<2x128xf32>
    %355 = arith.addf %353, %354 : vector<2x128xf32>
    %356 = math.tanh %355 : vector<2x128xf32>
    %357 = arith.mulf %352, %356 : vector<2x128xf32>
    %c5_111 = arith.constant 5 : index
    %c0_112 = arith.constant 0 : index
    %c0_113 = arith.constant 0 : index
    %358 = vector.load %arg5[%c5_111, %c0_112, %c0_113] : memref<8x2x128xf32, #tpu.memory_space<vmem>>, vector<1x2x128xf32>
    %359 = vector.shape_cast %358 : vector<1x2x128xf32> to vector<2x128xf32>
    %360 = vector.shape_cast %357 : vector<2x128xf32> to vector<1x2x128xf32>
    tpu.vector_store %arg5[%c5_111, %c0_112, %c0_113], %360 {strides = array<i32>} : memref<8x2x128xf32, #tpu.memory_space<vmem>>, vector<1x2x128xf32>,
    %c2_114 = arith.constant 2 : index
    %c0_115 = arith.constant 0 : index
    %c0_116 = arith.constant 0 : index
    %361 = vector.load %arg2[%c2_114, %c0_115, %c0_116] : memref<8x2x512xf32, #tpu.memory_space<vmem>>, vector<1x2x512xf32>
    %362 = vector.shape_cast %361 : vector<1x2x512xf32> to vector<2x512xf32>
    %cst_117 = arith.constant dense<0.000000e+00> : vector<2x512xf32>
    %363 = tpu.matmul %325, %4, %cst_117 {dimension_numbers = #tpu.dot_dimension_numbers<[1], [0], [0], [1], [0, 0, 1, 1], [], []>} : vector<2x128xf32>, vector<128x512xf32>, vector<2x512xf32> -> vector<2x512xf32>
    %364 = arith.addf %362, %363 : vector<2x512xf32>
    %365 = vector.extract_strided_slice %364 {offsets = [0, 0], sizes = [2, 128], strides = [1, 1]} : vector<2x512xf32> to vector<2x128xf32>
    %366 = arith.negf %365 : vector<2x128xf32>
    %367 = math.exp %366 : vector<2x128xf32>
    %cst_118 = arith.constant 1.000000e+00 : f32
    %368 = vector.broadcast %cst_118 : f32 to vector<2x128xf32>
    %369 = arith.addf %368, %367 : vector<2x128xf32>
    %370 = arith.divf %368, %369 : vector<2x128xf32>
    %371 = vector.extract_strided_slice %364 {offsets = [0, 128], sizes = [2, 128], strides = [1, 1]} : vector<2x512xf32> to vector<2x128xf32>
    %372 = arith.negf %371 : vector<2x128xf32>
    %373 = math.exp %372 : vector<2x128xf32>
    %cst_119 = arith.constant 1.000000e+00 : f32
    %374 = vector.broadcast %cst_119 : f32 to vector<2x128xf32>
    %375 = arith.addf %374, %373 : vector<2x128xf32>
    %376 = arith.divf %374, %375 : vector<2x128xf32>
    %377 = vector.extract_strided_slice %364 {offsets = [0, 256], sizes = [2, 128], strides = [1, 1]} : vector<2x512xf32> to vector<2x128xf32>
    %378 = math.tanh %377 : vector<2x128xf32>
    %379 = vector.extract_strided_slice %364 {offsets = [0, 384], sizes = [2, 128], strides = [1, 1]} : vector<2x512xf32> to vector<2x128xf32>
    %380 = arith.negf %379 : vector<2x128xf32>
    %381 = math.exp %380 : vector<2x128xf32>
    %cst_120 = arith.constant 1.000000e+00 : f32
    %382 = vector.broadcast %cst_120 : f32 to vector<2x128xf32>
    %383 = arith.addf %382, %381 : vector<2x128xf32>
    %384 = arith.divf %382, %383 : vector<2x128xf32>
    %385 = arith.mulf %376, %323 : vector<2x128xf32>
    %386 = arith.mulf %370, %378 : vector<2x128xf32>
    %387 = arith.addf %385, %386 : vector<2x128xf32>
    %388 = math.tanh %387 : vector<2x128xf32>
    %389 = arith.mulf %384, %388 : vector<2x128xf32>
    %c2_121 = arith.constant 2 : index
    %c0_122 = arith.constant 0 : index
    %c0_123 = arith.constant 0 : index
    %390 = vector.load %arg6[%c2_121, %c0_122, %c0_123] : memref<8x2x128xf32, #tpu.memory_space<vmem>>, vector<1x2x128xf32>
    %391 = vector.shape_cast %390 : vector<1x2x128xf32> to vector<2x128xf32>
    %392 = vector.shape_cast %389 : vector<2x128xf32> to vector<1x2x128xf32>
    tpu.vector_store %arg6[%c2_121, %c0_122, %c0_123], %392 {strides = array<i32>} : memref<8x2x128xf32, #tpu.memory_space<vmem>>, vector<1x2x128xf32>,
    %c6_124 = arith.constant 6 : index
    %c0_125 = arith.constant 0 : index
    %c0_126 = arith.constant 0 : index
    %393 = vector.load %arg1[%c6_124, %c0_125, %c0_126] : memref<8x2x512xf32, #tpu.memory_space<vmem>>, vector<1x2x512xf32>
    %394 = vector.shape_cast %393 : vector<1x2x512xf32> to vector<2x512xf32>
    %cst_127 = arith.constant dense<0.000000e+00> : vector<2x512xf32>
    %395 = tpu.matmul %357, %3, %cst_127 {dimension_numbers = #tpu.dot_dimension_numbers<[1], [0], [0], [1], [0, 0, 1, 1], [], []>} : vector<2x128xf32>, vector<128x512xf32>, vector<2x512xf32> -> vector<2x512xf32>
    %396 = arith.addf %394, %395 : vector<2x512xf32>
    %397 = vector.extract_strided_slice %396 {offsets = [0, 0], sizes = [2, 128], strides = [1, 1]} : vector<2x512xf32> to vector<2x128xf32>
    %398 = arith.negf %397 : vector<2x128xf32>
    %399 = math.exp %398 : vector<2x128xf32>
    %cst_128 = arith.constant 1.000000e+00 : f32
    %400 = vector.broadcast %cst_128 : f32 to vector<2x128xf32>
    %401 = arith.addf %400, %399 : vector<2x128xf32>
    %402 = arith.divf %400, %401 : vector<2x128xf32>
    %403 = vector.extract_strided_slice %396 {offsets = [0, 128], sizes = [2, 128], strides = [1, 1]} : vector<2x512xf32> to vector<2x128xf32>
    %404 = arith.negf %403 : vector<2x128xf32>
    %405 = math.exp %404 : vector<2x128xf32>
    %cst_129 = arith.constant 1.000000e+00 : f32
    %406 = vector.broadcast %cst_129 : f32 to vector<2x128xf32>
    %407 = arith.addf %406, %405 : vector<2x128xf32>
    %408 = arith.divf %406, %407 : vector<2x128xf32>
    %409 = vector.extract_strided_slice %396 {offsets = [0, 256], sizes = [2, 128], strides = [1, 1]} : vector<2x512xf32> to vector<2x128xf32>
    %410 = math.tanh %409 : vector<2x128xf32>
    %411 = vector.extract_strided_slice %396 {offsets = [0, 384], sizes = [2, 128], strides = [1, 1]} : vector<2x512xf32> to vector<2x128xf32>
    %412 = arith.negf %411 : vector<2x128xf32>
    %413 = math.exp %412 : vector<2x128xf32>
    %cst_130 = arith.constant 1.000000e+00 : f32
    %414 = vector.broadcast %cst_130 : f32 to vector<2x128xf32>
    %415 = arith.addf %414, %413 : vector<2x128xf32>
    %416 = arith.divf %414, %415 : vector<2x128xf32>
    %417 = arith.mulf %408, %355 : vector<2x128xf32>
    %418 = arith.mulf %402, %410 : vector<2x128xf32>
    %419 = arith.addf %417, %418 : vector<2x128xf32>
    %420 = math.tanh %419 : vector<2x128xf32>
    %421 = arith.mulf %416, %420 : vector<2x128xf32>
    %c6_131 = arith.constant 6 : index
    %c0_132 = arith.constant 0 : index
    %c0_133 = arith.constant 0 : index
    %422 = vector.load %arg5[%c6_131, %c0_132, %c0_133] : memref<8x2x128xf32, #tpu.memory_space<vmem>>, vector<1x2x128xf32>
    %423 = vector.shape_cast %422 : vector<1x2x128xf32> to vector<2x128xf32>
    %424 = vector.shape_cast %421 : vector<2x128xf32> to vector<1x2x128xf32>
    tpu.vector_store %arg5[%c6_131, %c0_132, %c0_133], %424 {strides = array<i32>} : memref<8x2x128xf32, #tpu.memory_space<vmem>>, vector<1x2x128xf32>,
    %c1_134 = arith.constant 1 : index
    %c0_135 = arith.constant 0 : index
    %c0_136 = arith.constant 0 : index
    %425 = vector.load %arg2[%c1_134, %c0_135, %c0_136] : memref<8x2x512xf32, #tpu.memory_space<vmem>>, vector<1x2x512xf32>
    %426 = vector.shape_cast %425 : vector<1x2x512xf32> to vector<2x512xf32>
    %cst_137 = arith.constant dense<0.000000e+00> : vector<2x512xf32>
    %427 = tpu.matmul %389, %4, %cst_137 {dimension_numbers = #tpu.dot_dimension_numbers<[1], [0], [0], [1], [0, 0, 1, 1], [], []>} : vector<2x128xf32>, vector<128x512xf32>, vector<2x512xf32> -> vector<2x512xf32>
    %428 = arith.addf %426, %427 : vector<2x512xf32>
    %429 = vector.extract_strided_slice %428 {offsets = [0, 0], sizes = [2, 128], strides = [1, 1]} : vector<2x512xf32> to vector<2x128xf32>
    %430 = arith.negf %429 : vector<2x128xf32>
    %431 = math.exp %430 : vector<2x128xf32>
    %cst_138 = arith.constant 1.000000e+00 : f32
    %432 = vector.broadcast %cst_138 : f32 to vector<2x128xf32>
    %433 = arith.addf %432, %431 : vector<2x128xf32>
    %434 = arith.divf %432, %433 : vector<2x128xf32>
    %435 = vector.extract_strided_slice %428 {offsets = [0, 128], sizes = [2, 128], strides = [1, 1]} : vector<2x512xf32> to vector<2x128xf32>
    %436 = arith.negf %435 : vector<2x128xf32>
    %437 = math.exp %436 : vector<2x128xf32>
    %cst_139 = arith.constant 1.000000e+00 : f32
    %438 = vector.broadcast %cst_139 : f32 to vector<2x128xf32>
    %439 = arith.addf %438, %437 : vector<2x128xf32>
    %440 = arith.divf %438, %439 : vector<2x128xf32>
    %441 = vector.extract_strided_slice %428 {offsets = [0, 256], sizes = [2, 128], strides = [1, 1]} : vector<2x512xf32> to vector<2x128xf32>
    %442 = math.tanh %441 : vector<2x128xf32>
    %443 = vector.extract_strided_slice %428 {offsets = [0, 384], sizes = [2, 128], strides = [1, 1]} : vector<2x512xf32> to vector<2x128xf32>
    %444 = arith.negf %443 : vector<2x128xf32>
    %445 = math.exp %444 : vector<2x128xf32>
    %cst_140 = arith.constant 1.000000e+00 : f32
    %446 = vector.broadcast %cst_140 : f32 to vector<2x128xf32>
    %447 = arith.addf %446, %445 : vector<2x128xf32>
    %448 = arith.divf %446, %447 : vector<2x128xf32>
    %449 = arith.mulf %440, %387 : vector<2x128xf32>
    %450 = arith.mulf %434, %442 : vector<2x128xf32>
    %451 = arith.addf %449, %450 : vector<2x128xf32>
    %452 = math.tanh %451 : vector<2x128xf32>
    %453 = arith.mulf %448, %452 : vector<2x128xf32>
    %c1_141 = arith.constant 1 : index
    %c0_142 = arith.constant 0 : index
    %c0_143 = arith.constant 0 : index
    %454 = vector.load %arg6[%c1_141, %c0_142, %c0_143] : memref<8x2x128xf32, #tpu.memory_space<vmem>>, vector<1x2x128xf32>
    %455 = vector.shape_cast %454 : vector<1x2x128xf32> to vector<2x128xf32>
    %456 = vector.shape_cast %453 : vector<2x128xf32> to vector<1x2x128xf32>
    tpu.vector_store %arg6[%c1_141, %c0_142, %c0_143], %456 {strides = array<i32>} : memref<8x2x128xf32, #tpu.memory_space<vmem>>, vector<1x2x128xf32>,
    %c7_144 = arith.constant 7 : index
    %c0_145 = arith.constant 0 : index
    %c0_146 = arith.constant 0 : index
    %457 = vector.load %arg1[%c7_144, %c0_145, %c0_146] : memref<8x2x512xf32, #tpu.memory_space<vmem>>, vector<1x2x512xf32>
    %458 = vector.shape_cast %457 : vector<1x2x512xf32> to vector<2x512xf32>
    %cst_147 = arith.constant dense<0.000000e+00> : vector<2x512xf32>
    %459 = tpu.matmul %421, %3, %cst_147 {dimension_numbers = #tpu.dot_dimension_numbers<[1], [0], [0], [1], [0, 0, 1, 1], [], []>} : vector<2x128xf32>, vector<128x512xf32>, vector<2x512xf32> -> vector<2x512xf32>
    %460 = arith.addf %458, %459 : vector<2x512xf32>
    %461 = vector.extract_strided_slice %460 {offsets = [0, 0], sizes = [2, 128], strides = [1, 1]} : vector<2x512xf32> to vector<2x128xf32>
    %462 = arith.negf %461 : vector<2x128xf32>
    %463 = math.exp %462 : vector<2x128xf32>
    %cst_148 = arith.constant 1.000000e+00 : f32
    %464 = vector.broadcast %cst_148 : f32 to vector<2x128xf32>
    %465 = arith.addf %464, %463 : vector<2x128xf32>
    %466 = arith.divf %464, %465 : vector<2x128xf32>
    %467 = vector.extract_strided_slice %460 {offsets = [0, 128], sizes = [2, 128], strides = [1, 1]} : vector<2x512xf32> to vector<2x128xf32>
    %468 = arith.negf %467 : vector<2x128xf32>
    %469 = math.exp %468 : vector<2x128xf32>
    %cst_149 = arith.constant 1.000000e+00 : f32
    %470 = vector.broadcast %cst_149 : f32 to vector<2x128xf32>
    %471 = arith.addf %470, %469 : vector<2x128xf32>
    %472 = arith.divf %470, %471 : vector<2x128xf32>
    %473 = vector.extract_strided_slice %460 {offsets = [0, 256], sizes = [2, 128], strides = [1, 1]} : vector<2x512xf32> to vector<2x128xf32>
    %474 = math.tanh %473 : vector<2x128xf32>
    %475 = vector.extract_strided_slice %460 {offsets = [0, 384], sizes = [2, 128], strides = [1, 1]} : vector<2x512xf32> to vector<2x128xf32>
    %476 = arith.negf %475 : vector<2x128xf32>
    %477 = math.exp %476 : vector<2x128xf32>
    %cst_150 = arith.constant 1.000000e+00 : f32
    %478 = vector.broadcast %cst_150 : f32 to vector<2x128xf32>
    %479 = arith.addf %478, %477 : vector<2x128xf32>
    %480 = arith.divf %478, %479 : vector<2x128xf32>
    %481 = arith.mulf %472, %419 : vector<2x128xf32>
    %482 = arith.mulf %466, %474 : vector<2x128xf32>
    %483 = arith.addf %481, %482 : vector<2x128xf32>
    %484 = math.tanh %483 : vector<2x128xf32>
    %485 = arith.mulf %480, %484 : vector<2x128xf32>
    %c7_151 = arith.constant 7 : index
    %c0_152 = arith.constant 0 : index
    %c0_153 = arith.constant 0 : index
    %486 = vector.load %arg5[%c7_151, %c0_152, %c0_153] : memref<8x2x128xf32, #tpu.memory_space<vmem>>, vector<1x2x128xf32>
    %487 = vector.shape_cast %486 : vector<1x2x128xf32> to vector<2x128xf32>
    %488 = vector.shape_cast %485 : vector<2x128xf32> to vector<1x2x128xf32>
    tpu.vector_store %arg5[%c7_151, %c0_152, %c0_153], %488 {strides = array<i32>} : memref<8x2x128xf32, #tpu.memory_space<vmem>>, vector<1x2x128xf32>,
    %c0_154 = arith.constant 0 : index
    %c0_155 = arith.constant 0 : index
    %c0_156 = arith.constant 0 : index
    %489 = vector.load %arg2[%c0_154, %c0_155, %c0_156] : memref<8x2x512xf32, #tpu.memory_space<vmem>>, vector<1x2x512xf32>
    %490 = vector.shape_cast %489 : vector<1x2x512xf32> to vector<2x512xf32>
    %cst_157 = arith.constant dense<0.000000e+00> : vector<2x512xf32>
    %491 = tpu.matmul %453, %4, %cst_157 {dimension_numbers = #tpu.dot_dimension_numbers<[1], [0], [0], [1], [0, 0, 1, 1], [], []>} : vector<2x128xf32>, vector<128x512xf32>, vector<2x512xf32> -> vector<2x512xf32>
    %492 = arith.addf %490, %491 : vector<2x512xf32>
    %493 = vector.extract_strided_slice %492 {offsets = [0, 0], sizes = [2, 128], strides = [1, 1]} : vector<2x512xf32> to vector<2x128xf32>
    %494 = arith.negf %493 : vector<2x128xf32>
    %495 = math.exp %494 : vector<2x128xf32>
    %cst_158 = arith.constant 1.000000e+00 : f32
    %496 = vector.broadcast %cst_158 : f32 to vector<2x128xf32>
    %497 = arith.addf %496, %495 : vector<2x128xf32>
    %498 = arith.divf %496, %497 : vector<2x128xf32>
    %499 = vector.extract_strided_slice %492 {offsets = [0, 128], sizes = [2, 128], strides = [1, 1]} : vector<2x512xf32> to vector<2x128xf32>
    %500 = arith.negf %499 : vector<2x128xf32>
    %501 = math.exp %500 : vector<2x128xf32>
    %cst_159 = arith.constant 1.000000e+00 : f32
    %502 = vector.broadcast %cst_159 : f32 to vector<2x128xf32>
    %503 = arith.addf %502, %501 : vector<2x128xf32>
    %504 = arith.divf %502, %503 : vector<2x128xf32>
    %505 = vector.extract_strided_slice %492 {offsets = [0, 256], sizes = [2, 128], strides = [1, 1]} : vector<2x512xf32> to vector<2x128xf32>
    %506 = math.tanh %505 : vector<2x128xf32>
    %507 = vector.extract_strided_slice %492 {offsets = [0, 384], sizes = [2, 128], strides = [1, 1]} : vector<2x512xf32> to vector<2x128xf32>
    %508 = arith.negf %507 : vector<2x128xf32>
    %509 = math.exp %508 : vector<2x128xf32>
    %cst_160 = arith.constant 1.000000e+00 : f32
    %510 = vector.broadcast %cst_160 : f32 to vector<2x128xf32>
    %511 = arith.addf %510, %509 : vector<2x128xf32>
    %512 = arith.divf %510, %511 : vector<2x128xf32>
    %513 = arith.mulf %504, %451 : vector<2x128xf32>
    %514 = arith.mulf %498, %506 : vector<2x128xf32>
    %515 = arith.addf %513, %514 : vector<2x128xf32>
    %516 = math.tanh %515 : vector<2x128xf32>
    %517 = arith.mulf %512, %516 : vector<2x128xf32>
    %c0_161 = arith.constant 0 : index
    %c0_162 = arith.constant 0 : index
    %c0_163 = arith.constant 0 : index
    %518 = vector.load %arg6[%c0_161, %c0_162, %c0_163] : memref<8x2x128xf32, #tpu.memory_space<vmem>>, vector<1x2x128xf32>
    %519 = vector.shape_cast %518 : vector<1x2x128xf32> to vector<2x128xf32>
    %520 = vector.shape_cast %517 : vector<2x128xf32> to vector<1x2x128xf32>
    tpu.vector_store %arg6[%c0_161, %c0_162, %c0_163], %520 {strides = array<i32>} : memref<8x2x128xf32, #tpu.memory_space<vmem>>, vector<1x2x128xf32>,
    %c0_164 = arith.constant 0 : index
    %c0_165 = arith.constant 0 : index
    %521 = vector.load %arg7[%c0_164, %c0_165] : memref<2x128xf32, #tpu.memory_space<vmem>>, vector<2x128xf32>
    tpu.vector_store %arg7[%c0_164, %c0_165], %485 {strides = array<i32>} : memref<2x128xf32, #tpu.memory_space<vmem>>, vector<2x128xf32>,
    %c0_166 = arith.constant 0 : index
    %c0_167 = arith.constant 0 : index
    %522 = vector.load %arg8[%c0_166, %c0_167] : memref<2x128xf32, #tpu.memory_space<vmem>>, vector<2x128xf32>
    tpu.vector_store %arg8[%c0_166, %c0_167], %483 {strides = array<i32>} : memref<2x128xf32, #tpu.memory_space<vmem>>, vector<2x128xf32>,
    %c0_168 = arith.constant 0 : index
    %c0_169 = arith.constant 0 : index
    %523 = vector.load %arg9[%c0_168, %c0_169] : memref<2x128xf32, #tpu.memory_space<vmem>>, vector<2x128xf32>
    tpu.vector_store %arg9[%c0_168, %c0_169], %517 {strides = array<i32>} : memref<2x128xf32, #tpu.memory_space<vmem>>, vector<2x128xf32>,
    %c0_170 = arith.constant 0 : index
    %c0_171 = arith.constant 0 : index
    %524 = vector.load %arg10[%c0_170, %c0_171] : memref<2x128xf32, #tpu.memory_space<vmem>>, vector<2x128xf32>
    tpu.vector_store %arg10[%c0_170, %c0_171], %515 {strides = array<i32>} : memref<2x128xf32, #tpu.memory_space<vmem>>, vector<2x128xf32>,
    return
  }
  func.func @transform_0(%arg0: i32) -> (i32, i32, i32) {
    %c0_i32 = arith.constant 0 : i32
    %c0_i32_0 = arith.constant 0 : i32
    %c0_i32_1 = arith.constant 0 : i32
    return %arg0, %c0_i32, %c0_i32_0 : i32, i32, i32
  }
  func.func @transform_1(%arg0: i32) -> (i32, i32, i32) {
    %c0_i32 = arith.constant 0 : i32
    %0 = arith.subi %c0_i32, %arg0 : i32
    %c0_i32_0 = arith.constant 0 : i32
    %c1_i32 = arith.constant 1 : i32
    %c0_i32_1 = arith.constant 0 : i32
    return %0, %c0_i32_0, %c1_i32 : i32, i32, i32
  }
  func.func @transform_2(%arg0: i32) -> (i32, i32) {
    %c0_i32 = arith.constant 0 : i32
    %c0_i32_0 = arith.constant 0 : i32
    %c0_i32_1 = arith.constant 0 : i32
    return %c0_i32, %c0_i32_0 : i32, i32
  }
  func.func @transform_3(%arg0: i32) -> (i32, i32) {
    %c0_i32 = arith.constant 0 : i32
    %c0_i32_0 = arith.constant 0 : i32
    %c0_i32_1 = arith.constant 0 : i32
    return %c0_i32, %c0_i32_0 : i32, i32
  }
  func.func @transform_4(%arg0: i32) -> (i32, i32, i32) {
    %c0_i32 = arith.constant 0 : i32
    %c0_i32_0 = arith.constant 0 : i32
    %c0_i32_1 = arith.constant 0 : i32
    return %arg0, %c0_i32, %c0_i32_0 : i32, i32, i32
  }
  func.func @transform_5(%arg0: i32) -> (i32, i32, i32) {
    %c0_i32 = arith.constant 0 : i32
    %0 = arith.subi %c0_i32, %arg0 : i32
    %c0_i32_0 = arith.constant 0 : i32
    %c0_i32_1 = arith.constant 0 : i32
    %c0_i32_2 = arith.constant 0 : i32
    return %0, %c0_i32_0, %c0_i32_1 : i32, i32, i32
  }
}

</mosaic_0001>

<bundles_post_ra>
// kernel: gcn_segmenter_forward.3
= control target key start
LH: loop header
LB: loop body
LE: loop exit
PB: predicated region body
PF: predicated region fallthrough
CT: control target
= control target key end

     0   :  { %s1040_s18 = smov 0   ;;  %s1042_s19 = smov 0   ;;  %s1164_s0 = inlined_call_operand.vmem [shape: bf16[2,24,8], index: 0, kind: input, shape index: {}]   ;;  %s1165_s1 = inlined_call_operand.vmem [shape: bf16[2,8,33], index: 1, kind: input, shape index: {}]   ;;  %s1166_s2 = inlined_call_operand.vmem [shape: f32[3,33,33], index: 2, kind: input, shape index: {}]   ;;  %s1167_s3 = inlined_call_operand.vmem [shape: f32[32,128], index: 3, kind: input, shape index: {}]   ;;  %s1168_s4 = inlined_call_operand.vmem [shape: f32[1,128], index: 4, kind: input, shape index: {}]   ;;  %s1169_s5 = inlined_call_operand.vmem [shape: f32[2,8,128], index: 5, kind: output, shape index: {}]  }
   0x1   :  { %s1044_s20 = smov 0  }
   0x2 LB: > { %s27_s21 = sadd.s32 1, %s1000_s19  ;;  %p823_p0 = scmp.ge.s32.totalorder %s1004_s20, 1  ;;  %s1004_s20 = sphi %s1044_s20, %s15_s20   ;;  %s1000_s19 = sphi %s1042_s19, %s1171_s19   ;;  %s996_s18 = sphi %s1040_s18, %s1170_s18  }
   0x3   : > { %p29_p1 = scmp.ge.s32.totalorder %s27_s21, 2  ;;  %p227_p2 = scmp.lt.s32.totalorder %s1004_s20, 3 }
   0x5   : > { %s1173_s21 = smov (%p29_p1, %s27_s21), 0  ;;  %p228_p3 = pnand %p823_p0, %p227_p2 }
   0x6   : > { %p269_p4 = scmp.lt.s32.totalorder (!%p228_p3), %s996_s18, 1  ;;  %v371_v0 = vld [vmem:[%s1166_s2] sm:$0xff] (!%p228_p3)  ;;  %v372_v1 = vld [vmem:[%s1166_s2 + $0x8] sm:$0xff] (!%p228_p3)  ;;  %v1006_v2 = vmov (!%p228_p3), 0.0|0.0   ;;  %v373_v4 = vld [vmem:[%s1166_s2 + $0x10] sm:$0xff] (!%p228_p3)  ;;  %vm319_vm0 = vcmask (!%p228_p3), 1043456  }
   0x7   : > { %231 = sbr.rel (%p228_p3) target bundleno = 830 (0x33e), region = 40  ;;  %923 = vmatprep.subr.bf16.mxu1 (!%p228_p3), %v1006_v2  ;;  %v924_v3 = vpack.c.bf16 (!%p228_p3), %v372_v1, %v371_v0  ;;  %v374_v5 = vld [vmem:[%s1166_s2 + $0x18] sm:$0xff] (!%p228_p3)  ;;  %v376_v7 = vld [vmem:[%s1166_s2 + $0x28] sm:$0xff] (!%p228_p3)  ;;  %v377_v8 = vld [vmem:[%s1166_s2 + $0x30] sm:$0xff] (!%p228_p3)  ;;  %vm312_vm1 = vcmask (!%p228_p3), 64512   ;;  %v1007_v14 = vmov (!%p228_p3), 0.0  }
   0x8   : > { %v927_v6 = vpack.c.bf16 (!%p228_p3), %v374_v5, %v373_v4  ;;  %v930_v13 = vpack.c.bf16 (!%p228_p3), %v377_v8, %v376_v7  ;;  %v378_v15 = vld [vmem:[%s1166_s2 + $0x38] sm:$0xff] (!%p228_p3)  ;;  %v379_v16 = vld [vmem:[%s1166_s2 + $0x40] sm:$0xff] (!%p228_p3)  ;;  %vm390_vm2 = vcmask (!%p228_p3), 1040384   ;;  %vm1008_vm3 = vmmov (!%p228_p3), 0   ;;  %v380_v19 = vld [vmem:[%s1166_s2 + $0x48] sm:$0x1] (!%p228_p3) }
   0x9   : > { %925 = vmatpush3.bf16.msra.mxu1 (!%p228_p3), %v924_v3  ;;  %v933_v17 = vpack.c.bf16 (!%p228_p3), %v379_v16, %v378_v15  ;;  %v375_v18 = vld [vmem:[%s1166_s2 + $0x20] sm:$0x1] (!%p228_p3)  ;;  %883 = vmatprep.mubr.msk.f32.mxu1 (!%p228_p3), %vm1008_vm3, %v1007_v14  ;;  %vm298_vm4 = vcmask (!%p228_p3), 269312   ;;  %v381_v20 = vld [vmem:[%s1166_s2 + $0x50] sm:$0xff] (!%p228_p3)  ;;  %v382_v21 = vld [vmem:[%s1166_s2 + $0x58] sm:$0xff] (!%p228_p3)  ;;  %v1009_v31 = vmov (!%p228_p3), 32  }
   0xa   : > { %926 = vmatprep.subr.bf16.mxu1 (!%p228_p3), %v1006_v2  ;;  %299 = vst.msk [vmem:[#allocation2] sm:$0xff] (!%p228_p3), %vm298_vm4, %v1007_v14  ;;  %v936_v22 = vpack.c.bf16 (!%p228_p3), %v382_v21, %v381_v20  ;;  %v383_v24 = vld [vmem:[%s1166_s2 + $0x60] sm:$0xff] (!%p228_p3)  ;;  %v384_v25 = vld [vmem:[%s1166_s2 + $0x68] sm:$0xff] (!%p228_p3)  ;;  %v385_v30 = vld [vmem:[%s1166_s2 + $0x70] sm:$0x1] (!%p228_p3)  ;;  %977 = vset.pattern.permute.xlu0 (!%p228_p3), %v1009_v31  ;;  %vm648_vm5 = vcmask (!%p228_p3), 261120  }
   0xb   : > { %v939_v29 = vpack.c.bf16 (!%p228_p3), %v384_v25, %v383_v24  ;;  %v637_v47 = vld [vmem:[%s1167_s3] sm:$0xff] (!%p228_p3)  ;;  %v638_v48 = vld [vmem:[%s1167_s3 + $0x8] sm:$0xff] (!%p228_p3)  ;;  %v639_v50 = vld [vmem:[%s1167_s3 + $0x10] sm:$0xff] (!%p228_p3) }
   0xc   : > { %v942_v49 = vpack.c.bf16 (!%p228_p3), %v638_v48, %v637_v47  ;;  %v640_v51 = vld [vmem:[%s1167_s3 + $0x18] sm:$0xff] (!%p228_p3)  ;;  %v837_v57 = vld [vmem:[%s1168_s4] ss:$0 sm:$0xff] (!%p228_p3) }
   0xd   : > { %928 = vmatpush3.bf16.msra.mxu1 (!%p228_p3), %v927_v6  ;;  %v945_v52 = vpack.c.bf16 (!%p228_p3), %v640_v51, %v639_v50 }
   0xe   : > { %s1175_s18 = smov (!%p269_p4, %s996_s18), 1  ;;  %881 = vmatprep.subr.mxu1 %v1007_v14 }
   0xf   : > { %s825_s30 = sshll.u32 %s1175_s18, 2  ;;  %s948_s6 = smul.u32 12, %s1175_s18 }
  0x10   : > { %s281_s9 = scalar_lea.vmem %s1165_s1, %s825_s30  ;;  %s826_s26 = sshll.u32 %s1175_s18, 3 }
  0x11   : > { %v300_v9 = vld [vmem:[%s281_s9] sm:$0xf]  ;;  %s276_s16 = scalar_lea.vmem %s1164_s0, %s948_s6  ;;  %882 = vmatpush3.msk.msra.mxu1 %vm390_vm2, %v375_v18  ;;  %s292_s6 = scalar_lea.vmem %s1169_s5, %s826_s26 }
  0x12   : > { %947 = vmatprep.subr.msk.bf16.mxu0 %vm319_vm0, %v300_v9  ;;  %v321_v10 = vsel %vm319_vm0, %v300_v9, 0  ;;  %v978_v11 = vld [vmem:[%s276_s16] sm:$0xff]   ;;  %v979_v12 = vld [vmem:[%s276_s16 + $0x8] ss:$0 sps:$4 sm:$0xff]   ;;  %935 = vmatprep.subr.bf16.mxu1 %v1006_v2 }
  0x13   : > { %868 = vmatpush3.bf16.msra.mxu0 %v321_v10  ;;  %869 = vmatprep.mubr.msk.bf16.mxu0 %vm312_vm1, %v978_v11  ;;  %v616_v40 = vld [vmem:[#allocation2] sm:$0xff] }
  0x14   : > { %929 = vmatprep.subr.bf16.mxu0 %v1006_v2 }
  0x16   : > { %870 = vmatmul.mubr.msk.bf16.vlgmr.msra.gmra.mrb[0].mxu0 %vm312_vm1, %v979_v12 }
  0x17   : > { %931 = vmatpush3.bf16.msra.mxu0 %v930_v13  ;;  %896 = vmatprep.mubr.msk.f32.mxu0 %vm1008_vm3, %v1007_v14 }
  0x18   : > { %932 = vmatprep.subr.bf16.mxu0 %v1006_v2 }
  0x1b   : > { %934 = vmatpush3.bf16.msra.mxu0 %v933_v17 }
  0x1c   : > { %894 = vmatprep.subr.mxu0 %v1007_v14 }
  0x1f   : > { %895 = vmatpush3.msk.msra.mxu0 %vm390_vm2, %v380_v19 }
  0x20   : > { %941 = vmatprep.subr.bf16.mxu0 %v1006_v2 }
  0xe9   : > { %v871_v23 = vpop.f32.mrb[0].mxu0 }
  0xea   : > { %v357_v26 = vpop.f32.mrb[1].mxu0 }
  0xeb   : > { %v872_v27 = vpop.f32.mrb[2].mxu0  ;;  %884 = vmatmul.mubr.msk.f32.vlgmr.msra.gmra.mrb[0].mxu1 %vm298_vm4, %v357_v26 }
  0xec   : > { %937 = vmatpush3.bf16.msra.mxu1 %v936_v22  ;;  %v360_v28 = vpop.f32.mrb[3].mxu0  ;;  %909 = vmatprep.mubr.msk.f32.mxu1 %vm1008_vm3, %v1007_v14 }
  0xed   : > { %897 = vmatmul.mubr.msk.f32.vlgmr.msra.gmra.mrb[4].mxu0 %vm298_vm4, %v360_v28  ;;  %938 = vmatprep.subr.bf16.mxu1 %v1006_v2 }
  0xee   : > { %920 = vmatprep.mubr.msk.f32.mxu0 %vm1008_vm3, %v1007_v14  ;;  %943 = vmatpush3.bf16.msra.mxu0 %v942_v49 }
  0xef   : > { %944 = vmatprep.subr.bf16.mxu0 %v1006_v2 }
  0xf0   : > { %940 = vmatpush3.bf16.msra.mxu1 %v939_v29 }
  0xf1   : > { %907 = vmatprep.subr.mxu1 %v1007_v14 }
  0xf2   : > { %946 = vmatpush3.bf16.msra.mxu0 %v945_v52 }
  0xf4   : > { %908 = vmatpush3.msk.msra.mxu1 %vm390_vm2, %v385_v30 }
  0xf5   : > { %910 = vmatmul.mubr.msk.f32.vlgmr.msra.gmra.mrb[2].mxu1 %vm298_vm4, %v871_v23 }
 0x1be   : > { %v460_v32 = vpop.f32.mrb[0].mxu1 }
 0x1bf   : > { %v885_v33 = vpop.f32.mrb[1].mxu1  ;;  %v617_v35 = vsel %vm298_vm4, %v460_v32, 0.0 }
 0x1c0   : > { %v536_v34 = vpop.f32.mrb[4].mxu0 }
 0x1c1   : > { %v618_v36 = vsel %vm298_vm4, %v536_v34, 0.0  ;;  %v898_v37 = vpop.f32.mrb[5].mxu0 }
 0x1c2   : > { %v619_v38 = vadd.f32 %v618_v36, %v617_v35 }
 0x1c8   : > { %v612_v39 = vpop.f32.mrb[2].mxu1 }
 0x1c9   : > { %v620_v41 = vsel %vm298_vm4, %v612_v39, 0.0  ;;  %v911_v42 = vpop.f32.mrb[3].mxu1 }
 0x1ca   : > { %v621_v43 = vadd.f32 %v620_v41, %v619_v38 }
 0x1cc   : > { %v622_v44 = vadd.f32 %v621_v43, %v616_v40 }
 0x1ce   : > { %623 = vst.msk [vmem:[#allocation2] sm:$0xff] %vm298_vm4, %v622_v44 }
 0x1d5   : > { %v627_v45 = vld [vmem:[#allocation2] sm:$0xff] }
 0x1d6   : > { %v628_v46 = vadd.f32 1e-10, %v627_v45 }
 0x1d8   : > { %631 = vperm.xlu0 %977, %v628_v46  }
 0x257   : > { %v632_v53 = vpop.permute.xlu0 %631 }
 0x258   : > { %980 = vrcp.f32 %v632_v53 }
 0x262   : > { %v981_v54 = vpop.eup %980 }
 0x263   : > { %v635_v55 = vmul.f32 %v981_v54, %v627_v45 }
 0x265   : > { %v636_v56 = vmax.f32 %v635_v55, 0.0 }
 0x267   : > { %921 = vmatmul.mubr.msk.f32.vlgmr.msra.gmra.mrb[6].mxu0 %vm648_vm5, %v636_v56 }
 0x33a   : > { %v718_v58 = vpop.f32.mrb[6].mxu0 }
 0x33b   : > { %v719_v59 = vadd.f32 %v837_v57, %v718_v58  ;;  %v922_v60 = vpop.f32.mrb[7].mxu0 }
 0x33d   : > { %722 = vst [vmem:[%s292_s6] sm:$0xff] %v719_v59 }
 0x33e PF: > { %s15_s20 = sadd.s32 1, %s1004_s20   ;;  %s1170_s18 = smov %s1000_s19 }
 0x33f   : > { %p12_p5 = scmp.ge.s32.totalorder %s15_s20, 4   ;;  %s1171_s19 = smov %s1173_s21 }
 0x341   :  { %14 = sbr.rel (!%p12_p5) target bundleno = 2 (0x2), region = 84 }

// kernel: gcn_segmenter_forward.2
= control target key start
LH: loop header
LB: loop body
LE: loop exit
PB: predicated region body
PF: predicated region fallthrough
CT: control target
= control target key end

     0   :  { %11 = vsyncpa [#allocation9], 0  ;;  %s4941_s28 = smov [#allocation8]   ;;  %s6090_s0 = inlined_call_operand.vmem [shape: f32[8,2,1024], index: 0, kind: input, shape index: {}, may-alias: {0,1}]   ;;  %s6091_s1 = inlined_call_operand.vmem [shape: f32[8,2,1024], index: 1, kind: input, shape index: {}, may-alias: {0,1}]   ;;  %s6092_s2 = inlined_call_operand.vmem [shape: f32[128,512], index: 2, kind: input, shape index: {}]   ;;  %s6093_s3 = inlined_call_operand.hbm [shape: f32[128,512], index: 3, kind: input, shape index: {}]   ;;  %s6094_s4 = inlined_call_operand.vmem [shape: f32[8,2,128], index: 4, kind: output, shape index: {0}]   ;;  %s6095_s5 = inlined_call_operand.vmem [shape: f32[8,2,128], index: 5, kind: output, shape index: {1}]  }
   0x1   :  { %v4979_v0 = vld [vmem:[%s6090_s0] sm:$0xff]  ;;  %v4984_v1 = vld [vmem:[%s6090_s0 + $0x10] sm:$0xff]  ;;  %s149_s29 = sshll.u32 %s4941_s28, 4  ;;  %v5019_v8 = vld [vmem:[%s6091_s1 + $0x8] sm:$0xff]  ;;  %s4917_s28 = scalar_lea.hbm %s6093_s3, 8192  ;;  %s150_s29 = int_to_ptr.vmem [resolvable:$true] %s149_s29 }
   0x2   :  { %6174 = vst [vmem:[#allocation11_spill] sm:$0xff] %v4984_v1  ;;  %v4989_v2 = vld [vmem:[%s6090_s0 + $0x20] sm:$0xff]  ;;  %v4994_v3 = vld [vmem:[%s6090_s0 + $0x30] sm:$0xff]  ;;  %6181 = vst [vmem:[#allocation18_spill] sm:$0xff] %v5019_v8  ;;  %p4918_p0 = scmp.ne.s32.totalorder %s6093_s3, %s4917_s28  ;;  %p4921_p1 = scmp.lt.u32.totalorder %s4917_s28, %s6093_s3 }
   0x3   :  { %6175 = vst [vmem:[#allocation12_spill] sm:$0xff] %v4989_v2  ;;  %6176 = vst [vmem:[#allocation13_spill] sm:$0xff] %v4994_v3  ;;  %v4999_v4 = vld [vmem:[%s6090_s0 + $0x40] sm:$0xff]  ;;  %v5004_v5 = vld [vmem:[%s6090_s0 + $0x50] sm:$0xff] }
   0x4   :  { %6177 = vst [vmem:[#allocation14_spill] sm:$0xff] %v4999_v4  ;;  %6178 = vst [vmem:[#allocation15_spill] sm:$0xff] %v5004_v5  ;;  %v5009_v6 = vld [vmem:[%s6090_s0 + $0x60] sm:$0xff]  ;;  %v5014_v7 = vld [vmem:[%s6090_s0 + $0x70] sm:$0xff]  ;;  %p4923_p2 = pnand %p4921_p1, %p4918_p0 }
   0x5   :  { %6179 = vst [vmem:[#allocation16_spill] sm:$0xff] %v5009_v6  ;;  %6180 = vst [vmem:[#allocation17_spill] sm:$0xff] %v5014_v7  ;;  %v5024_v9 = vld [vmem:[%s6091_s1 + $0x18] sm:$0xff]  ;;  %v5029_v10 = vld [vmem:[%s6091_s1 + $0x28] sm:$0xff] }
   0x6   :  { %6182 = vst [vmem:[#allocation19_spill] sm:$0xff] %v5024_v9  ;;  %6183 = vst [vmem:[#allocation20_spill] sm:$0xff] %v5029_v10  ;;  %v5034_v11 = vld [vmem:[%s6091_s1 + $0x38] sm:$0xff]  ;;  %v5039_v12 = vld [vmem:[%s6091_s1 + $0x48] sm:$0xff] }
   0x7   :  { %6184 = vst [vmem:[#allocation21_spill] sm:$0xff] %v5034_v11  ;;  %6185 = vst [vmem:[#allocation22_spill] sm:$0xff] %v5039_v12  ;;  %v5044_v13 = vld [vmem:[%s6091_s1 + $0x58] sm:$0xff]  ;;  %v5049_v14 = vld [vmem:[%s6091_s1 + $0x68] sm:$0xff] }
   0x8   :  { %6186 = vst [vmem:[#allocation23_spill] sm:$0xff] %v5044_v13  ;;  %6187 = vst [vmem:[#allocation24_spill] sm:$0xff] %v5049_v14  ;;  %v5054_v15 = vld [vmem:[%s6091_s1 + $0x78] sm:$0xff] }
   0x9   :  { %4926 = shalt.err (!%p4923_p2)
}
   0xa   :  { %s4927_s9 = scalar_lea.vmem %s150_s29, 8192  ;;  %p4932_p4 = scmp.lt.s32.totalorder %s150_s29, %s150_s29 }
   0xb   :  { %p4928_p3 = scmp.ne.s32.totalorder %s150_s29, %s4927_s9  ;;  %p4933_p5 = scmp.lt.s32.totalorder %s4927_s9, %s4927_s9 }
   0xd   :  { %p4934_p6 = por %p4933_p5, %p4932_p4 }
   0xf   :  { %p4935_p7 = pnand %p4934_p6, %p4928_p3 }
  0x11   :  { %4938 = shalt.err (!%p4935_p7)
}
  0x12   :  { %s4942_s1 = smov 512   ;;  %s4943_s10 = smov 32  }
  0x13   :  { %155 = dma.hbm_to_vmem [thread:$0]  %s6093_s3, 8192, %s150_s29, [#allocation9], %s4942_s1, %s4942_s1, %s4943_s10  }
  0x14   :  { %4939 = dma.done.wait [#allocation9], 8192  }
  0x15   :  { %4940 = vsyncadd [#allocation9], 4294959104  ;;  %v6096_v16 = vmov 0.0   ;;  %v188_v17 = vld [vmem:[%s6092_s2 + $0x8] sm:$0xff]  ;;  %v190_v19 = vld [vmem:[%s6092_s2 + $0x18] sm:$0xff] }
  0x16   :  { %384 = vmatprep.mubr.f32.mxu0 %v6096_v16  ;;  %183 = vst [vmem:[#allocation2] sm:$0x3] %v6096_v16  ;;  %184 = vst [vmem:[#allocation3] sm:$0x3] %v6096_v16  ;;  %455 = vmatprep.mubr.f32.mxu1 %v6096_v16  ;;  %v192_v18 = vld [vmem:[%s6092_s2 + $0x28] sm:$0xff]  ;;  %v194_v21 = vld [vmem:[%s6092_s2 + $0x38] sm:$0xff] }
  0x17   :  { %185 = vst [vmem:[#allocation4] sm:$0x3] %v6096_v16  ;;  %186 = vst [vmem:[#allocation5] sm:$0x3] %v6096_v16  ;;  %v5083_v20 = vpack.c.bf16 %v192_v18, %v188_v17  ;;  %v187_v22 = vld [vmem:[%s6092_s2] sm:$0xff]  ;;  %v5094_v24 = vpack.c.bf16 %v194_v21, %v190_v19  ;;  %v189_v26 = vld [vmem:[%s6092_s2 + $0x10] sm:$0xff] }
  0x18   :  { %v191_v23 = vld [vmem:[%s6092_s2 + $0x20] sm:$0xff]  ;;  %v193_v27 = vld [vmem:[%s6092_s2 + $0x30] sm:$0xff]  ;;  %v196_v28 = vld [vmem:[%s6092_s2 + $0x48] sm:$0xff] }
  0x19   :  { %v5096_v25 = vpack.c.bf16 %v191_v23, %v187_v22  ;;  %3633 = vmatprep.subr.bf16.mxu0 %v5083_v20  ;;  %v5108_v29 = vpack.c.bf16 %v193_v27, %v189_v26  ;;  %v200_v30 = vld [vmem:[%s6092_s2 + $0x68] sm:$0xff]  ;;  %v198_v31 = vld [vmem:[%s6092_s2 + $0x58] sm:$0xff]  ;;  %3665 = vmatprep.subr.bf16.mxu1 %v5094_v24  ;;  %v195_v35 = vld [vmem:[%s6092_s2 + $0x40] sm:$0xff] }
  0x1a   :  { %v202_v32 = vld [vmem:[%s6092_s2 + $0x78] sm:$0xff]  ;;  %v5121_v33 = vpack.c.bf16 %v200_v30, %v196_v28  ;;  %v199_v36 = vld [vmem:[%s6092_s2 + $0x60] sm:$0xff]  ;;  %v197_v37 = vld [vmem:[%s6092_s2 + $0x50] sm:$0xff] }
  0x1b   :  { %3635 = vmatpush1.bf16.msra.mxu0 %v5096_v25  ;;  %v5123_v34 = vpack.c.bf16 %v202_v32, %v198_v31  ;;  %3667 = vmatpush1.bf16.msra.mxu1 %v5108_v29  ;;  %v5135_v38 = vpack.c.bf16 %v199_v36, %v195_v35  ;;  %v201_v39 = vld [vmem:[%s6092_s2 + $0x70] sm:$0xff]  ;;  %v204_v40 = vld [vmem:[%s6092_s2 + $0x88] sm:$0xff]  ;;  %v206_v44 = vld [vmem:[%s6092_s2 + $0x98] sm:$0xff] }
  0x1c   :  { %v208_v41 = vld [vmem:[%s6092_s2 + $0xa8] sm:$0xff]  ;;  %3637 = vmatprep.subr.bf16.mxu0 %v5121_v33  ;;  %v5148_v42 = vpack.c.bf16 %v201_v39, %v197_v37  ;;  %v210_v45 = vld [vmem:[%s6092_s2 + $0xb8] sm:$0xff]  ;;  %v203_v46 = vld [vmem:[%s6092_s2 + $0x80] sm:$0xff] }
  0x1d   :  { %3669 = vmatprep.subr.bf16.mxu1 %v5123_v34  ;;  %v5150_v43 = vpack.c.bf16 %v208_v41, %v204_v40  ;;  %v5161_v47 = vpack.c.bf16 %v210_v45, %v206_v44  ;;  %v207_v48 = vld [vmem:[%s6092_s2 + $0xa0] sm:$0xff]  ;;  %v205_v49 = vld [vmem:[%s6092_s2 + $0x90] sm:$0xff]  ;;  %v212_v52 = vld [vmem:[%s6092_s2 + $0xc8] sm:$0xff] }
  0x1e   :  { %v209_v50 = vld [vmem:[%s6092_s2 + $0xb0] sm:$0xff]  ;;  %v5173_v51 = vpack.c.bf16 %v207_v48, %v203_v46  ;;  %v216_v53 = vld [vmem:[%s6092_s2 + $0xe8] sm:$0xff]  ;;  %v214_v54 = vld [vmem:[%s6092_s2 + $0xd8] sm:$0xff] }
  0x1f   :  { %3639 = vmatpush1.bf16.msra.mxu0 %v5135_v38  ;;  %3671 = vmatpush1.bf16.msra.mxu1 %v5148_v42  ;;  %v5186_v55 = vpack.c.bf16 %v209_v50, %v205_v49  ;;  %v5188_v56 = vpack.c.bf16 %v216_v53, %v212_v52  ;;  %v218_v57 = vld [vmem:[%s6092_s2 + $0xf8] sm:$0xff]  ;;  %v211_v58 = vld [vmem:[%s6092_s2 + $0xc0] sm:$0xff]  ;;  %v213_v61 = vld [vmem:[%s6092_s2 + $0xd0] sm:$0xff] }
  0x20   :  { %6188 = vst [vmem:[#allocation25_spill] sm:$0xff] %v5173_v51  ;;  %3641 = vmatprep.subr.bf16.mxu0 %v5150_v43  ;;  %v215_v59 = vld [vmem:[%s6092_s2 + $0xe0] sm:$0xff]  ;;  %3673 = vmatprep.subr.bf16.mxu1 %v5161_v47  ;;  %v5200_v60 = vpack.c.bf16 %v218_v57, %v214_v54  ;;  %v217_v62 = vld [vmem:[%s6092_s2 + $0xf0] sm:$0xff]  ;;  %v220_v63 = vld [vmem:[%s6092_s2 + $0x108] sm:$0xff] }
  0x21   :  { %6189 = vst [vmem:[#allocation26_spill] sm:$0xff] %v5186_v55  ;;  %6190 = vst [vmem:[#allocation27_spill] sm:$0xff] %v5188_v56  ;;  %v224_v17 = vld [vmem:[%s6092_s2 + $0x128] sm:$0xff]  ;;  %v222_v18 = vld [vmem:[%s6092_s2 + $0x118] sm:$0xff]  ;;  %v5221_v21 = vpack.c.bf16 %v215_v59, %v211_v58  ;;  %v5225_v22 = vpack.c.bf16 %v217_v62, %v213_v61 }
  0x22   :  { %6191 = vst [vmem:[#allocation28_spill] sm:$0xff] %v5200_v60  ;;  %v226_v19 = vld [vmem:[%s6092_s2 + $0x138] sm:$0xff]  ;;  %v5227_v23 = vpack.c.bf16 %v224_v17, %v220_v63  ;;  %v219_v26 = vld [vmem:[%s6092_s2 + $0x100] sm:$0xff]  ;;  %v221_v28 = vld [vmem:[%s6092_s2 + $0x110] sm:$0xff] }
  0x23   :  { %3643 = vmatpush1.bf16.msra.mxu0 %v5173_v51  ;;  %6192 = vst [vmem:[#allocation29_spill] sm:$0xff] %v5221_v21  ;;  %3675 = vmatpush1.bf16.msra.mxu1 %v5186_v55  ;;  %6193 = vst [vmem:[#allocation30_spill] sm:$0xff] %v5225_v22  ;;  %v223_v27 = vld [vmem:[%s6092_s2 + $0x120] sm:$0xff]  ;;  %v5239_v30 = vpack.c.bf16 %v226_v19, %v222_v18  ;;  %v225_v31 = vld [vmem:[%s6092_s2 + $0x130] sm:$0xff] }
  0x24   :  { %3645 = vmatprep.subr.bf16.mxu0 %v5188_v56  ;;  %6194 = vst [vmem:[#allocation31_spill] sm:$0xff] %v5227_v23  ;;  %3677 = vmatprep.subr.bf16.mxu1 %v5200_v60  ;;  %v228_v32 = vld [vmem:[%s6092_s2 + $0x148] sm:$0xff]  ;;  %v230_v36 = vld [vmem:[%s6092_s2 + $0x158] sm:$0xff]  ;;  %v5257_v39 = vpack.c.bf16 %v223_v27, %v219_v26  ;;  %v5261_v40 = vpack.c.bf16 %v225_v31, %v221_v28  ;;  %v227_v44 = vld [vmem:[%s6092_s2 + $0x140] sm:$0xff] }
  0x25   :  { %6195 = vst [vmem:[#allocation32_spill] sm:$0xff] %v5239_v30  ;;  %v232_v35 = vld [vmem:[%s6092_s2 + $0x168] sm:$0xff]  ;;  %v234_v37 = vld [vmem:[%s6092_s2 + $0x178] sm:$0xff]  ;;  %v231_v45 = vld [vmem:[%s6092_s2 + $0x160] sm:$0xff] }
  0x26   :  { %6196 = vst [vmem:[#allocation33_spill] sm:$0xff] %v5257_v39  ;;  %6197 = vst [vmem:[#allocation34_spill] sm:$0xff] %v5261_v40  ;;  %v5263_v41 = vpack.c.bf16 %v232_v35, %v228_v32  ;;  %v229_v46 = vld [vmem:[%s6092_s2 + $0x150] sm:$0xff]  ;;  %v5275_v48 = vpack.c.bf16 %v234_v37, %v230_v36  ;;  %v236_v50 = vld [vmem:[%s6092_s2 + $0x188] sm:$0xff]  ;;  %v5293_v57 = vpack.c.bf16 %v231_v45, %v227_v44 }
  0x27   :  { %3647 = vmatpush1.bf16.msra.mxu0 %v5221_v21  ;;  %3679 = vmatpush1.bf16.msra.mxu1 %v5225_v22  ;;  %v233_v49 = vld [vmem:[%s6092_s2 + $0x170] sm:$0xff]  ;;  %v240_v52 = vld [vmem:[%s6092_s2 + $0x1a8] sm:$0xff]  ;;  %v238_v53 = vld [vmem:[%s6092_s2 + $0x198] sm:$0xff] }
  0x28   :  { %3649 = vmatprep.subr.bf16.mxu0 %v5227_v23  ;;  %6198 = vst [vmem:[#allocation35_spill] sm:$0xff] %v5263_v41  ;;  %3681 = vmatprep.subr.bf16.mxu1 %v5239_v30  ;;  %6199 = vst [vmem:[#allocation36_spill] sm:$0xff] %v5275_v48  ;;  %v242_v54 = vld [vmem:[%s6092_s2 + $0x1b8] sm:$0xff]  ;;  %v5297_v58 = vpack.c.bf16 %v233_v49, %v229_v46  ;;  %v5299_v59 = vpack.c.bf16 %v240_v52, %v236_v50  ;;  %v235_v61 = vld [vmem:[%s6092_s2 + $0x180] sm:$0xff] }
  0x29   :  { %6200 = vst [vmem:[#allocation37_spill] sm:$0xff] %v5293_v57  ;;  %v239_v62 = vld [vmem:[%s6092_s2 + $0x1a0] sm:$0xff]  ;;  %v237_v63 = vld [vmem:[%s6092_s2 + $0x190] sm:$0xff]  ;;  %v5311_v17 = vpack.c.bf16 %v242_v54, %v238_v53  ;;  %v244_v19 = vld [vmem:[%s6092_s2 + $0x1c8] sm:$0xff] }
  0x2a   :  { %6201 = vst [vmem:[#allocation38_spill] sm:$0xff] %v5297_v58  ;;  %6202 = vst [vmem:[#allocation39_spill] sm:$0xff] %v5299_v59  ;;  %v241_v18 = vld [vmem:[%s6092_s2 + $0x1b0] sm:$0xff]  ;;  %v248_v26 = vld [vmem:[%s6092_s2 + $0x1e8] sm:$0xff]  ;;  %v5329_v31 = vpack.c.bf16 %v239_v62, %v235_v61 }
  0x2b   :  { %3651 = vmatpush1.bf16.msra.mxu0 %v5257_v39  ;;  %3683 = vmatpush1.bf16.msra.mxu1 %v5261_v40  ;;  %6203 = vst [vmem:[#allocation40_spill] sm:$0xff] %v5311_v17  ;;  %v246_v27 = vld [vmem:[%s6092_s2 + $0x1d8] sm:$0xff]  ;;  %v5333_v32 = vpack.c.bf16 %v241_v18, %v237_v63  ;;  %v5335_v35 = vpack.c.bf16 %v248_v26, %v244_v19  ;;  %v243_v36 = vld [vmem:[%s6092_s2 + $0x1c0] sm:$0xff]  ;;  %v245_v44 = vld [vmem:[%s6092_s2 + $0x1d0] sm:$0xff] }
  0x2c   :  { %3653 = vmatprep.subr.bf16.mxu0 %v5263_v41  ;;  %3685 = vmatprep.subr.bf16.mxu1 %v5275_v48  ;;  %v250_v28 = vld [vmem:[%s6092_s2 + $0x1f8] sm:$0xff]  ;;  %6204 = vst [vmem:[#allocation41_spill] sm:$0xff] %v5329_v31  ;;  %v247_v37 = vld [vmem:[%s6092_s2 + $0x1e0] sm:$0xff]  ;;  %v249_v46 = vld [vmem:[%s6092_s2 + $0x1f0] sm:$0xff] }
  0x2d   :  { %6205 = vst [vmem:[#allocation42_spill] sm:$0xff] %v5333_v32  ;;  %6206 = vst [vmem:[#allocation43_spill] sm:$0xff] %v5335_v35  ;;  %v5347_v45 = vpack.c.bf16 %v250_v28, %v246_v27  ;;  %v252_v49 = vld [vmem:[#allocation8 + $0x8] sm:$0xff]  ;;  %v254_v52 = vld [vmem:[#allocation8 + $0x18] sm:$0xff]  ;;  %v5353_v54 = vpack.c.bf16 %v247_v37, %v243_v36  ;;  %v5357_v61 = vpack.c.bf16 %v249_v46, %v245_v44 }
  0x2e   :  { %v256_v50 = vld [vmem:[#allocation8 + $0x28] sm:$0xff]  ;;  %v258_v53 = vld [vmem:[#allocation8 + $0x38] sm:$0xff]  ;;  %v251_v63 = vld [vmem:[#allocation8] sm:$0xff] }
  0x2f   :  { %3655 = vmatpush1.bf16.msra.mxu0 %v5293_v57  ;;  %3687 = vmatpush1.bf16.msra.mxu1 %v5297_v58  ;;  %6207 = vst [vmem:[#allocation44_spill] sm:$0xff] %v5347_v45  ;;  %6208 = vst [vmem:[#allocation45_spill] sm:$0xff] %v5353_v54  ;;  %v5359_v62 = vpack.c.bf16 %v256_v50, %v252_v49  ;;  %v255_v18 = vld [vmem:[#allocation8 + $0x20] sm:$0xff]  ;;  %v253_v19 = vld [vmem:[#allocation8 + $0x10] sm:$0xff]  ;;  %v5362_v26 = vpack.c.bf16 %v258_v53, %v254_v52 }
  0x30   :  { %3657 = vmatprep.subr.bf16.mxu0 %v5299_v59  ;;  %3689 = vmatprep.subr.bf16.mxu1 %v5311_v17  ;;  %6209 = vst [vmem:[#allocation46_spill] sm:$0xff] %v5357_v61  ;;  %v257_v27 = vld [vmem:[#allocation8 + $0x30] sm:$0xff]  ;;  %v260_v28 = vld [vmem:[#allocation8 + $0x48] sm:$0xff]  ;;  %v262_v36 = vld [vmem:[#allocation8 + $0x58] sm:$0xff]  ;;  %v5365_v7 = vpack.c.bf16 %v255_v18, %v251_v63 }
  0x31   :  { %6210 = vst [vmem:[#allocation47_spill] sm:$0xff] %v5359_v62  ;;  %6211 = vst [vmem:[#allocation48_spill] sm:$0xff] %v5362_v26  ;;  %v264_v16 = vld [vmem:[#allocation8 + $0x68] sm:$0xff]  ;;  %v266_v37 = vld [vmem:[#allocation8 + $0x78] sm:$0xff]  ;;  %v5369_v44 = vpack.c.bf16 %v257_v27, %v253_v19 }
  0x32   :  { %v315_v8 = vld [vmem:[#allocation2] sm:$0x3]  ;;  %v5371_v46 = vpack.c.bf16 %v264_v16, %v260_v28  ;;  %v259_v49 = vld [vmem:[#allocation8 + $0x40] sm:$0xff]  ;;  %v261_v52 = vld [vmem:[#allocation8 + $0x50] sm:$0xff]  ;;  %v5374_v53 = vpack.c.bf16 %v266_v37, %v262_v36 }
  0x33   :  { %3659 = vmatpush1.bf16.msra.mxu0 %v5329_v31  ;;  %3691 = vmatpush1.bf16.msra.mxu1 %v5333_v32  ;;  %v263_v50 = vld [vmem:[#allocation8 + $0x60] sm:$0xff]  ;;  %v265_v9 = vld [vmem:[#allocation8 + $0x70] sm:$0xff]  ;;  %v268_v6 = vld [vmem:[#allocation8 + $0x88] sm:$0xff] }
  0x34   :  { %3661 = vmatprep.subr.bf16.mxu0 %v5335_v35  ;;  %3693 = vmatprep.subr.bf16.mxu1 %v5347_v45  ;;  %v272_v10 = vld [vmem:[#allocation8 + $0xa8] sm:$0xff]  ;;  %v270_v63 = vld [vmem:[#allocation8 + $0x98] sm:$0xff]  ;;  %v5377_v19 = vpack.c.bf16 %v263_v50, %v259_v49  ;;  %v5381_v16 = vpack.c.bf16 %v265_v9, %v261_v52  ;;  %v267_v28 = vld [vmem:[#allocation8 + $0x80] sm:$0xff]  ;;  %v6214_v49 = vmov 0.0  }
  0x35   :  { %v274_v18 = vld [vmem:[#allocation8 + $0xb8] sm:$0xff]  ;;  %v5383_v27 = vpack.c.bf16 %v272_v10, %v268_v6  ;;  %v271_v36 = vld [vmem:[#allocation8 + $0xa0] sm:$0xff]  ;;  %v269_v37 = vld [vmem:[#allocation8 + $0x90] sm:$0xff] }
  0x36   :  { %v5386_v5 = vpack.c.bf16 %v274_v18, %v270_v63  ;;  %v276_v11 = vld [vmem:[#allocation8 + $0xc8] sm:$0xff]  ;;  %v278_v50 = vld [vmem:[#allocation8 + $0xd8] sm:$0xff]  ;;  %v5391_v6 = vpack.c.bf16 %v271_v36, %v267_v28  ;;  %v275_v52 = vld [vmem:[#allocation8 + $0xc0] sm:$0xff] }
  0x37   :  { %3663 = vmatpush1.bf16.msra.mxu0 %v5353_v54  ;;  %3695 = vmatpush1.bf16.msra.mxu1 %v5357_v61  ;;  %6212 = vst [vmem:[#allocation49_spill] sm:$0xff] %v5383_v27  ;;  %v280_v4 = vld [vmem:[#allocation8 + $0xe8] sm:$0xff]  ;;  %v282_v12 = vld [vmem:[#allocation8 + $0xf8] sm:$0xff]  ;;  %v279_v63 = vld [vmem:[#allocation8 + $0xe0] sm:$0xff] }
  0x38   :  { %3697 = vmatprep.subr.bf16.mxu0 %v5359_v62  ;;  %3729 = vmatprep.subr.bf16.mxu1 %v5362_v26  ;;  %6213 = vst [vmem:[#allocation50_spill] sm:$0xff] %v5386_v5  ;;  %6215 = vst [vmem:[#allocation51_spill] sm:$0xff] %v5391_v6  ;;  %v5397_v10 = vpack.c.bf16 %v280_v4, %v276_v11  ;;  %v277_v18 = vld [vmem:[#allocation8 + $0xd0] sm:$0xff]  ;;  %v5400_v3 = vpack.c.bf16 %v282_v12, %v278_v50  ;;  %v284_v2 = vld [vmem:[#allocation8 + $0x108] sm:$0xff] }
  0x39   :  { %v281_v13 = vld [vmem:[#allocation8 + $0xf0] sm:$0xff]  ;;  %v288_v14 = vld [vmem:[#allocation8 + $0x128] sm:$0xff]  ;;  %v286_v28 = vld [vmem:[#allocation8 + $0x118] sm:$0xff]  ;;  %v5403_v1 = vpack.c.bf16 %v279_v63, %v275_v52 }
  0x3a   :  { %385 = vmatmul.mubr.f32.vlgmr.msra.gmra.mrb[0].mxu0 %v315_v8  ;;  %456 = vmatmul.mubr.f32.vlgmr.msra.gmra.mrb[0].mxu1 %v315_v8  ;;  %v273_v8 = vld [vmem:[#allocation8 + $0xb0] sm:$0xff]  ;;  %6217 = vst [vmem:[#allocation53_spill] sm:$0xff] %v5397_v10  ;;  %6218 = vst [vmem:[#allocation54_spill] sm:$0xff] %v5400_v3  ;;  %v290_v36 = vld [vmem:[#allocation8 + $0x138] sm:$0xff]  ;;  %v5407_v4 = vpack.c.bf16 %v281_v13, %v277_v18  ;;  %v5409_v11 = vpack.c.bf16 %v288_v14, %v284_v2 }
  0x3b   :  { %3699 = vmatpush1.bf16.msra.mxu0 %v5365_v7  ;;  %3731 = vmatpush1.bf16.msra.mxu1 %v5369_v44  ;;  %v5395_v9 = vpack.c.bf16 %v273_v8, %v269_v37  ;;  %6219 = vst [vmem:[#allocation55_spill] sm:$0xff] %v5403_v1  ;;  %v283_v37 = vld [vmem:[#allocation8 + $0x100] sm:$0xff]  ;;  %v285_v8 = vld [vmem:[#allocation8 + $0x110] sm:$0xff]  ;;  %v5412_v50 = vpack.c.bf16 %v290_v36, %v286_v28  ;;  %v294_v52 = vld [vmem:[#allocation8 + $0x158] sm:$0xff] }
  0x3c   :  { %3701 = vmatprep.subr.bf16.mxu0 %v5371_v46  ;;  %3733 = vmatprep.subr.bf16.mxu1 %v5374_v53  ;;  %6220 = vst [vmem:[#allocation56_spill] sm:$0xff] %v5407_v4  ;;  %6221 = vst [vmem:[#allocation57_spill] sm:$0xff] %v5409_v11  ;;  %v287_v12 = vld [vmem:[#allocation8 + $0x120] sm:$0xff]  ;;  %v298_v63 = vld [vmem:[#allocation8 + $0x178] sm:$0xff] }
  0x3d   :  { %583 = vmatprep.mubr.f32.mxu0 %v6214_v49  ;;  %654 = vmatprep.mubr.f32.mxu1 %v6214_v49  ;;  %6216 = vst [vmem:[#allocation52_spill] sm:$0xff] %v5395_v9  ;;  %6222 = vst [vmem:[#allocation58_spill] sm:$0xff] %v5412_v50  ;;  %v291_v14 = vld [vmem:[#allocation8 + $0x140] sm:$0xff]  ;;  %v293_v28 = vld [vmem:[#allocation8 + $0x150] sm:$0xff]  ;;  %v5424_v36 = vpack.c.bf16 %v298_v63, %v294_v52 }
  0x3e   :  { %v295_v18 = vld [vmem:[#allocation8 + $0x160] sm:$0xff]  ;;  %v301_v52 = vld [vmem:[#allocation8 + $0x190] sm:$0xff] }
  0x3f   :  { %3703 = vmatpush1.bf16.msra.mxu0 %v5377_v19  ;;  %3735 = vmatpush1.bf16.msra.mxu1 %v5381_v16  ;;  %6225 = vst [vmem:[#allocation61_spill] sm:$0xff] %v5424_v36 }
  0x40   :  { %3705 = vmatprep.subr.bf16.mxu0 %v5383_v27  ;;  %3737 = vmatprep.subr.bf16.mxu1 %v5386_v5  ;;  %v289_v5 = vld [vmem:[#allocation8 + $0x130] sm:$0xff]  ;;  %v292_v27 = vld [vmem:[#allocation8 + $0x148] sm:$0xff] }
  0x41   :  { %v5419_v2 = vpack.c.bf16 %v289_v5, %v285_v8  ;;  %v303_v8 = vld [vmem:[#allocation8 + $0x1a0] sm:$0xff] }
  0x43   :  { %3707 = vmatpush1.bf16.msra.mxu0 %v5391_v6  ;;  %3739 = vmatpush1.bf16.msra.mxu1 %v5395_v9  ;;  %v296_v6 = vld [vmem:[#allocation8 + $0x168] sm:$0xff]  ;;  %v5415_v9 = vpack.c.bf16 %v287_v12, %v283_v37  ;;  %6224 = vst [vmem:[#allocation60_spill] sm:$0xff] %v5419_v2  ;;  %v302_v37 = vld [vmem:[#allocation8 + $0x198] sm:$0xff] }
  0x44   :  { %3709 = vmatprep.subr.bf16.mxu0 %v5397_v10  ;;  %3741 = vmatprep.subr.bf16.mxu1 %v5400_v3  ;;  %v5421_v13 = vpack.c.bf16 %v296_v6, %v292_v27  ;;  %v297_v3 = vld [vmem:[#allocation8 + $0x170] sm:$0xff]  ;;  %v300_v10 = vld [vmem:[#allocation8 + $0x188] sm:$0xff]  ;;  %v306_v12 = vld [vmem:[#allocation8 + $0x1b8] sm:$0xff] }
  0x45   :  { %6223 = vst [vmem:[#allocation59_spill] sm:$0xff] %v5415_v9  ;;  %v5431_v5 = vpack.c.bf16 %v297_v3, %v293_v28  ;;  %v299_v6 = vld [vmem:[#allocation8 + $0x180] sm:$0xff]  ;;  %v5436_v63 = vpack.c.bf16 %v306_v12, %v302_v37  ;;  %v309_v12 = vld [vmem:[#allocation8 + $0x1d0] sm:$0xff] }
  0x46   :  { %v311_v28 = vld [vmem:[#allocation8 + $0x1e0] sm:$0xff] }
  0x47   :  { %3711 = vmatpush1.bf16.msra.mxu0 %v5403_v1  ;;  %3743 = vmatpush1.bf16.msra.mxu1 %v5407_v4  ;;  %v304_v1 = vld [vmem:[#allocation8 + $0x1a8] sm:$0xff]  ;;  %v5427_v4 = vpack.c.bf16 %v295_v18, %v291_v14  ;;  %v310_v14 = vld [vmem:[#allocation8 + $0x1d8] sm:$0xff] }
  0x48   :  { %3713 = vmatprep.subr.bf16.mxu0 %v5409_v11  ;;  %3745 = vmatprep.subr.bf16.mxu1 %v5412_v50  ;;  %v5433_v27 = vpack.c.bf16 %v304_v1, %v300_v10  ;;  %v305_v50 = vld [vmem:[#allocation8 + $0x1b0] sm:$0xff]  ;;  %v308_v11 = vld [vmem:[#allocation8 + $0x1c8] sm:$0xff]  ;;  %v314_v18 = vld [vmem:[#allocation8 + $0x1f8] sm:$0xff] }
  0x49   :  { %v5443_v1 = vpack.c.bf16 %v305_v50, %v301_v52  ;;  %v307_v10 = vld [vmem:[#allocation8 + $0x1c0] sm:$0xff]  ;;  %v5448_v37 = vpack.c.bf16 %v314_v18, %v310_v14 }
  0x4b   :  { %3715 = vmatpush1.bf16.msra.mxu0 %v5415_v9  ;;  %3747 = vmatpush1.bf16.msra.mxu1 %v5419_v2  ;;  %v312_v9 = vld [vmem:[#allocation8 + $0x1e8] sm:$0xff]  ;;  %v5439_v2 = vpack.c.bf16 %v303_v8, %v299_v6  ;;  %v5451_v6 = vpack.c.bf16 %v311_v28, %v307_v10  ;;  %v471_v8 = vlaneseq }
  0x4c   :  { %3717 = vmatprep.subr.bf16.mxu0 %v5421_v13  ;;  %3749 = vmatprep.subr.bf16.mxu1 %v5424_v36  ;;  %v5445_v3 = vpack.c.bf16 %v312_v9, %v308_v11  ;;  %v313_v36 = vld [vmem:[#allocation8 + $0x1f0] sm:$0xff]  ;;  %v317_v9 = vld [vmem:[#allocation4] sm:$0x3]  ;;  %v4945_v11 = vmov 1983009808  }
  0x4d   :  { %v5455_v50 = vpack.c.bf16 %v313_v36, %v309_v12  ;;  %v469_v36 = vunpack.c.l.s4 %v4945_v11  ;;  %v472_v14 = vshrl.u32 %v471_v8, 7 }
  0x4f   :  { %3719 = vmatpush1.bf16.msra.mxu0 %v5427_v4  ;;  %3751 = vmatpush1.bf16.msra.mxu1 %v5431_v5  ;;  %v470_v52 = vunpack.c.0.s8 %v469_v36 }
  0x50   :  { %3721 = vmatprep.subr.bf16.mxu0 %v5433_v27  ;;  %3753 = vmatprep.subr.bf16.mxu1 %v5436_v63 }
  0x51   :  { %v5496_v10 = vsub.s32 %v470_v52, %v472_v14 }
  0x53   :  { %3723 = vmatpush1.bf16.msra.mxu0 %v5439_v2  ;;  %3755 = vmatpush1.bf16.msra.mxu1 %v5443_v1  ;;  %6226 = vst [vmem:[#allocation62_spill] sm:$0xff] %v5496_v10 }
  0x54   :  { %3725 = vmatprep.subr.bf16.mxu0 %v5445_v3  ;;  %3757 = vmatprep.subr.bf16.mxu1 %v5448_v37 }
  0x57   :  { %3727 = vmatpush1.bf16.msra.mxu0 %v5451_v6  ;;  %3759 = vmatpush1.bf16.msra.mxu1 %v5455_v50 }
  0x58   :  { %3761 = vmatprep.subr.bf16.mxu0 %v5083_v20  ;;  %3793 = vmatprep.subr.bf16.mxu1 %v5094_v24 }
  0x5a   :  { %584 = vmatmul.mubr.f32.vlgmr.msra.gmra.mrb[2].mxu0 %v317_v9  ;;  %655 = vmatmul.mubr.f32.vlgmr.msra.gmra.mrb[2].mxu1 %v317_v9 }
  0x5b   :  { %3763 = vmatpush1.bf16.msra.mxu0 %v5096_v25  ;;  %3795 = vmatpush1.bf16.msra.mxu1 %v5108_v29 }
  0x5c   :  { %3765 = vmatprep.subr.bf16.mxu0 %v5121_v33  ;;  %3797 = vmatprep.subr.bf16.mxu1 %v5123_v34 }
  0x5d   :  { %783 = vmatprep.mubr.f32.mxu0 %v6214_v49  ;;  %854 = vmatprep.mubr.f32.mxu1 %v6214_v49 }
  0x5f   :  { %3767 = vmatpush1.bf16.msra.mxu0 %v5135_v38  ;;  %3799 = vmatpush1.bf16.msra.mxu1 %v5148_v42 }
  0x60   :  { %3769 = vmatprep.subr.bf16.mxu0 %v5150_v43  ;;  %3801 = vmatprep.subr.bf16.mxu1 %v5161_v47 }
  0x63   :  { %3771 = vmatpush1.bf16.msra.mxu0 %v5173_v51  ;;  %3803 = vmatpush1.bf16.msra.mxu1 %v5186_v55 }
  0x64   :  { %3773 = vmatprep.subr.bf16.mxu0 %v5188_v56  ;;  %3805 = vmatprep.subr.bf16.mxu1 %v5200_v60 }
  0x67   :  { %3775 = vmatpush1.bf16.msra.mxu0 %v5221_v21  ;;  %3807 = vmatpush1.bf16.msra.mxu1 %v5225_v22 }
  0x68   :  { %3777 = vmatprep.subr.bf16.mxu0 %v5227_v23  ;;  %3809 = vmatprep.subr.bf16.mxu1 %v5239_v30 }
  0x6b   :  { %3779 = vmatpush1.bf16.msra.mxu0 %v5257_v39  ;;  %3811 = vmatpush1.bf16.msra.mxu1 %v5261_v40 }
  0x6c   :  { %3781 = vmatprep.subr.bf16.mxu0 %v5263_v41  ;;  %3813 = vmatprep.subr.bf16.mxu1 %v5275_v48 }
  0x6f   :  { %3783 = vmatpush1.bf16.msra.mxu0 %v5293_v57  ;;  %3815 = vmatpush1.bf16.msra.mxu1 %v5297_v58 }
  0x70   :  { %3785 = vmatprep.subr.bf16.mxu0 %v5299_v59  ;;  %3817 = vmatprep.subr.bf16.mxu1 %v5311_v17 }
  0x73   :  { %3787 = vmatpush1.bf16.msra.mxu0 %v5329_v31  ;;  %3819 = vmatpush1.bf16.msra.mxu1 %v5333_v32 }
  0x74   :  { %3789 = vmatprep.subr.bf16.mxu0 %v5335_v35  ;;  %3821 = vmatprep.subr.bf16.mxu1 %v5347_v45 }
  0x77   :  { %3791 = vmatpush1.bf16.msra.mxu0 %v5353_v54  ;;  %3823 = vmatpush1.bf16.msra.mxu1 %v5357_v61 }
  0x78   :  { %3825 = vmatprep.subr.bf16.mxu0 %v5359_v62  ;;  %3857 = vmatprep.subr.bf16.mxu1 %v5362_v26 }
 0x10d   :  { %v386_v18 = vpop.f32.mrb[0].mxu0  ;;  %v457_v28 = vpop.f32.mrb[0].mxu1 }
 0x10e   :  { %v388_v12 = vpop.f32.mrb[1].mxu0  ;;  %v459_v45 = vpop.f32.mrb[1].mxu1 }
 0x10f   :  { %v466_v9 = vcombine.low %v386_v18, %v388_v12  ;;  %v467_v35 = vcombine.low %v457_v28, %v459_v45 }
 0x111   :  { %v474_v54 = vrot.slane %v466_v9, %v5496_v10  ;;  %v481_v61 = vrot.slane %v467_v35, %v5496_v10 }
 0x113   :  { %v482_v62 = vcombine.low %v474_v54, %v481_v61 }
 0x115   :  { %v484_v26 = vadd.f32 %v482_v62, %v4979_v0 }
 0x117   :  { %v3570_v32 = vmul.f32 -1.442695, %v484_v26  ;;  %v492_v11 = vrot.slane %v484_v26, 2  ;;  %v503_v8 = vrot.slane %v484_v26, 6  ;;  %v500_v31 = vrot.slane %v484_v26, 4 }
 0x119   :  { %4661 = vpow2.f32 %v3570_v32  ;;  %v3571_v36 = vmul.f32 -1.442695, %v492_v11  ;;  %v3572_v52 = vmul.f32 -1.442695, %v503_v8  ;;  %v316_v11 = vld [vmem:[#allocation3] sm:$0x3] }
 0x11b   :  { %4663 = vpow2.f32 %v3571_v36 }
 0x11c   :  { %4665 = vpow2.f32 %v3572_v52 }
 0x123   :  { %v4662_v14 = vpop.eup %4661 }
 0x124   :  { %v488_v17 = vadd.f32 1.0, %v4662_v14 }
 0x125   :  { %v4664_v18 = vpop.eup %4663 }
 0x126   :  { %4667 = vrcp.f32 %v488_v17  ;;  %v497_v45 = vadd.f32 1.0, %v4664_v18  ;;  %v4666_v28 = vpop.eup %4665 }
 0x127   :  { %4669 = vtanh.f32 %v500_v31  ;;  %v508_v52 = vadd.f32 1.0, %v4666_v28 }
 0x128   :  { %4671 = vrcp.f32 %v497_v45 }
 0x129   :  { %4673 = vrcp.f32 %v508_v52  ;;  %v6230_v52 = vld [vmem:[#allocation52_spill] sm:$0xff] }
 0x12d   :  { %v585_v35 = vpop.f32.mrb[2].mxu0  ;;  %v656_v54 = vpop.f32.mrb[2].mxu1 }
 0x12e   :  { %v587_v61 = vpop.f32.mrb[3].mxu0  ;;  %v658_v62 = vpop.f32.mrb[3].mxu1 }
 0x12f   :  { %v665_v0 = vcombine.low %v585_v35, %v587_v61  ;;  %v666_v32 = vcombine.low %v656_v54, %v658_v62 }
 0x130   :  { %v4668_v12 = vpop.eup %4667 }
 0x131   :  { %v673_v9 = vrot.slane %v665_v0, %v5496_v10  ;;  %v4670_v36 = vpop.eup %4669  ;;  %v680_v26 = vrot.slane %v666_v32, %v5496_v10 }
 0x132   :  { %v4672_v8 = vpop.eup %4671  ;;  %v512_v31 = vmul.f32 %v4670_v36, %v4668_v12 }
 0x133   :  { %v681_v17 = vcombine.low %v673_v9, %v680_v26  ;;  %v511_v14 = vmul.f32 %v4672_v8, %v316_v11  ;;  %v4674_v62 = vpop.eup %4673  ;;  %v6228_v26 = vld [vmem:[#allocation50_spill] sm:$0xff]  ;;  %v6229_v8 = vld [vmem:[#allocation51_spill] sm:$0xff] }
 0x135   :  { %v683_v18 = vadd.f32 %v5054_v15, %v681_v17  ;;  %v5504_v45 = vadd.f32 %v512_v31, %v511_v14  ;;  %v6231_v14 = vld [vmem:[#allocation53_spill] sm:$0xff]  ;;  %v6232_v31 = vld [vmem:[#allocation54_spill] sm:$0xff] }
 0x137   :  { %v3573_v35 = vmul.f32 -1.442695, %v683_v18  ;;  %v691_v61 = vrot.slane %v683_v18, 2  ;;  %4675 = vtanh.f32 %v5504_v45  ;;  %v702_v0 = vrot.slane %v683_v18, 6 }
 0x138   :  { %v699_v9 = vrot.slane %v683_v18, 4 }
 0x139   :  { %4677 = vpow2.f32 %v3573_v35  ;;  %v3574_v54 = vmul.f32 -1.442695, %v691_v61  ;;  %v3575_v32 = vmul.f32 -1.442695, %v702_v0  ;;  %v318_v35 = vld [vmem:[#allocation5] sm:$0x3] }
 0x13b   :  { %4679 = vpow2.f32 %v3574_v54 }
 0x13c   :  { %4681 = vpow2.f32 %v3575_v32  ;;  %v6234_v32 = vld [vmem:[#allocation56_spill] sm:$0xff] }
 0x141   :  { %v4676_v10 = vpop.eup %4675 }
 0x142   :  { %v515_v11 = vmul.f32 %v4676_v10, %v4674_v62  ;;  %v6227_v10 = vld [vmem:[#allocation49_spill] sm:$0xff]  ;;  %v6233_v62 = vld [vmem:[#allocation55_spill] sm:$0xff] }
 0x143   :  { %v4678_v28 = vpop.eup %4677 }
 0x144   :  { %v687_v12 = vadd.f32 1.0, %v4678_v28  ;;  %516 = vst [vmem:[%s6094_s4] sm:$0x3] %v515_v11  ;;  %784 = vmatmul.mubr.f32.vlgmr.msra.gmra.mrb[4].mxu0 %v515_v11  ;;  %855 = vmatmul.mubr.f32.vlgmr.msra.gmra.mrb[4].mxu1 %v515_v11  ;;  %v6235_v28 = vld [vmem:[#allocation57_spill] sm:$0xff] }
 0x145   :  { %v4680_v36 = vpop.eup %4679  ;;  %3827 = vmatpush1.bf16.msra.mxu0 %v5365_v7  ;;  %3859 = vmatpush1.bf16.msra.mxu1 %v5369_v44 }
 0x146   :  { %4683 = vrcp.f32 %v687_v12  ;;  %v696_v15 = vadd.f32 1.0, %v4680_v36  ;;  %3829 = vmatprep.subr.bf16.mxu0 %v5371_v46  ;;  %3861 = vmatprep.subr.bf16.mxu1 %v5374_v53  ;;  %v4682_v17 = vpop.eup %4681 }
 0x147   :  { %4685 = vtanh.f32 %v699_v9  ;;  %983 = vmatprep.mubr.f32.mxu0 %v6214_v49  ;;  %1054 = vmatprep.mubr.f32.mxu1 %v6214_v49  ;;  %v707_v0 = vadd.f32 1.0, %v4682_v17  ;;  %v6236_v9 = vld [vmem:[#allocation58_spill] sm:$0xff]  ;;  %v6239_v17 = vld [vmem:[#allocation61_spill] sm:$0xff] }
 0x148   :  { %4687 = vrcp.f32 %v696_v15  ;;  %v6237_v15 = vld [vmem:[#allocation59_spill] sm:$0xff] }
 0x149   :  { %3831 = vmatpush1.bf16.msra.mxu0 %v5377_v19  ;;  %3863 = vmatpush1.bf16.msra.mxu1 %v5381_v16  ;;  %4689 = vrcp.f32 %v707_v0  ;;  %v6241_v0 = vld [vmem:[#allocation41_spill] sm:$0xff] }
 0x14a   :  { %3833 = vmatprep.subr.bf16.mxu0 %v6227_v10  ;;  %3865 = vmatprep.subr.bf16.mxu1 %v6228_v26 }
 0x14d   :  { %3835 = vmatpush1.bf16.msra.mxu0 %v6229_v8  ;;  %3867 = vmatpush1.bf16.msra.mxu1 %v6230_v52 }
 0x14e   :  { %3837 = vmatprep.subr.bf16.mxu0 %v6231_v14  ;;  %3869 = vmatprep.subr.bf16.mxu1 %v6232_v31  ;;  %v6238_v31 = vld [vmem:[#allocation60_spill] sm:$0xff] }
 0x150   :  { %v4684_v18 = vpop.eup %4683 }
 0x151   :  { %v4686_v61 = vpop.eup %4685  ;;  %3839 = vmatpush1.bf16.msra.mxu0 %v6233_v62  ;;  %3871 = vmatpush1.bf16.msra.mxu1 %v6234_v32 }
 0x152   :  { %v4688_v54 = vpop.eup %4687  ;;  %3841 = vmatprep.subr.bf16.mxu0 %v6235_v28  ;;  %3873 = vmatprep.subr.bf16.mxu1 %v6236_v9  ;;  %v711_v12 = vmul.f32 %v4686_v61, %v4684_v18 }
 0x153   :  { %v710_v11 = vmul.f32 %v4688_v54, %v318_v35  ;;  %v4690_v18 = vpop.eup %4689  ;;  %v6240_v54 = vld [vmem:[#allocation40_spill] sm:$0xff] }
 0x155   :  { %v5528_v36 = vadd.f32 %v711_v12, %v710_v11  ;;  %3843 = vmatpush1.bf16.msra.mxu0 %v6237_v15  ;;  %3875 = vmatpush1.bf16.msra.mxu1 %v6238_v31  ;;  %v6242_v11 = vld [vmem:[#allocation42_spill] sm:$0xff]  ;;  %v6243_v12 = vld [vmem:[#allocation43_spill] sm:$0xff] }
 0x156   :  { %3845 = vmatprep.subr.bf16.mxu0 %v5421_v13  ;;  %3877 = vmatprep.subr.bf16.mxu1 %v6239_v17 }
 0x157   :  { %4691 = vtanh.f32 %v5528_v36 }
 0x159   :  { %3847 = vmatpush1.bf16.msra.mxu0 %v5427_v4  ;;  %3879 = vmatpush1.bf16.msra.mxu1 %v5431_v5 }
 0x15a   :  { %3849 = vmatprep.subr.bf16.mxu0 %v5433_v27  ;;  %3881 = vmatprep.subr.bf16.mxu1 %v5436_v63 }
 0x15d   :  { %3851 = vmatpush1.bf16.msra.mxu0 %v5439_v2  ;;  %3883 = vmatpush1.bf16.msra.mxu1 %v5443_v1 }
 0x15e   :  { %3853 = vmatprep.subr.bf16.mxu0 %v5445_v3  ;;  %3885 = vmatprep.subr.bf16.mxu1 %v5448_v37 }
 0x161   :  { %v4692_v35 = vpop.eup %4691  ;;  %3855 = vmatpush1.bf16.msra.mxu0 %v5451_v6  ;;  %3887 = vmatpush1.bf16.msra.mxu1 %v5455_v50 }
 0x162   :  { %v714_v61 = vmul.f32 %v4692_v35, %v4690_v18  ;;  %3889 = vmatprep.subr.bf16.mxu0 %v5083_v20  ;;  %3921 = vmatprep.subr.bf16.mxu1 %v5094_v24  ;;  %v6244_v18 = vld [vmem:[#allocation44_spill] sm:$0xff]  ;;  %v6245_v35 = vld [vmem:[#allocation45_spill] sm:$0xff] }
 0x164   :  { %3576 = vst [vmem:[%s6095_s5 + $0xe] sm:$0x3] %v714_v61  ;;  %984 = vmatmul.mubr.f32.vlgmr.msra.gmra.mrb[6].mxu0 %v714_v61  ;;  %1055 = vmatmul.mubr.f32.vlgmr.msra.gmra.mrb[6].mxu1 %v714_v61  ;;  %v6246_v61 = vld [vmem:[#allocation46_spill] sm:$0xff] }
 0x165   :  { %3891 = vmatpush1.bf16.msra.mxu0 %v5096_v25  ;;  %3923 = vmatpush1.bf16.msra.mxu1 %v5108_v29 }
 0x166   :  { %3893 = vmatprep.subr.bf16.mxu0 %v5121_v33  ;;  %3925 = vmatprep.subr.bf16.mxu1 %v5123_v34 }
 0x167   :  { %1183 = vmatprep.mubr.f32.mxu0 %v6214_v49  ;;  %1254 = vmatprep.mubr.f32.mxu1 %v6214_v49 }
 0x169   :  { %3895 = vmatpush1.bf16.msra.mxu0 %v5135_v38  ;;  %3927 = vmatpush1.bf16.msra.mxu1 %v5148_v42 }
 0x16a   :  { %3897 = vmatprep.subr.bf16.mxu0 %v5150_v43  ;;  %3929 = vmatprep.subr.bf16.mxu1 %v5161_v47 }
 0x16d   :  { %3899 = vmatpush1.bf16.msra.mxu0 %v5173_v51  ;;  %3931 = vmatpush1.bf16.msra.mxu1 %v5186_v55 }
 0x16e   :  { %3901 = vmatprep.subr.bf16.mxu0 %v5188_v56  ;;  %3933 = vmatprep.subr.bf16.mxu1 %v5200_v60 }
 0x171   :  { %3903 = vmatpush1.bf16.msra.mxu0 %v5221_v21  ;;  %3935 = vmatpush1.bf16.msra.mxu1 %v5225_v22 }
 0x172   :  { %3905 = vmatprep.subr.bf16.mxu0 %v5227_v23  ;;  %3937 = vmatprep.subr.bf16.mxu1 %v5239_v30 }
 0x175   :  { %3907 = vmatpush1.bf16.msra.mxu0 %v5257_v39  ;;  %3939 = vmatpush1.bf16.msra.mxu1 %v5261_v40  ;;  %v6249_v39 = vld [vmem:[#allocation62_spill] sm:$0xff] }
 0x176   :  { %3909 = vmatprep.subr.bf16.mxu0 %v5263_v41  ;;  %3941 = vmatprep.subr.bf16.mxu1 %v5275_v48  ;;  %v6247_v48 = vld [vmem:[#allocation47_spill] sm:$0xff] }
 0x179   :  { %3911 = vmatpush1.bf16.msra.mxu0 %v5293_v57  ;;  %3943 = vmatpush1.bf16.msra.mxu1 %v5297_v58  ;;  %v6248_v57 = vld [vmem:[#allocation48_spill] sm:$0xff] }
 0x17a   :  { %3913 = vmatprep.subr.bf16.mxu0 %v5299_v59  ;;  %3945 = vmatprep.subr.bf16.mxu1 %v6240_v54 }
 0x17d   :  { %3915 = vmatpush1.bf16.msra.mxu0 %v6241_v0  ;;  %3947 = vmatpush1.bf16.msra.mxu1 %v6242_v11 }
 0x17e   :  { %3917 = vmatprep.subr.bf16.mxu0 %v6243_v12  ;;  %3949 = vmatprep.subr.bf16.mxu1 %v6244_v18  ;;  %v6250_v18 = vld [vmem:[#allocation11_spill] sm:$0xff] }
 0x181   :  { %3919 = vmatpush1.bf16.msra.mxu0 %v6245_v35  ;;  %3951 = vmatpush1.bf16.msra.mxu1 %v6246_v61 }
 0x182   :  { %3953 = vmatprep.subr.bf16.mxu0 %v6247_v48  ;;  %3985 = vmatprep.subr.bf16.mxu1 %v6248_v57 }
 0x217   :  { %v785_v58 = vpop.f32.mrb[4].mxu0  ;;  %v856_v59 = vpop.f32.mrb[4].mxu1 }
 0x218   :  { %v787_v41 = vpop.f32.mrb[5].mxu0  ;;  %v858_v54 = vpop.f32.mrb[5].mxu1 }
 0x219   :  { %v865_v40 = vcombine.low %v785_v58, %v787_v41  ;;  %v866_v0 = vcombine.low %v856_v59, %v858_v54 }
 0x21b   :  { %v873_v11 = vrot.slane %v865_v40, %v6249_v39  ;;  %v880_v12 = vrot.slane %v866_v0, %v6249_v39 }
 0x21d   :  { %v881_v30 = vcombine.low %v873_v11, %v880_v12 }
 0x21f   :  { %v883_v23 = vadd.f32 %v881_v30, %v6250_v18 }
 0x221   :  { %v3577_v35 = vmul.f32 -1.442695, %v883_v23  ;;  %v891_v22 = vrot.slane %v883_v23, 2  ;;  %v902_v48 = vrot.slane %v883_v23, 6  ;;  %v899_v60 = vrot.slane %v883_v23, 4 }
 0x223   :  { %4693 = vpow2.f32 %v3577_v35  ;;  %v3578_v61 = vmul.f32 -1.442695, %v891_v22  ;;  %v3579_v57 = vmul.f32 -1.442695, %v902_v48 }
 0x225   :  { %4695 = vpow2.f32 %v3578_v61 }
 0x226   :  { %4697 = vpow2.f32 %v3579_v57 }
 0x22d   :  { %v4694_v21 = vpop.eup %4693 }
 0x22e   :  { %v887_v56 = vadd.f32 1.0, %v4694_v21 }
 0x22f   :  { %v4696_v55 = vpop.eup %4695 }
 0x230   :  { %4699 = vrcp.f32 %v887_v56  ;;  %v896_v41 = vadd.f32 1.0, %v4696_v55  ;;  %v4698_v54 = vpop.eup %4697 }
 0x231   :  { %4701 = vtanh.f32 %v899_v60  ;;  %v907_v18 = vadd.f32 1.0, %v4698_v54  ;;  %v6251_v60 = vld [vmem:[#allocation24_spill] sm:$0xff] }
 0x232   :  { %4703 = vrcp.f32 %v896_v41 }
 0x233   :  { %4705 = vrcp.f32 %v907_v18  ;;  %v6252_v18 = vld [vmem:[#allocation54_spill] sm:$0xff] }
 0x237   :  { %v985_v40 = vpop.f32.mrb[6].mxu0  ;;  %v1056_v58 = vpop.f32.mrb[6].mxu1 }
 0x238   :  { %v987_v59 = vpop.f32.mrb[7].mxu0  ;;  %v1058_v30 = vpop.f32.mrb[7].mxu1 }
 0x239   :  { %v1065_v0 = vcombine.low %v985_v40, %v987_v59  ;;  %v1066_v11 = vcombine.low %v1056_v58, %v1058_v30 }
 0x23a   :  { %v4700_v22 = vpop.eup %4699 }
 0x23b   :  { %v4702_v12 = vpop.eup %4701  ;;  %v1073_v48 = vrot.slane %v1065_v0, %v6249_v39  ;;  %v1080_v23 = vrot.slane %v1066_v11, %v6249_v39 }
 0x23c   :  { %v4704_v21 = vpop.eup %4703  ;;  %v911_v56 = vmul.f32 %v4702_v12, %v4700_v22 }
 0x23d   :  { %v1081_v57 = vcombine.low %v1073_v48, %v1080_v23  ;;  %v910_v55 = vmul.f32 %v4704_v21, %v5504_v45  ;;  %v4706_v30 = vpop.eup %4705 }
 0x23f   :  { %v1083_v35 = vadd.f32 %v6251_v60, %v1081_v57  ;;  %v5591_v61 = vadd.f32 %v911_v56, %v910_v55 }
 0x241   :  { %v3581_v41 = vmul.f32 -1.442695, %v1083_v35  ;;  %v1091_v40 = vrot.slane %v1083_v35, 2  ;;  %4707 = vtanh.f32 %v5591_v61  ;;  %v1102_v59 = vrot.slane %v1083_v35, 6 }
 0x242   :  { %v1099_v48 = vrot.slane %v1083_v35, 4 }
 0x243   :  { %4709 = vpow2.f32 %v3581_v41  ;;  %v3582_v58 = vmul.f32 -1.442695, %v1091_v40  ;;  %v3583_v0 = vmul.f32 -1.442695, %v1102_v59 }
 0x245   :  { %4711 = vpow2.f32 %v3582_v58 }
 0x246   :  { %4713 = vpow2.f32 %v3583_v0  ;;  %v6254_v0 = vld [vmem:[#allocation27_spill] sm:$0xff] }
 0x24b   :  { %v4708_v54 = vpop.eup %4707 }
 0x24c   :  { %v914_v45 = vmul.f32 %v4708_v54, %v4706_v30  ;;  %v6253_v30 = vld [vmem:[#allocation26_spill] sm:$0xff]  ;;  %v6255_v54 = vld [vmem:[#allocation28_spill] sm:$0xff] }
 0x24d   :  { %v4710_v11 = vpop.eup %4709 }
 0x24e   :  { %v1087_v22 = vadd.f32 1.0, %v4710_v11  ;;  %3580 = vst [vmem:[%s6094_s4 + $0x2] sm:$0x3] %v914_v45  ;;  %1184 = vmatmul.mubr.f32.vlgmr.msra.gmra.mrb[8].mxu0 %v914_v45  ;;  %1255 = vmatmul.mubr.f32.vlgmr.msra.gmra.mrb[8].mxu1 %v914_v45  ;;  %v6256_v11 = vld [vmem:[#allocation29_spill] sm:$0xff]  ;;  %v6258_v45 = vld [vmem:[#allocation31_spill] sm:$0xff] }
 0x24f   :  { %v4712_v12 = vpop.eup %4711  ;;  %3955 = vmatpush1.bf16.msra.mxu0 %v5365_v7  ;;  %3987 = vmatpush1.bf16.msra.mxu1 %v5369_v44 }
 0x250   :  { %4715 = vrcp.f32 %v1087_v22  ;;  %v1096_v23 = vadd.f32 1.0, %v4712_v12  ;;  %3957 = vmatprep.subr.bf16.mxu0 %v5371_v46  ;;  %3989 = vmatprep.subr.bf16.mxu1 %v5374_v53  ;;  %v4714_v21 = vpop.eup %4713  ;;  %v6259_v22 = vld [vmem:[#allocation32_spill] sm:$0xff]  ;;  %v6260_v12 = vld [vmem:[#allocation33_spill] sm:$0xff] }
 0x251   :  { %4717 = vtanh.f32 %v1099_v48  ;;  %1383 = vmatprep.mubr.f32.mxu0 %v6214_v49  ;;  %1454 = vmatprep.mubr.f32.mxu1 %v6214_v49  ;;  %v1107_v60 = vadd.f32 1.0, %v4714_v21  ;;  %v6257_v48 = vld [vmem:[#allocation30_spill] sm:$0xff]  ;;  %v6262_v21 = vld [vmem:[#allocation35_spill] sm:$0xff] }
 0x252   :  { %4719 = vrcp.f32 %v1096_v23  ;;  %v6261_v23 = vld [vmem:[#allocation34_spill] sm:$0xff] }
 0x253   :  { %3959 = vmatpush1.bf16.msra.mxu0 %v5377_v19  ;;  %3991 = vmatpush1.bf16.msra.mxu1 %v5381_v16  ;;  %4721 = vrcp.f32 %v1107_v60  ;;  %v6266_v60 = vld [vmem:[#allocation39_spill] sm:$0xff] }
 0x254   :  { %3961 = vmatprep.subr.bf16.mxu0 %v6227_v10  ;;  %3993 = vmatprep.subr.bf16.mxu1 %v6228_v26 }
 0x257   :  { %3963 = vmatpush1.bf16.msra.mxu0 %v6229_v8  ;;  %3995 = vmatpush1.bf16.msra.mxu1 %v6230_v52 }
 0x258   :  { %3965 = vmatprep.subr.bf16.mxu0 %v6231_v14  ;;  %3997 = vmatprep.subr.bf16.mxu1 %v6252_v18 }
 0x25a   :  { %v4716_v57 = vpop.eup %4715 }
 0x25b   :  { %v4718_v55 = vpop.eup %4717  ;;  %3967 = vmatpush1.bf16.msra.mxu0 %v6233_v62  ;;  %3999 = vmatpush1.bf16.msra.mxu1 %v6234_v32 }
 0x25c   :  { %v4720_v56 = vpop.eup %4719  ;;  %3969 = vmatprep.subr.bf16.mxu0 %v6235_v28  ;;  %4001 = vmatprep.subr.bf16.mxu1 %v6236_v9  ;;  %v1111_v41 = vmul.f32 %v4718_v55, %v4716_v57  ;;  %v6263_v57 = vld [vmem:[#allocation36_spill] sm:$0xff]  ;;  %v6264_v55 = vld [vmem:[#allocation37_spill] sm:$0xff] }
 0x25d   :  { %v1110_v35 = vmul.f32 %v4720_v56, %v5528_v36  ;;  %v4722_v36 = vpop.eup %4721  ;;  %v6265_v56 = vld [vmem:[#allocation38_spill] sm:$0xff] }
 0x25f   :  { %v5616_v40 = vadd.f32 %v1111_v41, %v1110_v35  ;;  %3971 = vmatpush1.bf16.msra.mxu0 %v6237_v15  ;;  %4003 = vmatpush1.bf16.msra.mxu1 %v6238_v31  ;;  %v6267_v35 = vld [vmem:[#allocation40_spill] sm:$0xff]  ;;  %v6268_v41 = vld [vmem:[#allocation41_spill] sm:$0xff] }
 0x260   :  { %3973 = vmatprep.subr.bf16.mxu0 %v5421_v13  ;;  %4005 = vmatprep.subr.bf16.mxu1 %v6239_v17 }
 0x261   :  { %4723 = vtanh.f32 %v5616_v40 }
 0x263   :  { %3975 = vmatpush1.bf16.msra.mxu0 %v5427_v4  ;;  %4007 = vmatpush1.bf16.msra.mxu1 %v5431_v5 }
 0x264   :  { %3977 = vmatprep.subr.bf16.mxu0 %v5433_v27  ;;  %4009 = vmatprep.subr.bf16.mxu1 %v5436_v63 }
 0x267   :  { %3979 = vmatpush1.bf16.msra.mxu0 %v5439_v2  ;;  %4011 = vmatpush1.bf16.msra.mxu1 %v5443_v1 }
 0x268   :  { %3981 = vmatprep.subr.bf16.mxu0 %v5445_v3  ;;  %4013 = vmatprep.subr.bf16.mxu1 %v5448_v37 }
 0x26b   :  { %v4724_v58 = vpop.eup %4723  ;;  %3983 = vmatpush1.bf16.msra.mxu0 %v5451_v6  ;;  %4015 = vmatpush1.bf16.msra.mxu1 %v5455_v50 }
 0x26c   :  { %v1114_v59 = vmul.f32 %v4724_v58, %v4722_v36  ;;  %4017 = vmatprep.subr.bf16.mxu0 %v5083_v20  ;;  %4049 = vmatprep.subr.bf16.mxu1 %v5094_v24  ;;  %v6269_v36 = vld [vmem:[#allocation42_spill] sm:$0xff]  ;;  %v6270_v58 = vld [vmem:[#allocation43_spill] sm:$0xff] }
 0x26e   :  { %3584 = vst [vmem:[%s6095_s5 + $0xc] sm:$0x3] %v1114_v59  ;;  %1384 = vmatmul.mubr.f32.vlgmr.msra.gmra.mrb[10].mxu0 %v1114_v59  ;;  %1455 = vmatmul.mubr.f32.vlgmr.msra.gmra.mrb[10].mxu1 %v1114_v59  ;;  %v6271_v59 = vld [vmem:[#allocation44_spill] sm:$0xff] }
 0x26f   :  { %4019 = vmatpush1.bf16.msra.mxu0 %v5096_v25  ;;  %4051 = vmatpush1.bf16.msra.mxu1 %v5108_v29 }
 0x270   :  { %4021 = vmatprep.subr.bf16.mxu0 %v5121_v33  ;;  %4053 = vmatprep.subr.bf16.mxu1 %v5123_v34 }
 0x271   :  { %1583 = vmatprep.mubr.f32.mxu0 %v6214_v49  ;;  %1654 = vmatprep.mubr.f32.mxu1 %v6214_v49 }
 0x273   :  { %4023 = vmatpush1.bf16.msra.mxu0 %v5135_v38  ;;  %4055 = vmatpush1.bf16.msra.mxu1 %v5148_v42 }
 0x274   :  { %4025 = vmatprep.subr.bf16.mxu0 %v5150_v43  ;;  %4057 = vmatprep.subr.bf16.mxu1 %v5161_v47 }
 0x277   :  { %4027 = vmatpush1.bf16.msra.mxu0 %v5173_v51  ;;  %4059 = vmatpush1.bf16.msra.mxu1 %v6253_v30 }
 0x278   :  { %4029 = vmatprep.subr.bf16.mxu0 %v6254_v0  ;;  %4061 = vmatprep.subr.bf16.mxu1 %v6255_v54 }
 0x27b   :  { %4031 = vmatpush1.bf16.msra.mxu0 %v6256_v11  ;;  %4063 = vmatpush1.bf16.msra.mxu1 %v6257_v48 }
 0x27c   :  { %4033 = vmatprep.subr.bf16.mxu0 %v6258_v45  ;;  %4065 = vmatprep.subr.bf16.mxu1 %v6259_v22 }
 0x27f   :  { %4035 = vmatpush1.bf16.msra.mxu0 %v6260_v12  ;;  %4067 = vmatpush1.bf16.msra.mxu1 %v6261_v23  ;;  %v6272_v23 = vld [vmem:[#allocation45_spill] sm:$0xff] }
 0x280   :  { %4037 = vmatprep.subr.bf16.mxu0 %v6262_v21  ;;  %4069 = vmatprep.subr.bf16.mxu1 %v6263_v57  ;;  %v6273_v21 = vld [vmem:[#allocation46_spill] sm:$0xff]  ;;  %v6274_v57 = vld [vmem:[#allocation47_spill] sm:$0xff] }
 0x283   :  { %4039 = vmatpush1.bf16.msra.mxu0 %v6264_v55  ;;  %4071 = vmatpush1.bf16.msra.mxu1 %v6265_v56  ;;  %v6275_v55 = vld [vmem:[#allocation48_spill] sm:$0xff] }
 0x284   :  { %4041 = vmatprep.subr.bf16.mxu0 %v6266_v60  ;;  %4073 = vmatprep.subr.bf16.mxu1 %v6267_v35 }
 0x287   :  { %4043 = vmatpush1.bf16.msra.mxu0 %v6268_v41  ;;  %4075 = vmatpush1.bf16.msra.mxu1 %v6269_v36 }
 0x288   :  { %4045 = vmatprep.subr.bf16.mxu0 %v6270_v58  ;;  %4077 = vmatprep.subr.bf16.mxu1 %v6271_v59  ;;  %v6276_v59 = vld [vmem:[#allocation12_spill] sm:$0xff] }
 0x28b   :  { %4047 = vmatpush1.bf16.msra.mxu0 %v6272_v23  ;;  %4079 = vmatpush1.bf16.msra.mxu1 %v6273_v21 }
 0x28c   :  { %4081 = vmatprep.subr.bf16.mxu0 %v6274_v57  ;;  %4113 = vmatprep.subr.bf16.mxu1 %v6275_v55 }
 0x321   :  { %v1185_v56 = vpop.f32.mrb[8].mxu0  ;;  %v1256_v60 = vpop.f32.mrb[8].mxu1 }
 0x322   :  { %v1187_v12 = vpop.f32.mrb[9].mxu0  ;;  %v1258_v35 = vpop.f32.mrb[9].mxu1 }
 0x323   :  { %v1265_v22 = vcombine.low %v1185_v56, %v1187_v12  ;;  %v1266_v41 = vcombine.low %v1256_v60, %v1258_v35 }
 0x325   :  { %v1273_v36 = vrot.slane %v1265_v22, %v6249_v39  ;;  %v1280_v58 = vrot.slane %v1266_v41, %v6249_v39 }
 0x327   :  { %v1281_v45 = vcombine.low %v1273_v36, %v1280_v58 }
 0x329   :  { %v1283_v48 = vadd.f32 %v1281_v45, %v6276_v59 }
 0x32b   :  { %v3585_v23 = vmul.f32 -1.442695, %v1283_v48  ;;  %v1291_v11 = vrot.slane %v1283_v48, 2  ;;  %v1302_v57 = vrot.slane %v1283_v48, 6  ;;  %v1299_v0 = vrot.slane %v1283_v48, 4 }
 0x32d   :  { %4725 = vpow2.f32 %v3585_v23  ;;  %v3586_v21 = vmul.f32 -1.442695, %v1291_v11  ;;  %v3587_v55 = vmul.f32 -1.442695, %v1302_v57 }
 0x32f   :  { %4727 = vpow2.f32 %v3586_v21 }
 0x330   :  { %4729 = vpow2.f32 %v3587_v55 }
 0x337   :  { %v4726_v54 = vpop.eup %4725 }
 0x338   :  { %v1287_v30 = vadd.f32 1.0, %v4726_v54 }
 0x339   :  { %v4728_v51 = vpop.eup %4727 }
 0x33a   :  { %4731 = vrcp.f32 %v1287_v30  ;;  %v1296_v12 = vadd.f32 1.0, %v4728_v51  ;;  %v4730_v35 = vpop.eup %4729 }
 0x33b   :  { %4733 = vtanh.f32 %v1299_v0  ;;  %v1307_v36 = vadd.f32 1.0, %v4730_v35  ;;  %v6277_v0 = vld [vmem:[#allocation23_spill] sm:$0xff] }
 0x33c   :  { %4735 = vrcp.f32 %v1296_v12 }
 0x33d   :  { %4737 = vrcp.f32 %v1307_v36 }
 0x341   :  { %v1385_v22 = vpop.f32.mrb[10].mxu0  ;;  %v1456_v56 = vpop.f32.mrb[10].mxu1 }
 0x342   :  { %v1387_v60 = vpop.f32.mrb[11].mxu0  ;;  %v1458_v45 = vpop.f32.mrb[11].mxu1 }
 0x343   :  { %v1465_v41 = vcombine.low %v1385_v22, %v1387_v60  ;;  %v1466_v23 = vcombine.low %v1456_v56, %v1458_v45 }
 0x344   :  { %v4732_v11 = vpop.eup %4731 }
 0x345   :  { %v4734_v21 = vpop.eup %4733  ;;  %v1473_v57 = vrot.slane %v1465_v41, %v6249_v39  ;;  %v1480_v48 = vrot.slane %v1466_v23, %v6249_v39 }
 0x346   :  { %v4736_v54 = vpop.eup %4735  ;;  %v1311_v30 = vmul.f32 %v4734_v21, %v4732_v11 }
 0x347   :  { %v1481_v55 = vcombine.low %v1473_v57, %v1480_v48  ;;  %v1310_v51 = vmul.f32 %v4736_v54, %v5591_v61  ;;  %v4738_v45 = vpop.eup %4737 }
 0x349   :  { %v1483_v58 = vadd.f32 %v6277_v0, %v1481_v55  ;;  %v5679_v59 = vadd.f32 %v1311_v30, %v1310_v51 }
 0x34b   :  { %v3589_v12 = vmul.f32 -1.442695, %v1483_v58  ;;  %v1491_v22 = vrot.slane %v1483_v58, 2  ;;  %4739 = vtanh.f32 %v5679_v59  ;;  %v1502_v60 = vrot.slane %v1483_v58, 6 }
 0x34c   :  { %v1499_v57 = vrot.slane %v1483_v58, 4 }
 0x34d   :  { %4741 = vpow2.f32 %v3589_v12  ;;  %v3590_v56 = vmul.f32 -1.442695, %v1491_v22  ;;  %v3591_v41 = vmul.f32 -1.442695, %v1502_v60  ;;  %v6278_v60 = vld [vmem:[#allocation25_spill] sm:$0xff] }
 0x34f   :  { %4743 = vpow2.f32 %v3590_v56 }
 0x350   :  { %4745 = vpow2.f32 %v3591_v41  ;;  %v6280_v41 = vld [vmem:[#allocation27_spill] sm:$0xff] }
 0x355   :  { %v4740_v35 = vpop.eup %4739 }
 0x356   :  { %v1314_v61 = vmul.f32 %v4740_v35, %v4738_v45  ;;  %v6279_v45 = vld [vmem:[#allocation26_spill] sm:$0xff]  ;;  %v6281_v35 = vld [vmem:[#allocation28_spill] sm:$0xff] }
 0x357   :  { %v4742_v23 = vpop.eup %4741 }
 0x358   :  { %v1487_v11 = vadd.f32 1.0, %v4742_v23  ;;  %3588 = vst [vmem:[%s6094_s4 + $0x4] sm:$0x3] %v1314_v61  ;;  %1584 = vmatmul.mubr.f32.vlgmr.msra.gmra.mrb[12].mxu0 %v1314_v61  ;;  %1655 = vmatmul.mubr.f32.vlgmr.msra.gmra.mrb[12].mxu1 %v1314_v61  ;;  %v6282_v23 = vld [vmem:[#allocation29_spill] sm:$0xff]  ;;  %v6284_v61 = vld [vmem:[#allocation31_spill] sm:$0xff] }
 0x359   :  { %v4744_v21 = vpop.eup %4743  ;;  %4083 = vmatpush1.bf16.msra.mxu0 %v5365_v7  ;;  %4115 = vmatpush1.bf16.msra.mxu1 %v5369_v44 }
 0x35a   :  { %4747 = vrcp.f32 %v1487_v11  ;;  %v1496_v48 = vadd.f32 1.0, %v4744_v21  ;;  %4085 = vmatprep.subr.bf16.mxu0 %v5371_v46  ;;  %4117 = vmatprep.subr.bf16.mxu1 %v5374_v53  ;;  %v4746_v54 = vpop.eup %4745  ;;  %v6285_v11 = vld [vmem:[#allocation32_spill] sm:$0xff]  ;;  %v6286_v21 = vld [vmem:[#allocation33_spill] sm:$0xff] }
 0x35b   :  { %4749 = vtanh.f32 %v1499_v57  ;;  %1783 = vmatprep.mubr.f32.mxu0 %v6214_v49  ;;  %1854 = vmatprep.mubr.f32.mxu1 %v6214_v49  ;;  %v1507_v30 = vadd.f32 1.0, %v4746_v54  ;;  %v6283_v57 = vld [vmem:[#allocation30_spill] sm:$0xff]  ;;  %v6288_v54 = vld [vmem:[#allocation35_spill] sm:$0xff] }
 0x35c   :  { %4751 = vrcp.f32 %v1496_v48  ;;  %v6287_v48 = vld [vmem:[#allocation34_spill] sm:$0xff] }
 0x35d   :  { %4087 = vmatpush1.bf16.msra.mxu0 %v5377_v19  ;;  %4119 = vmatpush1.bf16.msra.mxu1 %v5381_v16  ;;  %4753 = vrcp.f32 %v1507_v30  ;;  %v6292_v30 = vld [vmem:[#allocation39_spill] sm:$0xff] }
 0x35e   :  { %4089 = vmatprep.subr.bf16.mxu0 %v6227_v10  ;;  %4121 = vmatprep.subr.bf16.mxu1 %v6228_v26 }
 0x361   :  { %4091 = vmatpush1.bf16.msra.mxu0 %v6229_v8  ;;  %4123 = vmatpush1.bf16.msra.mxu1 %v6230_v52 }
 0x362   :  { %4093 = vmatprep.subr.bf16.mxu0 %v6231_v14  ;;  %4125 = vmatprep.subr.bf16.mxu1 %v6252_v18 }
 0x364   :  { %v4748_v36 = vpop.eup %4747 }
 0x365   :  { %v4750_v55 = vpop.eup %4749  ;;  %4095 = vmatpush1.bf16.msra.mxu0 %v6233_v62  ;;  %4127 = vmatpush1.bf16.msra.mxu1 %v6234_v32 }
 0x366   :  { %v4752_v51 = vpop.eup %4751  ;;  %4097 = vmatprep.subr.bf16.mxu0 %v6235_v28  ;;  %4129 = vmatprep.subr.bf16.mxu1 %v6236_v9  ;;  %v1511_v58 = vmul.f32 %v4750_v55, %v4748_v36  ;;  %v6289_v36 = vld [vmem:[#allocation36_spill] sm:$0xff]  ;;  %v6290_v55 = vld [vmem:[#allocation37_spill] sm:$0xff] }
 0x367   :  { %v1510_v0 = vmul.f32 %v4752_v51, %v5616_v40  ;;  %v4754_v40 = vpop.eup %4753  ;;  %v6291_v51 = vld [vmem:[#allocation38_spill] sm:$0xff] }
 0x369   :  { %v5704_v12 = vadd.f32 %v1511_v58, %v1510_v0  ;;  %4099 = vmatpush1.bf16.msra.mxu0 %v6237_v15  ;;  %4131 = vmatpush1.bf16.msra.mxu1 %v6238_v31  ;;  %v6293_v0 = vld [vmem:[#allocation40_spill] sm:$0xff]  ;;  %v6294_v58 = vld [vmem:[#allocation41_spill] sm:$0xff] }
 0x36a   :  { %4101 = vmatprep.subr.bf16.mxu0 %v5421_v13  ;;  %4133 = vmatprep.subr.bf16.mxu1 %v6239_v17 }
 0x36b   :  { %4755 = vtanh.f32 %v5704_v12 }
 0x36d   :  { %4103 = vmatpush1.bf16.msra.mxu0 %v5427_v4  ;;  %4135 = vmatpush1.bf16.msra.mxu1 %v5431_v5 }
 0x36e   :  { %4105 = vmatprep.subr.bf16.mxu0 %v5433_v27  ;;  %4137 = vmatprep.subr.bf16.mxu1 %v5436_v63 }
 0x371   :  { %4107 = vmatpush1.bf16.msra.mxu0 %v5439_v2  ;;  %4139 = vmatpush1.bf16.msra.mxu1 %v5443_v1 }
 0x372   :  { %4109 = vmatprep.subr.bf16.mxu0 %v5445_v3  ;;  %4141 = vmatprep.subr.bf16.mxu1 %v5448_v37 }
 0x375   :  { %v4756_v22 = vpop.eup %4755  ;;  %4111 = vmatpush1.bf16.msra.mxu0 %v5451_v6  ;;  %4143 = vmatpush1.bf16.msra.mxu1 %v5455_v50 }
 0x376   :  { %v1514_v56 = vmul.f32 %v4756_v22, %v4754_v40  ;;  %4145 = vmatprep.subr.bf16.mxu0 %v5083_v20  ;;  %4177 = vmatprep.subr.bf16.mxu1 %v5094_v24  ;;  %v6295_v40 = vld [vmem:[#allocation42_spill] sm:$0xff]  ;;  %v6296_v22 = vld [vmem:[#allocation43_spill] sm:$0xff] }
 0x378   :  { %3592 = vst [vmem:[%s6095_s5 + $0xa] sm:$0x3] %v1514_v56  ;;  %1784 = vmatmul.mubr.f32.vlgmr.msra.gmra.mrb[14].mxu0 %v1514_v56  ;;  %1855 = vmatmul.mubr.f32.vlgmr.msra.gmra.mrb[14].mxu1 %v1514_v56  ;;  %v6297_v56 = vld [vmem:[#allocation44_spill] sm:$0xff] }
 0x379   :  { %4147 = vmatpush1.bf16.msra.mxu0 %v5096_v25  ;;  %4179 = vmatpush1.bf16.msra.mxu1 %v5108_v29 }
 0x37a   :  { %4149 = vmatprep.subr.bf16.mxu0 %v5121_v33  ;;  %4181 = vmatprep.subr.bf16.mxu1 %v5123_v34 }
 0x37b   :  { %1983 = vmatprep.mubr.f32.mxu0 %v6214_v49  ;;  %2054 = vmatprep.mubr.f32.mxu1 %v6214_v49 }
 0x37d   :  { %4151 = vmatpush1.bf16.msra.mxu0 %v5135_v38  ;;  %4183 = vmatpush1.bf16.msra.mxu1 %v5148_v42 }
 0x37e   :  { %4153 = vmatprep.subr.bf16.mxu0 %v5150_v43  ;;  %4185 = vmatprep.subr.bf16.mxu1 %v5161_v47 }
 0x381   :  { %4155 = vmatpush1.bf16.msra.mxu0 %v6278_v60  ;;  %4187 = vmatpush1.bf16.msra.mxu1 %v6279_v45 }
 0x382   :  { %4157 = vmatprep.subr.bf16.mxu0 %v6280_v41  ;;  %4189 = vmatprep.subr.bf16.mxu1 %v6281_v35 }
 0x385   :  { %4159 = vmatpush1.bf16.msra.mxu0 %v6282_v23  ;;  %4191 = vmatpush1.bf16.msra.mxu1 %v6283_v57 }
 0x386   :  { %4161 = vmatprep.subr.bf16.mxu0 %v6284_v61  ;;  %4193 = vmatprep.subr.bf16.mxu1 %v6285_v11 }
 0x389   :  { %4163 = vmatpush1.bf16.msra.mxu0 %v6286_v21  ;;  %4195 = vmatpush1.bf16.msra.mxu1 %v6287_v48  ;;  %v6298_v48 = vld [vmem:[#allocation45_spill] sm:$0xff] }
 0x38a   :  { %4165 = vmatprep.subr.bf16.mxu0 %v6288_v54  ;;  %4197 = vmatprep.subr.bf16.mxu1 %v6289_v36  ;;  %v6299_v54 = vld [vmem:[#allocation46_spill] sm:$0xff]  ;;  %v6300_v36 = vld [vmem:[#allocation47_spill] sm:$0xff] }
 0x38d   :  { %4167 = vmatpush1.bf16.msra.mxu0 %v6290_v55  ;;  %4199 = vmatpush1.bf16.msra.mxu1 %v6291_v51  ;;  %v6301_v55 = vld [vmem:[#allocation48_spill] sm:$0xff] }
 0x38e   :  { %4169 = vmatprep.subr.bf16.mxu0 %v6292_v30  ;;  %4201 = vmatprep.subr.bf16.mxu1 %v6293_v0 }
 0x391   :  { %4171 = vmatpush1.bf16.msra.mxu0 %v6294_v58  ;;  %4203 = vmatpush1.bf16.msra.mxu1 %v6295_v40 }
 0x392   :  { %4173 = vmatprep.subr.bf16.mxu0 %v6296_v22  ;;  %4205 = vmatprep.subr.bf16.mxu1 %v6297_v56  ;;  %v6302_v56 = vld [vmem:[#allocation13_spill] sm:$0xff] }
 0x395   :  { %4175 = vmatpush1.bf16.msra.mxu0 %v6298_v48  ;;  %4207 = vmatpush1.bf16.msra.mxu1 %v6299_v54 }
 0x396   :  { %4209 = vmatprep.subr.bf16.mxu0 %v6300_v36  ;;  %4241 = vmatprep.subr.bf16.mxu1 %v6301_v55 }
 0x42b   :  { %v1585_v51 = vpop.f32.mrb[12].mxu0  ;;  %v1656_v30 = vpop.f32.mrb[12].mxu1 }
 0x42c   :  { %v1587_v21 = vpop.f32.mrb[13].mxu0  ;;  %v1658_v0 = vpop.f32.mrb[13].mxu1 }
 0x42d   :  { %v1665_v11 = vcombine.low %v1585_v51, %v1587_v21  ;;  %v1666_v58 = vcombine.low %v1656_v30, %v1658_v0 }
 0x42f   :  { %v1673_v40 = vrot.slane %v1665_v11, %v6249_v39  ;;  %v1680_v22 = vrot.slane %v1666_v58, %v6249_v39 }
 0x431   :  { %v1681_v61 = vcombine.low %v1673_v40, %v1680_v22 }
 0x433   :  { %v1683_v57 = vadd.f32 %v1681_v61, %v6302_v56 }
 0x435   :  { %v3593_v48 = vmul.f32 -1.442695, %v1683_v57  ;;  %v1691_v23 = vrot.slane %v1683_v57, 2  ;;  %v1702_v36 = vrot.slane %v1683_v57, 6  ;;  %v1699_v41 = vrot.slane %v1683_v57, 4 }
 0x437   :  { %4757 = vpow2.f32 %v3593_v48  ;;  %v3594_v54 = vmul.f32 -1.442695, %v1691_v23  ;;  %v3595_v55 = vmul.f32 -1.442695, %v1702_v36 }
 0x439   :  { %4759 = vpow2.f32 %v3594_v54 }
 0x43a   :  { %4761 = vpow2.f32 %v3595_v55 }
 0x441   :  { %v4758_v35 = vpop.eup %4757 }
 0x442   :  { %v1687_v45 = vadd.f32 1.0, %v4758_v35 }
 0x443   :  { %v4760_v60 = vpop.eup %4759 }
 0x444   :  { %4763 = vrcp.f32 %v1687_v45  ;;  %v1696_v21 = vadd.f32 1.0, %v4760_v60  ;;  %v4762_v0 = vpop.eup %4761 }
 0x445   :  { %4765 = vtanh.f32 %v1699_v41  ;;  %v1707_v40 = vadd.f32 1.0, %v4762_v0  ;;  %v6303_v41 = vld [vmem:[#allocation22_spill] sm:$0xff] }
 0x446   :  { %4767 = vrcp.f32 %v1696_v21 }
 0x447   :  { %4769 = vrcp.f32 %v1707_v40 }
 0x44b   :  { %v1785_v11 = vpop.f32.mrb[14].mxu0  ;;  %v1856_v51 = vpop.f32.mrb[14].mxu1 }
 0x44c   :  { %v1787_v30 = vpop.f32.mrb[15].mxu0  ;;  %v1858_v61 = vpop.f32.mrb[15].mxu1 }
 0x44d   :  { %v1865_v58 = vcombine.low %v1785_v11, %v1787_v30  ;;  %v1866_v48 = vcombine.low %v1856_v51, %v1858_v61 }
 0x44e   :  { %v4764_v23 = vpop.eup %4763 }
 0x44f   :  { %v4766_v54 = vpop.eup %4765  ;;  %v1873_v36 = vrot.slane %v1865_v58, %v6249_v39  ;;  %v1880_v57 = vrot.slane %v1866_v48, %v6249_v39 }
 0x450   :  { %v4768_v35 = vpop.eup %4767  ;;  %v1711_v45 = vmul.f32 %v4766_v54, %v4764_v23 }
 0x451   :  { %v1881_v55 = vcombine.low %v1873_v36, %v1880_v57  ;;  %v1710_v60 = vmul.f32 %v4768_v35, %v5679_v59  ;;  %v4770_v61 = vpop.eup %4769 }
 0x453   :  { %v1883_v22 = vadd.f32 %v6303_v41, %v1881_v55  ;;  %v5767_v56 = vadd.f32 %v1711_v45, %v1710_v60 }
 0x455   :  { %v3597_v21 = vmul.f32 -1.442695, %v1883_v22  ;;  %v1891_v11 = vrot.slane %v1883_v22, 2  ;;  %4771 = vtanh.f32 %v5767_v56  ;;  %v1902_v30 = vrot.slane %v1883_v22, 6 }
 0x456   :  { %v1899_v36 = vrot.slane %v1883_v22, 4 }
 0x457   :  { %4773 = vpow2.f32 %v3597_v21  ;;  %v3598_v51 = vmul.f32 -1.442695, %v1891_v11  ;;  %v3599_v58 = vmul.f32 -1.442695, %v1902_v30  ;;  %v6304_v30 = vld [vmem:[#allocation25_spill] sm:$0xff] }
 0x459   :  { %4775 = vpow2.f32 %v3598_v51 }
 0x45a   :  { %4777 = vpow2.f32 %v3599_v58  ;;  %v6306_v58 = vld [vmem:[#allocation27_spill] sm:$0xff] }
 0x45f   :  { %v4772_v0 = vpop.eup %4771 }
 0x460   :  { %v1714_v59 = vmul.f32 %v4772_v0, %v4770_v61  ;;  %v6305_v61 = vld [vmem:[#allocation26_spill] sm:$0xff]  ;;  %v6307_v0 = vld [vmem:[#allocation28_spill] sm:$0xff] }
 0x461   :  { %v4774_v48 = vpop.eup %4773 }
 0x462   :  { %v1887_v23 = vadd.f32 1.0, %v4774_v48  ;;  %3596 = vst [vmem:[%s6094_s4 + $0x6] sm:$0x3] %v1714_v59  ;;  %1984 = vmatmul.mubr.f32.vlgmr.msra.gmra.mrb[16].mxu0 %v1714_v59  ;;  %2055 = vmatmul.mubr.f32.vlgmr.msra.gmra.mrb[16].mxu1 %v1714_v59  ;;  %v6308_v48 = vld [vmem:[#allocation29_spill] sm:$0xff]  ;;  %v6310_v59 = vld [vmem:[#allocation31_spill] sm:$0xff] }
 0x463   :  { %v4776_v54 = vpop.eup %4775  ;;  %4211 = vmatpush1.bf16.msra.mxu0 %v5365_v7  ;;  %4243 = vmatpush1.bf16.msra.mxu1 %v5369_v44 }
 0x464   :  { %4779 = vrcp.f32 %v1887_v23  ;;  %v1896_v57 = vadd.f32 1.0, %v4776_v54  ;;  %4213 = vmatprep.subr.bf16.mxu0 %v5371_v46  ;;  %4245 = vmatprep.subr.bf16.mxu1 %v5374_v53  ;;  %v4778_v35 = vpop.eup %4777  ;;  %v6311_v23 = vld [vmem:[#allocation32_spill] sm:$0xff]  ;;  %v6312_v54 = vld [vmem:[#allocation33_spill] sm:$0xff] }
 0x465   :  { %4781 = vtanh.f32 %v1899_v36  ;;  %2183 = vmatprep.mubr.f32.mxu0 %v6214_v49  ;;  %2254 = vmatprep.mubr.f32.mxu1 %v6214_v49  ;;  %v1907_v45 = vadd.f32 1.0, %v4778_v35  ;;  %v6309_v36 = vld [vmem:[#allocation30_spill] sm:$0xff]  ;;  %v6314_v35 = vld [vmem:[#allocation35_spill] sm:$0xff] }
 0x466   :  { %4783 = vrcp.f32 %v1896_v57  ;;  %v6313_v57 = vld [vmem:[#allocation34_spill] sm:$0xff] }
 0x467   :  { %4215 = vmatpush1.bf16.msra.mxu0 %v5377_v19  ;;  %4247 = vmatpush1.bf16.msra.mxu1 %v5381_v16  ;;  %4785 = vrcp.f32 %v1907_v45  ;;  %v6318_v45 = vld [vmem:[#allocation39_spill] sm:$0xff] }
 0x468   :  { %4217 = vmatprep.subr.bf16.mxu0 %v6227_v10  ;;  %4249 = vmatprep.subr.bf16.mxu1 %v6228_v26 }
 0x46b   :  { %4219 = vmatpush1.bf16.msra.mxu0 %v6229_v8  ;;  %4251 = vmatpush1.bf16.msra.mxu1 %v6230_v52 }
 0x46c   :  { %4221 = vmatprep.subr.bf16.mxu0 %v6231_v14  ;;  %4253 = vmatprep.subr.bf16.mxu1 %v6252_v18 }
 0x46e   :  { %v4780_v40 = vpop.eup %4779 }
 0x46f   :  { %v4782_v55 = vpop.eup %4781  ;;  %4223 = vmatpush1.bf16.msra.mxu0 %v6233_v62  ;;  %4255 = vmatpush1.bf16.msra.mxu1 %v6234_v32 }
 0x470   :  { %v4784_v60 = vpop.eup %4783  ;;  %4225 = vmatprep.subr.bf16.mxu0 %v6235_v28  ;;  %4257 = vmatprep.subr.bf16.mxu1 %v6236_v9  ;;  %v1911_v22 = vmul.f32 %v4782_v55, %v4780_v40  ;;  %v6315_v40 = vld [vmem:[#allocation36_spill] sm:$0xff]  ;;  %v6316_v55 = vld [vmem:[#allocation37_spill] sm:$0xff] }
 0x471   :  { %v1910_v41 = vmul.f32 %v4784_v60, %v5704_v12  ;;  %v4786_v12 = vpop.eup %4785  ;;  %v6317_v60 = vld [vmem:[#allocation38_spill] sm:$0xff] }
 0x473   :  { %v5792_v21 = vadd.f32 %v1911_v22, %v1910_v41  ;;  %4227 = vmatpush1.bf16.msra.mxu0 %v6237_v15  ;;  %4259 = vmatpush1.bf16.msra.mxu1 %v6238_v31  ;;  %v6319_v41 = vld [vmem:[#allocation40_spill] sm:$0xff]  ;;  %v6320_v22 = vld [vmem:[#allocation41_spill] sm:$0xff] }
 0x474   :  { %4229 = vmatprep.subr.bf16.mxu0 %v5421_v13  ;;  %4261 = vmatprep.subr.bf16.mxu1 %v6239_v17 }
 0x475   :  { %4787 = vtanh.f32 %v5792_v21 }
 0x477   :  { %4231 = vmatpush1.bf16.msra.mxu0 %v5427_v4  ;;  %4263 = vmatpush1.bf16.msra.mxu1 %v5431_v5 }
 0x478   :  { %4233 = vmatprep.subr.bf16.mxu0 %v5433_v27  ;;  %4265 = vmatprep.subr.bf16.mxu1 %v5436_v63 }
 0x47b   :  { %4235 = vmatpush1.bf16.msra.mxu0 %v5439_v2  ;;  %4267 = vmatpush1.bf16.msra.mxu1 %v5443_v1 }
 0x47c   :  { %4237 = vmatprep.subr.bf16.mxu0 %v5445_v3  ;;  %4269 = vmatprep.subr.bf16.mxu1 %v5448_v37 }
 0x47f   :  { %v4788_v11 = vpop.eup %4787  ;;  %4239 = vmatpush1.bf16.msra.mxu0 %v5451_v6  ;;  %4271 = vmatpush1.bf16.msra.mxu1 %v5455_v50 }
 0x480   :  { %v1914_v51 = vmul.f32 %v4788_v11, %v4786_v12  ;;  %4273 = vmatprep.subr.bf16.mxu0 %v5083_v20  ;;  %4305 = vmatprep.subr.bf16.mxu1 %v5094_v24  ;;  %v6321_v12 = vld [vmem:[#allocation42_spill] sm:$0xff]  ;;  %v6322_v11 = vld [vmem:[#allocation43_spill] sm:$0xff] }
 0x482   :  { %3600 = vst [vmem:[%s6095_s5 + $0x8] sm:$0x3] %v1914_v51  ;;  %2184 = vmatmul.mubr.f32.vlgmr.msra.gmra.mrb[18].mxu0 %v1914_v51  ;;  %2255 = vmatmul.mubr.f32.vlgmr.msra.gmra.mrb[18].mxu1 %v1914_v51  ;;  %v6323_v51 = vld [vmem:[#allocation44_spill] sm:$0xff] }
 0x483   :  { %4275 = vmatpush1.bf16.msra.mxu0 %v5096_v25  ;;  %4307 = vmatpush1.bf16.msra.mxu1 %v5108_v29 }
 0x484   :  { %4277 = vmatprep.subr.bf16.mxu0 %v5121_v33  ;;  %4309 = vmatprep.subr.bf16.mxu1 %v5123_v34 }
 0x485   :  { %2383 = vmatprep.mubr.f32.mxu0 %v6214_v49  ;;  %2454 = vmatprep.mubr.f32.mxu1 %v6214_v49 }
 0x487   :  { %4279 = vmatpush1.bf16.msra.mxu0 %v5135_v38  ;;  %4311 = vmatpush1.bf16.msra.mxu1 %v5148_v42 }
 0x488   :  { %4281 = vmatprep.subr.bf16.mxu0 %v5150_v43  ;;  %4313 = vmatprep.subr.bf16.mxu1 %v5161_v47 }
 0x48b   :  { %4283 = vmatpush1.bf16.msra.mxu0 %v6304_v30  ;;  %4315 = vmatpush1.bf16.msra.mxu1 %v6305_v61 }
 0x48c   :  { %4285 = vmatprep.subr.bf16.mxu0 %v6306_v58  ;;  %4317 = vmatprep.subr.bf16.mxu1 %v6307_v0 }
 0x48f   :  { %4287 = vmatpush1.bf16.msra.mxu0 %v6308_v48  ;;  %4319 = vmatpush1.bf16.msra.mxu1 %v6309_v36 }
 0x490   :  { %4289 = vmatprep.subr.bf16.mxu0 %v6310_v59  ;;  %4321 = vmatprep.subr.bf16.mxu1 %v6311_v23 }
 0x493   :  { %4291 = vmatpush1.bf16.msra.mxu0 %v6312_v54  ;;  %4323 = vmatpush1.bf16.msra.mxu1 %v6313_v57  ;;  %v6324_v57 = vld [vmem:[#allocation45_spill] sm:$0xff] }
 0x494   :  { %4293 = vmatprep.subr.bf16.mxu0 %v6314_v35  ;;  %4325 = vmatprep.subr.bf16.mxu1 %v6315_v40  ;;  %v6325_v35 = vld [vmem:[#allocation46_spill] sm:$0xff]  ;;  %v6326_v40 = vld [vmem:[#allocation47_spill] sm:$0xff] }
 0x497   :  { %4295 = vmatpush1.bf16.msra.mxu0 %v6316_v55  ;;  %4327 = vmatpush1.bf16.msra.mxu1 %v6317_v60  ;;  %v6327_v55 = vld [vmem:[#allocation48_spill] sm:$0xff] }
 0x498   :  { %4297 = vmatprep.subr.bf16.mxu0 %v6318_v45  ;;  %4329 = vmatprep.subr.bf16.mxu1 %v6319_v41 }
 0x49b   :  { %4299 = vmatpush1.bf16.msra.mxu0 %v6320_v22  ;;  %4331 = vmatpush1.bf16.msra.mxu1 %v6321_v12 }
 0x49c   :  { %4301 = vmatprep.subr.bf16.mxu0 %v6322_v11  ;;  %4333 = vmatprep.subr.bf16.mxu1 %v6323_v51  ;;  %v6328_v51 = vld [vmem:[#allocation14_spill] sm:$0xff] }
 0x49f   :  { %4303 = vmatpush1.bf16.msra.mxu0 %v6324_v57  ;;  %4335 = vmatpush1.bf16.msra.mxu1 %v6325_v35 }
 0x4a0   :  { %4337 = vmatprep.subr.bf16.mxu0 %v6326_v40  ;;  %4369 = vmatprep.subr.bf16.mxu1 %v6327_v55 }
 0x535   :  { %v1985_v60 = vpop.f32.mrb[16].mxu0  ;;  %v2056_v45 = vpop.f32.mrb[16].mxu1 }
 0x536   :  { %v1987_v54 = vpop.f32.mrb[17].mxu0  ;;  %v2058_v41 = vpop.f32.mrb[17].mxu1 }
 0x537   :  { %v2065_v23 = vcombine.low %v1985_v60, %v1987_v54  ;;  %v2066_v22 = vcombine.low %v2056_v45, %v2058_v41 }
 0x539   :  { %v2073_v12 = vrot.slane %v2065_v23, %v6249_v39  ;;  %v2080_v11 = vrot.slane %v2066_v22, %v6249_v39 }
 0x53b   :  { %v2081_v59 = vcombine.low %v2073_v12, %v2080_v11 }
 0x53d   :  { %v2083_v36 = vadd.f32 %v2081_v59, %v6328_v51 }
 0x53f   :  { %v3601_v57 = vmul.f32 -1.442695, %v2083_v36  ;;  %v2091_v48 = vrot.slane %v2083_v36, 2  ;;  %v2102_v40 = vrot.slane %v2083_v36, 6  ;;  %v2099_v58 = vrot.slane %v2083_v36, 4 }
 0x541   :  { %4789 = vpow2.f32 %v3601_v57  ;;  %v3602_v35 = vmul.f32 -1.442695, %v2091_v48  ;;  %v3603_v55 = vmul.f32 -1.442695, %v2102_v40 }
 0x543   :  { %4791 = vpow2.f32 %v3602_v35 }
 0x544   :  { %4793 = vpow2.f32 %v3603_v55 }
 0x54b   :  { %v4790_v0 = vpop.eup %4789 }
 0x54c   :  { %v2087_v61 = vadd.f32 1.0, %v4790_v0 }
 0x54d   :  { %v4792_v30 = vpop.eup %4791 }
 0x54e   :  { %4795 = vrcp.f32 %v2087_v61  ;;  %v2096_v54 = vadd.f32 1.0, %v4792_v30  ;;  %v4794_v41 = vpop.eup %4793 }
 0x54f   :  { %4797 = vtanh.f32 %v2099_v58  ;;  %v2107_v12 = vadd.f32 1.0, %v4794_v41  ;;  %v6329_v58 = vld [vmem:[#allocation21_spill] sm:$0xff] }
 0x550   :  { %4799 = vrcp.f32 %v2096_v54 }
 0x551   :  { %4801 = vrcp.f32 %v2107_v12 }
 0x555   :  { %v2185_v23 = vpop.f32.mrb[18].mxu0  ;;  %v2256_v60 = vpop.f32.mrb[18].mxu1 }
 0x556   :  { %v2187_v45 = vpop.f32.mrb[19].mxu0  ;;  %v2258_v59 = vpop.f32.mrb[19].mxu1 }
 0x557   :  { %v2265_v22 = vcombine.low %v2185_v23, %v2187_v45  ;;  %v2266_v57 = vcombine.low %v2256_v60, %v2258_v59 }
 0x558   :  { %v4796_v48 = vpop.eup %4795 }
 0x559   :  { %v4798_v35 = vpop.eup %4797  ;;  %v2273_v40 = vrot.slane %v2265_v22, %v6249_v39  ;;  %v2280_v36 = vrot.slane %v2266_v57, %v6249_v39 }
 0x55a   :  { %v4800_v0 = vpop.eup %4799  ;;  %v2111_v61 = vmul.f32 %v4798_v35, %v4796_v48 }
 0x55b   :  { %v2281_v55 = vcombine.low %v2273_v40, %v2280_v36  ;;  %v2110_v30 = vmul.f32 %v4800_v0, %v5767_v56  ;;  %v4802_v59 = vpop.eup %4801 }
 0x55d   :  { %v2283_v11 = vadd.f32 %v6329_v58, %v2281_v55  ;;  %v5855_v51 = vadd.f32 %v2111_v61, %v2110_v30 }
 0x55f   :  { %v3605_v54 = vmul.f32 -1.442695, %v2283_v11  ;;  %v2291_v23 = vrot.slane %v2283_v11, 2  ;;  %4803 = vtanh.f32 %v5855_v51  ;;  %v2302_v45 = vrot.slane %v2283_v11, 6 }
 0x560   :  { %v2299_v40 = vrot.slane %v2283_v11, 4 }
 0x561   :  { %4805 = vpow2.f32 %v3605_v54  ;;  %v3606_v60 = vmul.f32 -1.442695, %v2291_v23  ;;  %v3607_v22 = vmul.f32 -1.442695, %v2302_v45  ;;  %v6330_v45 = vld [vmem:[#allocation25_spill] sm:$0xff] }
 0x563   :  { %4807 = vpow2.f32 %v3606_v60 }
 0x564   :  { %4809 = vpow2.f32 %v3607_v22  ;;  %v6332_v22 = vld [vmem:[#allocation27_spill] sm:$0xff] }
 0x569   :  { %v4804_v41 = vpop.eup %4803 }
 0x56a   :  { %v2114_v56 = vmul.f32 %v4804_v41, %v4802_v59  ;;  %v6331_v59 = vld [vmem:[#allocation26_spill] sm:$0xff]  ;;  %v6333_v41 = vld [vmem:[#allocation28_spill] sm:$0xff] }
 0x56b   :  { %v4806_v57 = vpop.eup %4805 }
 0x56c   :  { %v2287_v48 = vadd.f32 1.0, %v4806_v57  ;;  %3604 = vst [vmem:[%s6094_s4 + $0x8] sm:$0x3] %v2114_v56  ;;  %2384 = vmatmul.mubr.f32.vlgmr.msra.gmra.mrb[20].mxu0 %v2114_v56  ;;  %2455 = vmatmul.mubr.f32.vlgmr.msra.gmra.mrb[20].mxu1 %v2114_v56  ;;  %v6334_v57 = vld [vmem:[#allocation29_spill] sm:$0xff]  ;;  %v6336_v56 = vld [vmem:[#allocation31_spill] sm:$0xff] }
 0x56d   :  { %v4808_v35 = vpop.eup %4807  ;;  %4339 = vmatpush1.bf16.msra.mxu0 %v5365_v7  ;;  %4371 = vmatpush1.bf16.msra.mxu1 %v5369_v44 }
 0x56e   :  { %4811 = vrcp.f32 %v2287_v48  ;;  %v2296_v36 = vadd.f32 1.0, %v4808_v35  ;;  %4341 = vmatprep.subr.bf16.mxu0 %v5371_v46  ;;  %4373 = vmatprep.subr.bf16.mxu1 %v5374_v53  ;;  %v4810_v0 = vpop.eup %4809  ;;  %v6337_v48 = vld [vmem:[#allocation32_spill] sm:$0xff]  ;;  %v6338_v35 = vld [vmem:[#allocation33_spill] sm:$0xff] }
 0x56f   :  { %4813 = vtanh.f32 %v2299_v40  ;;  %2583 = vmatprep.mubr.f32.mxu0 %v6214_v49  ;;  %2654 = vmatprep.mubr.f32.mxu1 %v6214_v49  ;;  %v2307_v61 = vadd.f32 1.0, %v4810_v0  ;;  %v6335_v40 = vld [vmem:[#allocation30_spill] sm:$0xff]  ;;  %v6340_v0 = vld [vmem:[#allocation35_spill] sm:$0xff] }
 0x570   :  { %4815 = vrcp.f32 %v2296_v36  ;;  %v6339_v36 = vld [vmem:[#allocation34_spill] sm:$0xff] }
 0x571   :  { %4343 = vmatpush1.bf16.msra.mxu0 %v5377_v19  ;;  %4375 = vmatpush1.bf16.msra.mxu1 %v5381_v16  ;;  %4817 = vrcp.f32 %v2307_v61  ;;  %v6344_v61 = vld [vmem:[#allocation39_spill] sm:$0xff] }
 0x572   :  { %4345 = vmatprep.subr.bf16.mxu0 %v6227_v10  ;;  %4377 = vmatprep.subr.bf16.mxu1 %v6228_v26 }
 0x575   :  { %4347 = vmatpush1.bf16.msra.mxu0 %v6229_v8  ;;  %4379 = vmatpush1.bf16.msra.mxu1 %v6230_v52 }
 0x576   :  { %4349 = vmatprep.subr.bf16.mxu0 %v6231_v14  ;;  %4381 = vmatprep.subr.bf16.mxu1 %v6252_v18 }
 0x578   :  { %v4812_v12 = vpop.eup %4811 }
 0x579   :  { %v4814_v55 = vpop.eup %4813  ;;  %4351 = vmatpush1.bf16.msra.mxu0 %v6233_v62  ;;  %4383 = vmatpush1.bf16.msra.mxu1 %v6234_v32 }
 0x57a   :  { %v4816_v30 = vpop.eup %4815  ;;  %4353 = vmatprep.subr.bf16.mxu0 %v6235_v28  ;;  %4385 = vmatprep.subr.bf16.mxu1 %v6236_v9  ;;  %v2311_v11 = vmul.f32 %v4814_v55, %v4812_v12  ;;  %v6341_v12 = vld [vmem:[#allocation36_spill] sm:$0xff]  ;;  %v6342_v55 = vld [vmem:[#allocation37_spill] sm:$0xff] }
 0x57b   :  { %v2310_v58 = vmul.f32 %v4816_v30, %v5792_v21  ;;  %v4818_v21 = vpop.eup %4817  ;;  %v6343_v30 = vld [vmem:[#allocation38_spill] sm:$0xff] }
 0x57d   :  { %v5880_v54 = vadd.f32 %v2311_v11, %v2310_v58  ;;  %4355 = vmatpush1.bf16.msra.mxu0 %v6237_v15  ;;  %4387 = vmatpush1.bf16.msra.mxu1 %v6238_v31  ;;  %v6345_v58 = vld [vmem:[#allocation40_spill] sm:$0xff]  ;;  %v6346_v11 = vld [vmem:[#allocation41_spill] sm:$0xff] }
 0x57e   :  { %4357 = vmatprep.subr.bf16.mxu0 %v5421_v13  ;;  %4389 = vmatprep.subr.bf16.mxu1 %v6239_v17 }
 0x57f   :  { %4819 = vtanh.f32 %v5880_v54 }
 0x581   :  { %4359 = vmatpush1.bf16.msra.mxu0 %v5427_v4  ;;  %4391 = vmatpush1.bf16.msra.mxu1 %v5431_v5 }
 0x582   :  { %4361 = vmatprep.subr.bf16.mxu0 %v5433_v27  ;;  %4393 = vmatprep.subr.bf16.mxu1 %v5436_v63 }
 0x585   :  { %4363 = vmatpush1.bf16.msra.mxu0 %v5439_v2  ;;  %4395 = vmatpush1.bf16.msra.mxu1 %v5443_v1 }
 0x586   :  { %4365 = vmatprep.subr.bf16.mxu0 %v5445_v3  ;;  %4397 = vmatprep.subr.bf16.mxu1 %v5448_v37 }
 0x589   :  { %v4820_v23 = vpop.eup %4819  ;;  %4367 = vmatpush1.bf16.msra.mxu0 %v5451_v6  ;;  %4399 = vmatpush1.bf16.msra.mxu1 %v5455_v50 }
 0x58a   :  { %v2314_v60 = vmul.f32 %v4820_v23, %v4818_v21  ;;  %4401 = vmatprep.subr.bf16.mxu0 %v5083_v20  ;;  %4433 = vmatprep.subr.bf16.mxu1 %v5094_v24  ;;  %v6347_v21 = vld [vmem:[#allocation42_spill] sm:$0xff]  ;;  %v6348_v23 = vld [vmem:[#allocation43_spill] sm:$0xff] }
 0x58c   :  { %3608 = vst [vmem:[%s6095_s5 + $0x6] sm:$0x3] %v2314_v60  ;;  %2584 = vmatmul.mubr.f32.vlgmr.msra.gmra.mrb[22].mxu0 %v2314_v60  ;;  %2655 = vmatmul.mubr.f32.vlgmr.msra.gmra.mrb[22].mxu1 %v2314_v60  ;;  %v6349_v60 = vld [vmem:[#allocation44_spill] sm:$0xff] }
 0x58d   :  { %4403 = vmatpush1.bf16.msra.mxu0 %v5096_v25  ;;  %4435 = vmatpush1.bf16.msra.mxu1 %v5108_v29 }
 0x58e   :  { %4405 = vmatprep.subr.bf16.mxu0 %v5121_v33  ;;  %4437 = vmatprep.subr.bf16.mxu1 %v5123_v34 }
 0x58f   :  { %2783 = vmatprep.mubr.f32.mxu0 %v6214_v49  ;;  %2854 = vmatprep.mubr.f32.mxu1 %v6214_v49 }
 0x591   :  { %4407 = vmatpush1.bf16.msra.mxu0 %v5135_v38  ;;  %4439 = vmatpush1.bf16.msra.mxu1 %v5148_v42 }
 0x592   :  { %4409 = vmatprep.subr.bf16.mxu0 %v5150_v43  ;;  %4441 = vmatprep.subr.bf16.mxu1 %v5161_v47 }
 0x595   :  { %4411 = vmatpush1.bf16.msra.mxu0 %v6330_v45  ;;  %4443 = vmatpush1.bf16.msra.mxu1 %v6331_v59 }
 0x596   :  { %4413 = vmatprep.subr.bf16.mxu0 %v6332_v22  ;;  %4445 = vmatprep.subr.bf16.mxu1 %v6333_v41 }
 0x599   :  { %4415 = vmatpush1.bf16.msra.mxu0 %v6334_v57  ;;  %4447 = vmatpush1.bf16.msra.mxu1 %v6335_v40 }
 0x59a   :  { %4417 = vmatprep.subr.bf16.mxu0 %v6336_v56  ;;  %4449 = vmatprep.subr.bf16.mxu1 %v6337_v48 }
 0x59d   :  { %4419 = vmatpush1.bf16.msra.mxu0 %v6338_v35  ;;  %4451 = vmatpush1.bf16.msra.mxu1 %v6339_v36  ;;  %v6350_v36 = vld [vmem:[#allocation45_spill] sm:$0xff] }
 0x59e   :  { %4421 = vmatprep.subr.bf16.mxu0 %v6340_v0  ;;  %4453 = vmatprep.subr.bf16.mxu1 %v6341_v12  ;;  %v6351_v0 = vld [vmem:[#allocation46_spill] sm:$0xff]  ;;  %v6352_v12 = vld [vmem:[#allocation47_spill] sm:$0xff] }
 0x5a1   :  { %4423 = vmatpush1.bf16.msra.mxu0 %v6342_v55  ;;  %4455 = vmatpush1.bf16.msra.mxu1 %v6343_v30  ;;  %v6353_v55 = vld [vmem:[#allocation48_spill] sm:$0xff] }
 0x5a2   :  { %4425 = vmatprep.subr.bf16.mxu0 %v6344_v61  ;;  %4457 = vmatprep.subr.bf16.mxu1 %v6345_v58 }
 0x5a5   :  { %4427 = vmatpush1.bf16.msra.mxu0 %v6346_v11  ;;  %4459 = vmatpush1.bf16.msra.mxu1 %v6347_v21 }
 0x5a6   :  { %4429 = vmatprep.subr.bf16.mxu0 %v6348_v23  ;;  %4461 = vmatprep.subr.bf16.mxu1 %v6349_v60  ;;  %v6354_v60 = vld [vmem:[#allocation15_spill] sm:$0xff] }
 0x5a9   :  { %4431 = vmatpush1.bf16.msra.mxu0 %v6350_v36  ;;  %4463 = vmatpush1.bf16.msra.mxu1 %v6351_v0 }
 0x5aa   :  { %4465 = vmatprep.subr.bf16.mxu0 %v6352_v12  ;;  %4497 = vmatprep.subr.bf16.mxu1 %v6353_v55 }
 0x63f   :  { %v2385_v30 = vpop.f32.mrb[20].mxu0  ;;  %v2456_v61 = vpop.f32.mrb[20].mxu1 }
 0x640   :  { %v2387_v35 = vpop.f32.mrb[21].mxu0  ;;  %v2458_v58 = vpop.f32.mrb[21].mxu1 }
 0x641   :  { %v2465_v48 = vcombine.low %v2385_v30, %v2387_v35  ;;  %v2466_v11 = vcombine.low %v2456_v61, %v2458_v58 }
 0x643   :  { %v2473_v21 = vrot.slane %v2465_v48, %v6249_v39  ;;  %v2480_v23 = vrot.slane %v2466_v11, %v6249_v39 }
 0x645   :  { %v2481_v56 = vcombine.low %v2473_v21, %v2480_v23 }
 0x647   :  { %v2483_v40 = vadd.f32 %v2481_v56, %v6354_v60 }
 0x649   :  { %v3609_v36 = vmul.f32 -1.442695, %v2483_v40  ;;  %v2491_v57 = vrot.slane %v2483_v40, 2  ;;  %v2502_v12 = vrot.slane %v2483_v40, 6  ;;  %v2499_v22 = vrot.slane %v2483_v40, 4 }
 0x64b   :  { %4821 = vpow2.f32 %v3609_v36  ;;  %v3610_v0 = vmul.f32 -1.442695, %v2491_v57  ;;  %v3611_v55 = vmul.f32 -1.442695, %v2502_v12 }
 0x64d   :  { %4823 = vpow2.f32 %v3610_v0 }
 0x64e   :  { %4825 = vpow2.f32 %v3611_v55 }
 0x655   :  { %v4822_v41 = vpop.eup %4821 }
 0x656   :  { %v2487_v59 = vadd.f32 1.0, %v4822_v41 }
 0x657   :  { %v4824_v45 = vpop.eup %4823 }
 0x658   :  { %4827 = vrcp.f32 %v2487_v59  ;;  %v2496_v35 = vadd.f32 1.0, %v4824_v45  ;;  %v4826_v58 = vpop.eup %4825 }
 0x659   :  { %4829 = vtanh.f32 %v2499_v22  ;;  %v2507_v21 = vadd.f32 1.0, %v4826_v58  ;;  %v6355_v22 = vld [vmem:[#allocation20_spill] sm:$0xff] }
 0x65a   :  { %4831 = vrcp.f32 %v2496_v35 }
 0x65b   :  { %4833 = vrcp.f32 %v2507_v21 }
 0x65f   :  { %v2585_v48 = vpop.f32.mrb[22].mxu0  ;;  %v2656_v30 = vpop.f32.mrb[22].mxu1 }
 0x660   :  { %v2587_v61 = vpop.f32.mrb[23].mxu0  ;;  %v2658_v56 = vpop.f32.mrb[23].mxu1 }
 0x661   :  { %v2665_v11 = vcombine.low %v2585_v48, %v2587_v61  ;;  %v2666_v36 = vcombine.low %v2656_v30, %v2658_v56 }
 0x662   :  { %v4828_v57 = vpop.eup %4827 }
 0x663   :  { %v4830_v0 = vpop.eup %4829  ;;  %v2673_v12 = vrot.slane %v2665_v11, %v6249_v39  ;;  %v2680_v40 = vrot.slane %v2666_v36, %v6249_v39 }
 0x664   :  { %v4832_v41 = vpop.eup %4831  ;;  %v2511_v59 = vmul.f32 %v4830_v0, %v4828_v57 }
 0x665   :  { %v2681_v55 = vcombine.low %v2673_v12, %v2680_v40  ;;  %v2510_v45 = vmul.f32 %v4832_v41, %v5855_v51  ;;  %v4834_v56 = vpop.eup %4833 }
 0x667   :  { %v2683_v23 = vadd.f32 %v6355_v22, %v2681_v55  ;;  %v5943_v60 = vadd.f32 %v2511_v59, %v2510_v45 }
 0x669   :  { %v3613_v35 = vmul.f32 -1.442695, %v2683_v23  ;;  %v2691_v48 = vrot.slane %v2683_v23, 2  ;;  %4835 = vtanh.f32 %v5943_v60  ;;  %v2702_v61 = vrot.slane %v2683_v23, 6 }
 0x66a   :  { %v2699_v12 = vrot.slane %v2683_v23, 4 }
 0x66b   :  { %4837 = vpow2.f32 %v3613_v35  ;;  %v3614_v30 = vmul.f32 -1.442695, %v2691_v48  ;;  %v3615_v11 = vmul.f32 -1.442695, %v2702_v61  ;;  %v6362_v61 = vld [vmem:[#allocation31_spill] sm:$0xff] }
 0x66d   :  { %4839 = vpow2.f32 %v3614_v30 }
 0x66e   :  { %4841 = vpow2.f32 %v3615_v11  ;;  %v6368_v11 = vld [vmem:[#allocation37_spill] sm:$0xff] }
 0x673   :  { %v4836_v58 = vpop.eup %4835 }
 0x674   :  { %v2514_v51 = vmul.f32 %v4836_v58, %v4834_v56  ;;  %v6367_v56 = vld [vmem:[#allocation36_spill] sm:$0xff]  ;;  %v6369_v58 = vld [vmem:[#allocation38_spill] sm:$0xff] }
 0x675   :  { %v4838_v36 = vpop.eup %4837 }
 0x676   :  { %v2687_v57 = vadd.f32 1.0, %v4838_v36  ;;  %3612 = vst [vmem:[%s6094_s4 + $0xa] sm:$0x3] %v2514_v51  ;;  %2784 = vmatmul.mubr.f32.vlgmr.msra.gmra.mrb[24].mxu0 %v2514_v51  ;;  %2855 = vmatmul.mubr.f32.vlgmr.msra.gmra.mrb[24].mxu1 %v2514_v51  ;;  %v6370_v36 = vld [vmem:[#allocation39_spill] sm:$0xff]  ;;  %v6372_v51 = vld [vmem:[#allocation41_spill] sm:$0xff] }
 0x677   :  { %v4840_v0 = vpop.eup %4839  ;;  %4467 = vmatpush1.bf16.msra.mxu0 %v5365_v7  ;;  %4499 = vmatpush1.bf16.msra.mxu1 %v5369_v44 }
 0x678   :  { %4843 = vrcp.f32 %v2687_v57  ;;  %v2696_v40 = vadd.f32 1.0, %v4840_v0  ;;  %4469 = vmatprep.subr.bf16.mxu0 %v5371_v46  ;;  %4501 = vmatprep.subr.bf16.mxu1 %v5374_v53  ;;  %v4842_v41 = vpop.eup %4841  ;;  %v6373_v57 = vld [vmem:[#allocation42_spill] sm:$0xff]  ;;  %v6374_v0 = vld [vmem:[#allocation43_spill] sm:$0xff] }
 0x679   :  { %4845 = vtanh.f32 %v2699_v12  ;;  %2983 = vmatprep.mubr.f32.mxu0 %v6214_v49  ;;  %3054 = vmatprep.mubr.f32.mxu1 %v6214_v49  ;;  %v2707_v59 = vadd.f32 1.0, %v4842_v41  ;;  %v6371_v12 = vld [vmem:[#allocation40_spill] sm:$0xff]  ;;  %v6376_v41 = vld [vmem:[#allocation45_spill] sm:$0xff] }
 0x67a   :  { %4847 = vrcp.f32 %v2696_v40  ;;  %v6375_v40 = vld [vmem:[#allocation44_spill] sm:$0xff] }
 0x67b   :  { %4471 = vmatpush1.bf16.msra.mxu0 %v5377_v19  ;;  %4503 = vmatpush1.bf16.msra.mxu1 %v5381_v16  ;;  %4849 = vrcp.f32 %v2707_v59 }
 0x67c   :  { %4473 = vmatprep.subr.bf16.mxu0 %v6227_v10  ;;  %4505 = vmatprep.subr.bf16.mxu1 %v6228_v26 }
 0x67f   :  { %4475 = vmatpush1.bf16.msra.mxu0 %v6229_v8  ;;  %4507 = vmatpush1.bf16.msra.mxu1 %v6230_v52 }
 0x680   :  { %4477 = vmatprep.subr.bf16.mxu0 %v6231_v14  ;;  %4509 = vmatprep.subr.bf16.mxu1 %v6252_v18 }
 0x682   :  { %v4844_v21 = vpop.eup %4843 }
 0x683   :  { %v4846_v55 = vpop.eup %4845  ;;  %4479 = vmatpush1.bf16.msra.mxu0 %v6233_v62  ;;  %4511 = vmatpush1.bf16.msra.mxu1 %v6234_v32 }
 0x684   :  { %v4848_v45 = vpop.eup %4847  ;;  %4481 = vmatprep.subr.bf16.mxu0 %v6235_v28  ;;  %4513 = vmatprep.subr.bf16.mxu1 %v6236_v9  ;;  %v2711_v23 = vmul.f32 %v4846_v55, %v4844_v21  ;;  %v6377_v21 = vld [vmem:[#allocation46_spill] sm:$0xff]  ;;  %v6378_v55 = vld [vmem:[#allocation47_spill] sm:$0xff] }
 0x685   :  { %v2710_v22 = vmul.f32 %v4848_v45, %v5880_v54  ;;  %v4850_v54 = vpop.eup %4849  ;;  %v6379_v45 = vld [vmem:[#allocation48_spill] sm:$0xff] }
 0x687   :  { %v5968_v35 = vadd.f32 %v2711_v23, %v2710_v22  ;;  %4483 = vmatpush1.bf16.msra.mxu0 %v6237_v15  ;;  %4515 = vmatpush1.bf16.msra.mxu1 %v6238_v31 }
 0x688   :  { %4485 = vmatprep.subr.bf16.mxu0 %v5421_v13  ;;  %4517 = vmatprep.subr.bf16.mxu1 %v6239_v17 }
 0x689   :  { %4851 = vtanh.f32 %v5968_v35 }
 0x68b   :  { %4487 = vmatpush1.bf16.msra.mxu0 %v5427_v4  ;;  %4519 = vmatpush1.bf16.msra.mxu1 %v5431_v5 }
 0x68c   :  { %4489 = vmatprep.subr.bf16.mxu0 %v5433_v27  ;;  %4521 = vmatprep.subr.bf16.mxu1 %v5436_v63 }
 0x68f   :  { %4491 = vmatpush1.bf16.msra.mxu0 %v5439_v2  ;;  %4523 = vmatpush1.bf16.msra.mxu1 %v5443_v1 }
 0x690   :  { %4493 = vmatprep.subr.bf16.mxu0 %v5445_v3  ;;  %4525 = vmatprep.subr.bf16.mxu1 %v5448_v37 }
 0x693   :  { %v4852_v48 = vpop.eup %4851  ;;  %4495 = vmatpush1.bf16.msra.mxu0 %v5451_v6  ;;  %4527 = vmatpush1.bf16.msra.mxu1 %v5455_v50 }
 0x694   :  { %v2714_v30 = vmul.f32 %v4852_v48, %v4850_v54  ;;  %4529 = vmatprep.subr.bf16.mxu0 %v5083_v20  ;;  %4561 = vmatprep.subr.bf16.mxu1 %v5094_v24  ;;  %v6356_v20 = vld [vmem:[#allocation25_spill] sm:$0xff]  ;;  %v6357_v24 = vld [vmem:[#allocation26_spill] sm:$0xff] }
 0x696   :  { %3616 = vst [vmem:[%s6095_s5 + $0x4] sm:$0x3] %v2714_v30  ;;  %2984 = vmatmul.mubr.f32.vlgmr.msra.gmra.mrb[26].mxu0 %v2714_v30  ;;  %3055 = vmatmul.mubr.f32.vlgmr.msra.gmra.mrb[26].mxu1 %v2714_v30 }
 0x697   :  { %4531 = vmatpush1.bf16.msra.mxu0 %v5096_v25  ;;  %4563 = vmatpush1.bf16.msra.mxu1 %v5108_v29  ;;  %v6358_v25 = vld [vmem:[#allocation27_spill] sm:$0xff]  ;;  %v6359_v29 = vld [vmem:[#allocation28_spill] sm:$0xff] }
 0x698   :  { %4533 = vmatprep.subr.bf16.mxu0 %v5121_v33  ;;  %4565 = vmatprep.subr.bf16.mxu1 %v5123_v34  ;;  %v6360_v33 = vld [vmem:[#allocation29_spill] sm:$0xff]  ;;  %v6361_v34 = vld [vmem:[#allocation30_spill] sm:$0xff] }
 0x699   :  { %3183 = vmatprep.mubr.f32.mxu0 %v6214_v49  ;;  %3254 = vmatprep.mubr.f32.mxu1 %v6214_v49 }
 0x69b   :  { %4535 = vmatpush1.bf16.msra.mxu0 %v5135_v38  ;;  %4567 = vmatpush1.bf16.msra.mxu1 %v5148_v42  ;;  %v6363_v38 = vld [vmem:[#allocation32_spill] sm:$0xff]  ;;  %v6364_v42 = vld [vmem:[#allocation33_spill] sm:$0xff] }
 0x69c   :  { %4537 = vmatprep.subr.bf16.mxu0 %v5150_v43  ;;  %4569 = vmatprep.subr.bf16.mxu1 %v5161_v47  ;;  %v6365_v43 = vld [vmem:[#allocation34_spill] sm:$0xff]  ;;  %v6366_v47 = vld [vmem:[#allocation35_spill] sm:$0xff] }
 0x69f   :  { %4539 = vmatpush1.bf16.msra.mxu0 %v6356_v20  ;;  %4571 = vmatpush1.bf16.msra.mxu1 %v6357_v24 }
 0x6a0   :  { %4541 = vmatprep.subr.bf16.mxu0 %v6358_v25  ;;  %4573 = vmatprep.subr.bf16.mxu1 %v6359_v29  ;;  %v6380_v29 = vld [vmem:[#allocation16_spill] sm:$0xff] }
 0x6a3   :  { %4543 = vmatpush1.bf16.msra.mxu0 %v6360_v33  ;;  %4575 = vmatpush1.bf16.msra.mxu1 %v6361_v34 }
 0x6a4   :  { %4545 = vmatprep.subr.bf16.mxu0 %v6362_v61  ;;  %4577 = vmatprep.subr.bf16.mxu1 %v6363_v38 }
 0x6a7   :  { %4547 = vmatpush1.bf16.msra.mxu0 %v6364_v42  ;;  %4579 = vmatpush1.bf16.msra.mxu1 %v6365_v43 }
 0x6a8   :  { %4549 = vmatprep.subr.bf16.mxu0 %v6366_v47  ;;  %4581 = vmatprep.subr.bf16.mxu1 %v6367_v56 }
 0x6ab   :  { %4551 = vmatpush1.bf16.msra.mxu0 %v6368_v11  ;;  %4583 = vmatpush1.bf16.msra.mxu1 %v6369_v58 }
 0x6ac   :  { %4553 = vmatprep.subr.bf16.mxu0 %v6370_v36  ;;  %4585 = vmatprep.subr.bf16.mxu1 %v6371_v12 }
 0x6af   :  { %4555 = vmatpush1.bf16.msra.mxu0 %v6372_v51  ;;  %4587 = vmatpush1.bf16.msra.mxu1 %v6373_v57 }
 0x6b0   :  { %4557 = vmatprep.subr.bf16.mxu0 %v6374_v0  ;;  %4589 = vmatprep.subr.bf16.mxu1 %v6375_v40 }
 0x6b3   :  { %4559 = vmatpush1.bf16.msra.mxu0 %v6376_v41  ;;  %4591 = vmatpush1.bf16.msra.mxu1 %v6377_v21 }
 0x6b4   :  { %4593 = vmatprep.subr.bf16.mxu0 %v6378_v55  ;;  %4625 = vmatprep.subr.bf16.mxu1 %v6379_v45 }
 0x749   :  { %v2785_v59 = vpop.f32.mrb[24].mxu0  ;;  %v2856_v22 = vpop.f32.mrb[24].mxu1 }
 0x74a   :  { %v2787_v23 = vpop.f32.mrb[25].mxu0  ;;  %v2858_v54 = vpop.f32.mrb[25].mxu1 }
 0x74b   :  { %v2865_v48 = vcombine.low %v2785_v59, %v2787_v23  ;;  %v2866_v30 = vcombine.low %v2856_v22, %v2858_v54 }
 0x74d   :  { %v2873_v20 = vrot.slane %v2865_v48, %v6249_v39  ;;  %v2880_v24 = vrot.slane %v2866_v30, %v6249_v39 }
 0x74f   :  { %v2881_v25 = vcombine.low %v2873_v20, %v2880_v24  ;;  %v6381_v24 = vld [vmem:[#allocation19_spill] sm:$0xff] }
 0x751   :  { %v2883_v33 = vadd.f32 %v2881_v25, %v6380_v29 }
 0x753   :  { %v3617_v34 = vmul.f32 -1.442695, %v2883_v33  ;;  %v2891_v61 = vrot.slane %v2883_v33, 2  ;;  %v2902_v42 = vrot.slane %v2883_v33, 6  ;;  %v2899_v56 = vrot.slane %v2883_v33, 4 }
 0x755   :  { %4853 = vpow2.f32 %v3617_v34  ;;  %v3618_v38 = vmul.f32 -1.442695, %v2891_v61  ;;  %v3619_v43 = vmul.f32 -1.442695, %v2902_v42 }
 0x757   :  { %4855 = vpow2.f32 %v3618_v38 }
 0x758   :  { %4857 = vpow2.f32 %v3619_v43 }
 0x75f   :  { %v4854_v47 = vpop.eup %4853 }
 0x760   :  { %v2887_v11 = vadd.f32 1.0, %v4854_v47 }
 0x761   :  { %v4856_v58 = vpop.eup %4855 }
 0x762   :  { %4859 = vrcp.f32 %v2887_v11  ;;  %v2896_v36 = vadd.f32 1.0, %v4856_v58  ;;  %v4858_v40 = vpop.eup %4857 }
 0x763   :  { %4861 = vtanh.f32 %v2899_v56  ;;  %v2907_v54 = vadd.f32 1.0, %v4858_v40 }
 0x764   :  { %4863 = vrcp.f32 %v2896_v36 }
 0x765   :  { %4865 = vrcp.f32 %v2907_v54 }
 0x769   :  { %v2985_v12 = vpop.f32.mrb[26].mxu0  ;;  %v3056_v51 = vpop.f32.mrb[26].mxu1 }
 0x76a   :  { %v2987_v57 = vpop.f32.mrb[27].mxu0  ;;  %v3058_v0 = vpop.f32.mrb[27].mxu1 }
 0x76b   :  { %v3065_v41 = vcombine.low %v2985_v12, %v2987_v57  ;;  %v3066_v21 = vcombine.low %v3056_v51, %v3058_v0 }
 0x76c   :  { %v4860_v55 = vpop.eup %4859 }
 0x76d   :  { %v4862_v45 = vpop.eup %4861  ;;  %v3073_v59 = vrot.slane %v3065_v41, %v6249_v39  ;;  %v3080_v22 = vrot.slane %v3066_v21, %v6249_v39 }
 0x76e   :  { %v4864_v23 = vpop.eup %4863  ;;  %v2911_v20 = vmul.f32 %v4862_v45, %v4860_v55 }
 0x76f   :  { %v3081_v48 = vcombine.low %v3073_v59, %v3080_v22  ;;  %v2910_v30 = vmul.f32 %v4864_v23, %v5943_v60  ;;  %v4866_v42 = vpop.eup %4865 }
 0x771   :  { %v3083_v25 = vadd.f32 %v6381_v24, %v3081_v48  ;;  %v6031_v29 = vadd.f32 %v2911_v20, %v2910_v30 }
 0x773   :  { %v3621_v33 = vmul.f32 -1.442695, %v3083_v25  ;;  %v3091_v34 = vrot.slane %v3083_v25, 2  ;;  %4867 = vtanh.f32 %v6031_v29  ;;  %v3102_v38 = vrot.slane %v3083_v25, 6 }
 0x774   :  { %v3099_v11 = vrot.slane %v3083_v25, 4 }
 0x775   :  { %4869 = vpow2.f32 %v3621_v33  ;;  %v3622_v61 = vmul.f32 -1.442695, %v3091_v34  ;;  %v3623_v43 = vmul.f32 -1.442695, %v3102_v38  ;;  %v6383_v33 = vld [vmem:[#allocation18_spill] sm:$0xff] }
 0x777   :  { %4871 = vpow2.f32 %v3622_v61 }
 0x778   :  { %4873 = vpow2.f32 %v3623_v43 }
 0x77d   :  { %v4868_v47 = vpop.eup %4867 }
 0x77e   :  { %v2914_v60 = vmul.f32 %v4868_v47, %v4866_v42 }
 0x77f   :  { %v4870_v56 = vpop.eup %4869 }
 0x780   :  { %v3087_v58 = vadd.f32 1.0, %v4870_v56  ;;  %3620 = vst [vmem:[%s6094_s4 + $0xc] sm:$0x3] %v2914_v60  ;;  %3184 = vmatmul.mubr.f32.vlgmr.msra.gmra.mrb[28].mxu0 %v2914_v60  ;;  %3255 = vmatmul.mubr.f32.vlgmr.msra.gmra.mrb[28].mxu1 %v2914_v60 }
 0x781   :  { %v4872_v36 = vpop.eup %4871  ;;  %4595 = vmatpush1.bf16.msra.mxu0 %v5365_v7  ;;  %4627 = vmatpush1.bf16.msra.mxu1 %v5369_v44 }
 0x782   :  { %4875 = vrcp.f32 %v3087_v58  ;;  %v3096_v12 = vadd.f32 1.0, %v4872_v36  ;;  %4597 = vmatprep.subr.bf16.mxu0 %v5371_v46  ;;  %4629 = vmatprep.subr.bf16.mxu1 %v5374_v53  ;;  %v4874_v7 = vpop.eup %4873 }
 0x783   :  { %4877 = vtanh.f32 %v3099_v11  ;;  %3382 = vmatprep.mubr.f32.mxu0 %v6214_v49  ;;  %3453 = vmatprep.mubr.f32.mxu1 %v6214_v49  ;;  %v3107_v49 = vadd.f32 1.0, %v4874_v7 }
 0x784   :  { %4879 = vrcp.f32 %v3096_v12 }
 0x785   :  { %4599 = vmatpush1.bf16.msra.mxu0 %v5377_v19  ;;  %4631 = vmatpush1.bf16.msra.mxu1 %v5381_v16  ;;  %4881 = vrcp.f32 %v3107_v49 }
 0x786   :  { %4601 = vmatprep.subr.bf16.mxu0 %v6227_v10  ;;  %4633 = vmatprep.subr.bf16.mxu1 %v6228_v26 }
 0x789   :  { %4603 = vmatpush1.bf16.msra.mxu0 %v6229_v8  ;;  %4635 = vmatpush1.bf16.msra.mxu1 %v6230_v52  ;;  %v6382_v52 = vld [vmem:[#allocation17_spill] sm:$0xff] }
 0x78a   :  { %4605 = vmatprep.subr.bf16.mxu0 %v6231_v14  ;;  %4637 = vmatprep.subr.bf16.mxu1 %v6252_v18 }
 0x78c   :  { %v4876_v44 = vpop.eup %4875 }
 0x78d   :  { %v4878_v46 = vpop.eup %4877  ;;  %4607 = vmatpush1.bf16.msra.mxu0 %v6233_v62  ;;  %4639 = vmatpush1.bf16.msra.mxu1 %v6234_v32 }
 0x78e   :  { %v4880_v53 = vpop.eup %4879  ;;  %4609 = vmatprep.subr.bf16.mxu0 %v6235_v28  ;;  %4641 = vmatprep.subr.bf16.mxu1 %v6236_v9  ;;  %v3111_v16 = vmul.f32 %v4878_v46, %v4876_v44 }
 0x78f   :  { %v3110_v19 = vmul.f32 %v4880_v53, %v5968_v35 }
 0x791   :  { %v6056_v10 = vadd.f32 %v3111_v16, %v3110_v19  ;;  %4611 = vmatpush1.bf16.msra.mxu0 %v6237_v15  ;;  %4643 = vmatpush1.bf16.msra.mxu1 %v6238_v31 }
 0x792   :  { %4613 = vmatprep.subr.bf16.mxu0 %v5421_v13  ;;  %4645 = vmatprep.subr.bf16.mxu1 %v6239_v17  ;;  %v4882_v13 = vpop.eup %4881 }
 0x793   :  { %4883 = vtanh.f32 %v6056_v10 }
 0x795   :  { %4615 = vmatpush1.bf16.msra.mxu0 %v5427_v4  ;;  %4647 = vmatpush1.bf16.msra.mxu1 %v5431_v5 }
 0x796   :  { %4617 = vmatprep.subr.bf16.mxu0 %v5433_v27  ;;  %4649 = vmatprep.subr.bf16.mxu1 %v5436_v63 }
 0x799   :  { %4619 = vmatpush1.bf16.msra.mxu0 %v5439_v2  ;;  %4651 = vmatpush1.bf16.msra.mxu1 %v5443_v1 }
 0x79a   :  { %4621 = vmatprep.subr.bf16.mxu0 %v5445_v3  ;;  %4653 = vmatprep.subr.bf16.mxu1 %v5448_v37 }
 0x79d   :  { %v4884_v26 = vpop.eup %4883  ;;  %4623 = vmatpush1.bf16.msra.mxu0 %v5451_v6  ;;  %4655 = vmatpush1.bf16.msra.mxu1 %v5455_v50 }
 0x79e   :  { %v3114_v4 = vmul.f32 %v4884_v26, %v4882_v13 }
 0x7a0   :  { %3624 = vst [vmem:[%s6095_s5 + $0x2] sm:$0x3] %v3114_v4  ;;  %3383 = vmatmul.mubr.f32.vlgmr.msra.gmra.mrb[30].mxu0 %v3114_v4  ;;  %3454 = vmatmul.mubr.f32.vlgmr.msra.gmra.mrb[30].mxu1 %v3114_v4 }
 0x853   :  { %v3185_v2 = vpop.f32.mrb[28].mxu0  ;;  %v3256_v5 = vpop.f32.mrb[28].mxu1 }
 0x854   :  { %v3187_v27 = vpop.f32.mrb[29].mxu0  ;;  %v3258_v63 = vpop.f32.mrb[29].mxu1 }
 0x855   :  { %v3265_v1 = vcombine.low %v3185_v2, %v3187_v27  ;;  %v3266_v3 = vcombine.low %v3256_v5, %v3258_v63 }
 0x857   :  { %v3273_v37 = vrot.slane %v3265_v1, %v6249_v39  ;;  %v3280_v8 = vrot.slane %v3266_v3, %v6249_v39 }
 0x859   :  { %v3281_v6 = vcombine.low %v3273_v37, %v3280_v8 }
 0x85b   :  { %v3283_v50 = vadd.f32 %v3281_v6, %v6382_v52 }
 0x85d   :  { %v3625_v14 = vmul.f32 -1.442695, %v3283_v50  ;;  %v3291_v31 = vrot.slane %v3283_v50, 2  ;;  %v3302_v32 = vrot.slane %v3283_v50, 6  ;;  %v3299_v15 = vrot.slane %v3283_v50, 4 }
 0x85f   :  { %4885 = vpow2.f32 %v3625_v14  ;;  %v3626_v62 = vmul.f32 -1.442695, %v3291_v31  ;;  %v3627_v28 = vmul.f32 -1.442695, %v3302_v32 }
 0x861   :  { %4887 = vpow2.f32 %v3626_v62 }
 0x862   :  { %4889 = vpow2.f32 %v3627_v28 }
 0x869   :  { %v4886_v9 = vpop.eup %4885 }
 0x86a   :  { %v3287_v17 = vadd.f32 1.0, %v4886_v9 }
 0x86b   :  { %v4888_v18 = vpop.eup %4887 }
 0x86c   :  { %4891 = vrcp.f32 %v3287_v17  ;;  %v3296_v35 = vadd.f32 1.0, %v4888_v18  ;;  %v4890_v41 = vpop.eup %4889 }
 0x86d   :  { %4893 = vtanh.f32 %v3299_v15  ;;  %v3307_v48 = vadd.f32 1.0, %v4890_v41 }
 0x86e   :  { %4895 = vrcp.f32 %v3296_v35 }
 0x86f   :  { %4897 = vrcp.f32 %v3307_v48 }
 0x873   :  { %v3384_v51 = vpop.f32.mrb[30].mxu0  ;;  %v3455_v57 = vpop.f32.mrb[30].mxu1 }
 0x874   :  { %v3386_v0 = vpop.f32.mrb[31].mxu0  ;;  %v3457_v40 = vpop.f32.mrb[31].mxu1 }
 0x875   :  { %v3464_v21 = vcombine.low %v3384_v51, %v3386_v0  ;;  %v3465_v55 = vcombine.low %v3455_v57, %v3457_v40 }
 0x876   :  { %v4892_v45 = vpop.eup %4891 }
 0x877   :  { %v4894_v59 = vpop.eup %4893  ;;  %v3472_v22 = vrot.slane %v3464_v21, %v6249_v39  ;;  %v3479_v23 = vrot.slane %v3465_v55, %v6249_v39 }
 0x878   :  { %v4896_v54 = vpop.eup %4895  ;;  %v3311_v20 = vmul.f32 %v4894_v59, %v4892_v45 }
 0x879   :  { %v3310_v30 = vmul.f32 %v4896_v54, %v6031_v29  ;;  %v3480_v24 = vcombine.low %v3472_v22, %v3479_v23  ;;  %v4898_v47 = vpop.eup %4897 }
 0x87b   :  { %v3312_v25 = vadd.f32 %v3311_v20, %v3310_v30  ;;  %v3482_v34 = vadd.f32 %v6383_v33, %v3480_v24 }
 0x87d   :  { %4899 = vtanh.f32 %v3312_v25  ;;  %3516 = vst [vmem:[#allocation3] sm:$0x3] %v3312_v25  ;;  %v3629_v61 = vmul.f32 -1.442695, %v3482_v34  ;;  %v3490_v38 = vrot.slane %v3482_v34, 2  ;;  %v3501_v43 = vrot.slane %v3482_v34, 6 }
 0x87e   :  { %v3498_v29 = vrot.slane %v3482_v34, 4 }
 0x87f   :  { %4901 = vpow2.f32 %v3629_v61  ;;  %v3630_v42 = vmul.f32 -1.442695, %v3490_v38  ;;  %v3631_v56 = vmul.f32 -1.442695, %v3501_v43 }
 0x881   :  { %4903 = vpow2.f32 %v3630_v42 }
 0x882   :  { %4905 = vpow2.f32 %v3631_v56 }
 0x887   :  { %v4900_v39 = vpop.eup %4899 }
 0x888   :  { %v3314_v11 = vmul.f32 %v4900_v39, %v4898_v47 }
 0x889   :  { %v4902_v60 = vpop.eup %4901 }
 0x88a   :  { %3628 = vst [vmem:[%s6094_s4 + $0xe] sm:$0x3] %v3314_v11  ;;  %3515 = vst [vmem:[#allocation2] sm:$0x3] %v3314_v11  ;;  %v3486_v58 = vadd.f32 1.0, %v4902_v60 }
 0x88b   :  { %v4904_v36 = vpop.eup %4903 }
 0x88c   :  { %4907 = vrcp.f32 %v3486_v58  ;;  %v3495_v12 = vadd.f32 1.0, %v4904_v36  ;;  %v4906_v7 = vpop.eup %4905 }
 0x88d   :  { %4909 = vtanh.f32 %v3498_v29  ;;  %v3506_v49 = vadd.f32 1.0, %v4906_v7 }
 0x88e   :  { %4911 = vrcp.f32 %v3495_v12 }
 0x88f   :  { %4913 = vrcp.f32 %v3506_v49 }
 0x896   :  { %v4908_v44 = vpop.eup %4907 }
 0x897   :  { %v4910_v46 = vpop.eup %4909 }
 0x898   :  { %v4912_v53 = vpop.eup %4911  ;;  %v3510_v16 = vmul.f32 %v4910_v46, %v4908_v44 }
 0x899   :  { %v3509_v19 = vmul.f32 %v4912_v53, %v6056_v10  ;;  %v4914_v26 = vpop.eup %4913 }
 0x89b   :  { %v3511_v13 = vadd.f32 %v3510_v16, %v3509_v19 }
 0x89d   :  { %4915 = vtanh.f32 %v3511_v13  ;;  %3518 = vst [vmem:[#allocation5] sm:$0x3] %v3511_v13 }
 0x8a7   :  { %v4916_v4 = vpop.eup %4915 }
 0x8a8   :  { %v3513_v2 = vmul.f32 %v4916_v4, %v4914_v26 }
 0x8aa   :  { %3514 = vst [vmem:[%s6095_s5] sm:$0x3] %v3513_v2  ;;  %3517 = vst [vmem:[#allocation4] sm:$0x3] %v3513_v2 }
 0x8ab   :  { %3541 = vsyncpa [#allocation9], 1 }

</bundles_post_ra>
